<compile_context>
chip_gen: v7x
topology: tpu7x:2x2x1
jax: 0.10.0
libtpu: 0.0.40
codegen_flags: <defaults>
</compile_context>

<pallas_src>
import functools

import jax
import jax.numpy as jnp
from jax import lax
from jax.experimental import pallas as pl
from jax.experimental.pallas import tpu as pltpu

BN_EPS = 1e-5
LANE = 128                       # pad channel dims to a multiple of the 128-lane width
VMEM_LIMIT = 48 * 1024 * 1024    # safe for v5e/v6e (128 MiB) and v7x (64 MiB) VMEM


def _round_up(x, m):
    return (x + m - 1) // m * m


def _pick_row_tile(h, w, c, out_bytes=4, budget_bytes=2 * 1024 * 1024):
    """Largest divisor of h whose [th, W, C] f32 output tile stays under budget.
    Prefers tiles whose flattened row count (th*W) is sublane-aligned (mult of 8)."""
    max_rows = max(1, budget_bytes // max(1, w * c * out_bytes))
    best, best_aligned = 1, 0
    for d in range(1, h + 1):
        if h % d == 0 and d <= max_rows:
            best = d
            if (d * w) % 8 == 0:
                best_aligned = d
    return best_aligned if best_aligned else best


def _pick_m_tile(m, cap=4096):
    """Largest divisor of m <= cap for the elementwise pass; prefer multiples of 8."""
    best, best_aligned = 1, 0
    for d in range(1, min(m, cap) + 1):
        if m % d == 0:
            best = d
            if d % 8 == 0:
                best_aligned = d
    return best_aligned if best_aligned else best


# -----------------------------------------------------------------------------
# Kernel 1: 3x3 conv as 9 shifted bf16 MXU matmuls + f32 per-channel BN stats
# -----------------------------------------------------------------------------
def _conv3x3_stats_kernel(x_ref, w_ref, y_ref, sum_ref, sq_ref, *, th, ow):
    # x_ref:   [1, H+2, W+2, Cin_p]  bf16 — whole padded image, resident across hb
    # w_ref:   [3, 3, Cin_p, Cout_p] bf16 — resident across the whole grid
    # y_ref:   [1, th*W, Cout_p]     f32  — raw conv output rows for this block
    # sum/sq:  [1, 1, Cout_p]        f32  — per-image channel sum / sum-of-squares,
    #                                        accumulated over the hb ("arbitrary") axis
    hb = pl.program_id(1)
    row0 = hb * th
    cin = w_ref.shape[2]
    cout = w_ref.shape[3]

    acc = jnp.zeros((th * ow, cout), jnp.float32)
    for dh in range(3):            # unrolled 9-tap conv -> 9 MXU matmuls, f32 accum
        for dw in range(3):
            # H+2 axis is not a (sublane, lane) tiled dim -> dynamic row start is
            # just address arithmetic; only the dw column shift costs an XLU relayout.
            win = x_ref[0, pl.ds(row0 + dh, th), pl.ds(dw, ow), :]   # [th, W, Cin_p] bf16
            win = win.reshape(th * ow, cin)
            acc = acc + jnp.dot(win, w_ref[dh, dw],
                                preferred_element_type=jnp.float32)

    # Lane-dense (Cout_p multiple of 128) raw conv output for the normalize pass.
    y_ref[...] = acc.reshape(1, th * ow, cout)

    # Two-pass BN: accumulate per-channel sum / sum-of-squares across row blocks.
    @pl.when(hb == 0)
    def _():
        sum_ref[...] = jnp.zeros_like(sum_ref)
        sq_ref[...] = jnp.zeros_like(sq_ref)

    # Sublane reductions go to the XLU slot (hidden under MXU work).
    sum_ref[...] += jnp.sum(acc, axis=0, keepdims=True).reshape(1, 1, cout)
    sq_ref[...] += jnp.sum(acc * acc, axis=0, keepdims=True).reshape(1, 1, cout)


def _conv3x3_stats(x_pad, w_k, th):
    n, hp2, wp2, cin = x_pad.shape
    h, wid = hp2 - 2, wp2 - 2
    cout = w_k.shape[3]
    n_hb = h // th

    kernel = functools.partial(_conv3x3_stats_kernel, th=th, ow=wid)

    flops = 2 * n * h * wid * 9 * cin * cout
    bytes_accessed = (x_pad.size * 2 + w_k.size * 2
                      + n * h * wid * cout * 4 + 2 * n * cout * 4)

    return pl.pallas_call(
        kernel,
        out_shape=(
            jax.ShapeDtypeStruct((n, h * wid, cout), jnp.float32),   # raw conv output
            jax.ShapeDtypeStruct((n, 1, cout), jnp.float32),         # per-image sum
            jax.ShapeDtypeStruct((n, 1, cout), jnp.float32),         # per-image sum of squares
        ),
        grid_spec=pltpu.PrefetchScalarGridSpec(
            num_scalar_prefetch=0,
            grid=(n, n_hb),
            in_specs=[
                # Full padded image; index ignores hb -> stays resident in VMEM.
                pl.BlockSpec((1, hp2, wp2, cin), lambda i, j: (i, 0, 0, 0)),
                # Weights resident for the whole grid.
                pl.BlockSpec((3, 3, cin, cout), lambda i, j: (0, 0, 0, 0)),
            ],
            out_specs=(
                pl.BlockSpec((1, th * wid, cout), lambda i, j: (i, j, 0)),
                pl.BlockSpec((1, 1, cout), lambda i, j: (i, 0, 0)),
                pl.BlockSpec((1, 1, cout), lambda i, j: (i, 0, 0)),
            ),
        ),
        compiler_params=pltpu.CompilerParams(
            # batch axis parallel (megacore / v7x 2-TC sharding); row-block axis
            # is the stats-accumulation axis -> arbitrary.
            dimension_semantics=("parallel", "arbitrary"),
            vmem_limit_bytes=VMEM_LIMIT,
        ),
        cost_estimate=pl.CostEstimate(flops=flops, transcendentals=0,
                                      bytes_accessed=bytes_accessed),
    )(x_pad, w_k)


# -----------------------------------------------------------------------------
# Kernel 2: fused BatchNorm (folded scale/shift) + ReLU, tiled elementwise
# -----------------------------------------------------------------------------
def _bn_relu_kernel(y_ref, scale_ref, shift_ref, o_ref):
    y = y_ref[...]
    o_ref[...] = jnp.maximum(y * scale_ref[...] + shift_ref[...], 0.0).astype(o_ref.dtype)


def _bn_relu_apply(y2d, scale, shift, out_dtype):
    m, c = y2d.shape
    tm = _pick_m_tile(m)
    out_bytes = jnp.dtype(out_dtype).itemsize
    bytes_accessed = m * c * 4 + 2 * c * 4 + m * c * out_bytes
    return pl.pallas_call(
        _bn_relu_kernel,
        out_shape=jax.ShapeDtypeStruct((m, c), out_dtype),
        grid_spec=pltpu.PrefetchScalarGridSpec(
            num_scalar_prefetch=0,
            grid=(m // tm,),
            in_specs=[
                pl.BlockSpec((tm, c), lambda i: (i, 0)),
                pl.BlockSpec((1, c), lambda i: (0, 0)),   # resident scale
                pl.BlockSpec((1, c), lambda i: (0, 0)),   # resident shift
            ],
            out_specs=pl.BlockSpec((tm, c), lambda i: (i, 0)),
        ),
        compiler_params=pltpu.CompilerParams(
            dimension_semantics=("parallel",),
            vmem_limit_bytes=VMEM_LIMIT,
        ),
        cost_estimate=pl.CostEstimate(flops=2 * m * c, transcendentals=0,
                                      bytes_accessed=bytes_accessed),
    )(y2d, scale, shift)


# -----------------------------------------------------------------------------
# conv3x3 -> BN(train-mode batch stats) -> ReLU stage
# -----------------------------------------------------------------------------
def _conv_bn_relu_stage(x_pad, w_k, gamma_p, beta_p, out_dtype):
    n, hp2, wp2, _ = x_pad.shape
    h, wid = hp2 - 2, wp2 - 2
    c = w_k.shape[3]
    th = _pick_row_tile(h, wid, c)

    y_raw, ysum, ysq = _conv3x3_stats(x_pad, w_k, th)     # [N,H*W,C] f32, [N,1,C], [N,1,C]

    m = n * h * wid
    total_sum = jnp.sum(ysum, axis=0)                      # [1, C] f32
    total_sq = jnp.sum(ysq, axis=0)                        # [1, C] f32
    mean = total_sum / m
    var = jnp.maximum(total_sq / m - mean * mean, 0.0)     # biased var (nn.BatchNorm2d train)
    inv = lax.rsqrt(var + BN_EPS)
    scale = gamma_p * inv                                  # fold BN affine into scale/shift
    shift = beta_p - mean * scale

    y_act = _bn_relu_apply(y_raw.reshape(m, c), scale, shift, out_dtype)
    return y_act.reshape(n, h, wid, c)


def vgg_block_forward(x_nchw, params, *, out_channels):
    w1, w2 = params["w1"], params["w2"]
    g1, be1, g2, be2 = params["g1"], params["be1"], params["g2"], params["be2"]
    cin_p = w1.shape[2]

    n, cin, h, wid = x_nchw.shape
    x = jnp.transpose(x_nchw, (0, 2, 3, 1)).astype(jnp.bfloat16)    # NCHW -> NHWC, bf16 MXU input
    x = jnp.pad(x, ((0, 0), (1, 1), (1, 1), (0, cin_p - cin)))      # 1-px halo + lane pad to 128

    # conv1 -> BN1 -> ReLU (intermediate kept bf16: it only feeds conv2's bf16 matmul)
    y1 = _conv_bn_relu_stage(x, w1, g1, be1, jnp.bfloat16)
    y1 = jnp.pad(y1, ((0, 0), (1, 1), (1, 1), (0, 0)))              # halo for conv2

    # conv2 -> BN2 -> ReLU (final output f32)
    y2 = _conv_bn_relu_stage(y1, w2, g2, be2, jnp.float32)

    y2 = y2[..., :out_channels]
    return jnp.transpose(y2, (0, 3, 1, 2))                          # NHWC -> NCHW


def prepare_params(w1, g1, be1, w2, g2, be2):
    """Conv weights -> [3,3,Cin_p,Cout_p] bf16 (lane-padded); BN affine -> [1,C_p] f32.
    Conv biases are intentionally omitted: they are exactly cancelled by the BN
    batch-mean subtraction, so the forward output is unchanged."""
    def prep_w(w_oihw):
        cout, cin = w_oihw.shape[0], w_oihw.shape[1]
        cin_p, cout_p = _round_up(cin, LANE), _round_up(cout, LANE)
        wk = jnp.transpose(w_oihw, (2, 3, 1, 0))                     # [3,3,Cin,Cout]
        wk = jnp.pad(wk, ((0, 0), (0, 0), (0, cin_p - cin), (0, cout_p - cout)))
        return wk.astype(jnp.bfloat16)

    def prep_v(v):
        c_p = _round_up(v.shape[0], LANE)
        return jnp.pad(v.astype(jnp.float32), (0, c_p - v.shape[0])).reshape(1, c_p)

    return {"w1": prep_w(w1), "g1": prep_v(g1), "be1": prep_v(be1),
            "w2": prep_w(w2), "g2": prep_v(g2), "be2": prep_v(be2)}


# ------------------------- reference (mirrors kernel precision) -------------------------
def _ref_forward(x, w1, b1, g1, be1, w2, b2, g2, be2):
    # Same math as the PyTorch module; conv inputs cast to bf16 with f32 accumulation
    # to mirror the kernel's MXU precision (BN math stays f32).
    def conv(xx, w, b):
        y = lax.conv_general_dilated(
            xx.astype(jnp.bfloat16), w.astype(jnp.bfloat16), (1, 1), ((1, 1), (1, 1)),
            dimension_numbers=("NCHW", "OIHW", "NCHW"),
            preferred_element_type=jnp.float32)
        return y + b[None, :, None, None]

    def bn_relu(y, g, be):
        mean = jnp.mean(y, axis=(0, 2, 3), keepdims=True)
        var = jnp.mean((y - mean) ** 2, axis=(0, 2, 3), keepdims=True)
        out = g[None, :, None, None] * (y - mean) / jnp.sqrt(var + BN_EPS) + be[None, :, None, None]
        return jnp.maximum(out, 0.0)

    y = bn_relu(conv(x, w1, b1), g1, be1)
    y = bn_relu(conv(y, w2, b2), g2, be2)
    return y


if __name__ == "__main__":
    N, Cin, Cmid, Cout, H, W = 2, 4, 8, 8, 16, 16

    key = jax.random.PRNGKey(0)
    ks = jax.random.split(key, 9)
    x = jax.random.normal(ks[0], (N, Cin, H, W), jnp.float32)

    w1 = jax.random.normal(ks[1], (Cmid, Cin, 3, 3), jnp.float32) * 0.2
    b1 = jax.random.normal(ks[2], (Cmid,), jnp.float32) * 0.1
    g1 = 1.0 + 0.1 * jax.random.normal(ks[3], (Cmid,), jnp.float32)
    be1 = 0.1 * jax.random.normal(ks[4], (Cmid,), jnp.float32)

    w2 = jax.random.normal(ks[5], (Cout, Cmid, 3, 3), jnp.float32) * 0.2
    b2 = jax.random.normal(ks[6], (Cout,), jnp.float32) * 0.1
    g2 = 1.0 + 0.1 * jax.random.normal(ks[7], (Cout,), jnp.float32)
    be2 = 0.1 * jax.random.normal(ks[8], (Cout,), jnp.float32)

    params = prepare_params(w1, g1, be1, w2, g2, be2)

    fwd = jax.jit(functools.partial(vgg_block_forward, out_channels=Cout))
    out = jax.block_until_ready(fwd(x, params))

    ref = _ref_forward(x, w1, b1, g1, be1, w2, b2, g2, be2)
    assert out.shape == (N, Cout, H, W), out.shape
    max_err = float(jnp.max(jnp.abs(out - ref)))
    assert jnp.allclose(out, ref, atol=2e-2, rtol=2e-2), max_err   # bf16 MXU inputs

    print("KERNEL_OK")
</pallas_src>

<mosaic_0001>
module attributes {stable_mosaic.version = 11 : i64} {
  func.func @_conv3x3_stats_kernel(%arg0: i32, %arg1: i32, %arg2: memref<1x18x18x128xbf16, #tpu.memory_space<vmem>>, %arg3: memref<3x3x128x128xbf16, #tpu.memory_space<vmem>>, %arg4: memref<1x256x128xf32, #tpu.memory_space<vmem>>, %arg5: memref<1x1x128xf32, #tpu.memory_space<vmem>>, %arg6: memref<1x1x128xf32, #tpu.memory_space<vmem>>) attributes {dimension_semantics = [#tpu.dimension_semantics<parallel>, #tpu.dimension_semantics<arbitrary>], iteration_bounds = array<i64: 2, 1>, scalar_prefetch = 0 : i64, scratch_operands = 0 : i64, tpu.core_type = #tpu.core_type<tc>, window_params = [{transform_indices = @transform_0, window_bounds = array<i64: 1, 18, 18, 128>}, {pipeline_mode = #tpu.pipeline_mode<synchronous>, transform_indices = @transform_1, window_bounds = array<i64: 3, 3, 128, 128>}, {transform_indices = @transform_2, window_bounds = array<i64: 1, 256, 128>}, {transform_indices = @transform_3, window_bounds = array<i64: 1, 1, 128>}, {transform_indices = @transform_4, window_bounds = array<i64: 1, 1, 128>}]} {
    %c16_i32 = arith.constant 16 : i32
    %0 = arith.muli %arg1, %c16_i32 : i32
    %cst = arith.constant 0.000000e+00 : f32
    %1 = vector.broadcast %cst : f32 to vector<256x128xf32>
    %c0_i32 = arith.constant 0 : i32
    %2 = arith.addi %0, %c0_i32 : i32
    %c0 = arith.constant 0 : index
    %3 = arith.index_cast %2 : i32 to index
    %c0_0 = arith.constant 0 : index
    %c0_1 = arith.constant 0 : index
    %4 = vector.load %arg2[%c0, %3, %c0_0, %c0_1] : memref<1x18x18x128xbf16, #tpu.memory_space<vmem>>, vector<1x16x16x128xbf16>
    %5 = vector.shape_cast %4 : vector<1x16x16x128xbf16> to vector<16x16x128xbf16>
    %6 = vector.shape_cast %5 : vector<16x16x128xbf16> to vector<256x128xbf16>
    %c0_2 = arith.constant 0 : index
    %c0_3 = arith.constant 0 : index
    %c0_4 = arith.constant 0 : index
    %c0_5 = arith.constant 0 : index
    %7 = vector.load %arg3[%c0_2, %c0_3, %c0_4, %c0_5] : memref<3x3x128x128xbf16, #tpu.memory_space<vmem>>, vector<1x1x128x128xbf16>
    %8 = vector.shape_cast %7 : vector<1x1x128x128xbf16> to vector<128x128xbf16>
    %cst_6 = arith.constant dense<0.000000e+00> : vector<256x128xf32>
    %9 = tpu.matmul %6, %8, %cst_6 {dimension_numbers = #tpu.dot_dimension_numbers<[1], [0], [0], [1], [0, 0, 1, 1], [], []>} : vector<256x128xbf16>, vector<128x128xbf16>, vector<256x128xf32> -> vector<256x128xf32>
    %10 = arith.addf %1, %9 : vector<256x128xf32>
    %c0_i32_7 = arith.constant 0 : i32
    %11 = arith.addi %0, %c0_i32_7 : i32
    %c0_8 = arith.constant 0 : index
    %12 = arith.index_cast %11 : i32 to index
    %c1 = arith.constant 1 : index
    %c0_9 = arith.constant 0 : index
    %13 = vector.load %arg2[%c0_8, %12, %c1, %c0_9] : memref<1x18x18x128xbf16, #tpu.memory_space<vmem>>, vector<1x16x16x128xbf16>
    %14 = vector.shape_cast %13 : vector<1x16x16x128xbf16> to vector<16x16x128xbf16>
    %15 = vector.shape_cast %14 : vector<16x16x128xbf16> to vector<256x128xbf16>
    %c0_10 = arith.constant 0 : index
    %c1_11 = arith.constant 1 : index
    %c0_12 = arith.constant 0 : index
    %c0_13 = arith.constant 0 : index
    %16 = vector.load %arg3[%c0_10, %c1_11, %c0_12, %c0_13] : memref<3x3x128x128xbf16, #tpu.memory_space<vmem>>, vector<1x1x128x128xbf16>
    %17 = vector.shape_cast %16 : vector<1x1x128x128xbf16> to vector<128x128xbf16>
    %cst_14 = arith.constant dense<0.000000e+00> : vector<256x128xf32>
    %18 = tpu.matmul %15, %17, %cst_14 {dimension_numbers = #tpu.dot_dimension_numbers<[1], [0], [0], [1], [0, 0, 1, 1], [], []>} : vector<256x128xbf16>, vector<128x128xbf16>, vector<256x128xf32> -> vector<256x128xf32>
    %19 = arith.addf %10, %18 : vector<256x128xf32>
    %c0_i32_15 = arith.constant 0 : i32
    %20 = arith.addi %0, %c0_i32_15 : i32
    %c0_16 = arith.constant 0 : index
    %21 = arith.index_cast %20 : i32 to index
    %c2 = arith.constant 2 : index
    %c0_17 = arith.constant 0 : index
    %22 = vector.load %arg2[%c0_16, %21, %c2, %c0_17] : memref<1x18x18x128xbf16, #tpu.memory_space<vmem>>, vector<1x16x16x128xbf16>
    %23 = vector.shape_cast %22 : vector<1x16x16x128xbf16> to vector<16x16x128xbf16>
    %24 = vector.shape_cast %23 : vector<16x16x128xbf16> to vector<256x128xbf16>
    %c0_18 = arith.constant 0 : index
    %c2_19 = arith.constant 2 : index
    %c0_20 = arith.constant 0 : index
    %c0_21 = arith.constant 0 : index
    %25 = vector.load %arg3[%c0_18, %c2_19, %c0_20, %c0_21] : memref<3x3x128x128xbf16, #tpu.memory_space<vmem>>, vector<1x1x128x128xbf16>
    %26 = vector.shape_cast %25 : vector<1x1x128x128xbf16> to vector<128x128xbf16>
    %cst_22 = arith.constant dense<0.000000e+00> : vector<256x128xf32>
    %27 = tpu.matmul %24, %26, %cst_22 {dimension_numbers = #tpu.dot_dimension_numbers<[1], [0], [0], [1], [0, 0, 1, 1], [], []>} : vector<256x128xbf16>, vector<128x128xbf16>, vector<256x128xf32> -> vector<256x128xf32>
    %28 = arith.addf %19, %27 : vector<256x128xf32>
    %c1_i32 = arith.constant 1 : i32
    %29 = arith.addi %0, %c1_i32 : i32
    %c0_23 = arith.constant 0 : index
    %30 = arith.index_cast %29 : i32 to index
    %c0_24 = arith.constant 0 : index
    %c0_25 = arith.constant 0 : index
    %31 = vector.load %arg2[%c0_23, %30, %c0_24, %c0_25] : memref<1x18x18x128xbf16, #tpu.memory_space<vmem>>, vector<1x16x16x128xbf16>
    %32 = vector.shape_cast %31 : vector<1x16x16x128xbf16> to vector<16x16x128xbf16>
    %33 = vector.shape_cast %32 : vector<16x16x128xbf16> to vector<256x128xbf16>
    %c1_26 = arith.constant 1 : index
    %c0_27 = arith.constant 0 : index
    %c0_28 = arith.constant 0 : index
    %c0_29 = arith.constant 0 : index
    %34 = vector.load %arg3[%c1_26, %c0_27, %c0_28, %c0_29] : memref<3x3x128x128xbf16, #tpu.memory_space<vmem>>, vector<1x1x128x128xbf16>
    %35 = vector.shape_cast %34 : vector<1x1x128x128xbf16> to vector<128x128xbf16>
    %cst_30 = arith.constant dense<0.000000e+00> : vector<256x128xf32>
    %36 = tpu.matmul %33, %35, %cst_30 {dimension_numbers = #tpu.dot_dimension_numbers<[1], [0], [0], [1], [0, 0, 1, 1], [], []>} : vector<256x128xbf16>, vector<128x128xbf16>, vector<256x128xf32> -> vector<256x128xf32>
    %37 = arith.addf %28, %36 : vector<256x128xf32>
    %c1_i32_31 = arith.constant 1 : i32
    %38 = arith.addi %0, %c1_i32_31 : i32
    %c0_32 = arith.constant 0 : index
    %39 = arith.index_cast %38 : i32 to index
    %c1_33 = arith.constant 1 : index
    %c0_34 = arith.constant 0 : index
    %40 = vector.load %arg2[%c0_32, %39, %c1_33, %c0_34] : memref<1x18x18x128xbf16, #tpu.memory_space<vmem>>, vector<1x16x16x128xbf16>
    %41 = vector.shape_cast %40 : vector<1x16x16x128xbf16> to vector<16x16x128xbf16>
    %42 = vector.shape_cast %41 : vector<16x16x128xbf16> to vector<256x128xbf16>
    %c1_35 = arith.constant 1 : index
    %c1_36 = arith.constant 1 : index
    %c0_37 = arith.constant 0 : index
    %c0_38 = arith.constant 0 : index
    %43 = vector.load %arg3[%c1_35, %c1_36, %c0_37, %c0_38] : memref<3x3x128x128xbf16, #tpu.memory_space<vmem>>, vector<1x1x128x128xbf16>
    %44 = vector.shape_cast %43 : vector<1x1x128x128xbf16> to vector<128x128xbf16>
    %cst_39 = arith.constant dense<0.000000e+00> : vector<256x128xf32>
    %45 = tpu.matmul %42, %44, %cst_39 {dimension_numbers = #tpu.dot_dimension_numbers<[1], [0], [0], [1], [0, 0, 1, 1], [], []>} : vector<256x128xbf16>, vector<128x128xbf16>, vector<256x128xf32> -> vector<256x128xf32>
    %46 = arith.addf %37, %45 : vector<256x128xf32>
    %c1_i32_40 = arith.constant 1 : i32
    %47 = arith.addi %0, %c1_i32_40 : i32
    %c0_41 = arith.constant 0 : index
    %48 = arith.index_cast %47 : i32 to index
    %c2_42 = arith.constant 2 : index
    %c0_43 = arith.constant 0 : index
    %49 = vector.load %arg2[%c0_41, %48, %c2_42, %c0_43] : memref<1x18x18x128xbf16, #tpu.memory_space<vmem>>, vector<1x16x16x128xbf16>
    %50 = vector.shape_cast %49 : vector<1x16x16x128xbf16> to vector<16x16x128xbf16>
    %51 = vector.shape_cast %50 : vector<16x16x128xbf16> to vector<256x128xbf16>
    %c1_44 = arith.constant 1 : index
    %c2_45 = arith.constant 2 : index
    %c0_46 = arith.constant 0 : index
    %c0_47 = arith.constant 0 : index
    %52 = vector.load %arg3[%c1_44, %c2_45, %c0_46, %c0_47] : memref<3x3x128x128xbf16, #tpu.memory_space<vmem>>, vector<1x1x128x128xbf16>
    %53 = vector.shape_cast %52 : vector<1x1x128x128xbf16> to vector<128x128xbf16>
    %cst_48 = arith.constant dense<0.000000e+00> : vector<256x128xf32>
    %54 = tpu.matmul %51, %53, %cst_48 {dimension_numbers = #tpu.dot_dimension_numbers<[1], [0], [0], [1], [0, 0, 1, 1], [], []>} : vector<256x128xbf16>, vector<128x128xbf16>, vector<256x128xf32> -> vector<256x128xf32>
    %55 = arith.addf %46, %54 : vector<256x128xf32>
    %c2_i32 = arith.constant 2 : i32
    %56 = arith.addi %0, %c2_i32 : i32
    %c0_49 = arith.constant 0 : index
    %57 = arith.index_cast %56 : i32 to index
    %c0_50 = arith.constant 0 : index
    %c0_51 = arith.constant 0 : index
    %58 = vector.load %arg2[%c0_49, %57, %c0_50, %c0_51] : memref<1x18x18x128xbf16, #tpu.memory_space<vmem>>, vector<1x16x16x128xbf16>
    %59 = vector.shape_cast %58 : vector<1x16x16x128xbf16> to vector<16x16x128xbf16>
    %60 = vector.shape_cast %59 : vector<16x16x128xbf16> to vector<256x128xbf16>
    %c2_52 = arith.constant 2 : index
    %c0_53 = arith.constant 0 : index
    %c0_54 = arith.constant 0 : index
    %c0_55 = arith.constant 0 : index
    %61 = vector.load %arg3[%c2_52, %c0_53, %c0_54, %c0_55] : memref<3x3x128x128xbf16, #tpu.memory_space<vmem>>, vector<1x1x128x128xbf16>
    %62 = vector.shape_cast %61 : vector<1x1x128x128xbf16> to vector<128x128xbf16>
    %cst_56 = arith.constant dense<0.000000e+00> : vector<256x128xf32>
    %63 = tpu.matmul %60, %62, %cst_56 {dimension_numbers = #tpu.dot_dimension_numbers<[1], [0], [0], [1], [0, 0, 1, 1], [], []>} : vector<256x128xbf16>, vector<128x128xbf16>, vector<256x128xf32> -> vector<256x128xf32>
    %64 = arith.addf %55, %63 : vector<256x128xf32>
    %c2_i32_57 = arith.constant 2 : i32
    %65 = arith.addi %0, %c2_i32_57 : i32
    %c0_58 = arith.constant 0 : index
    %66 = arith.index_cast %65 : i32 to index
    %c1_59 = arith.constant 1 : index
    %c0_60 = arith.constant 0 : index
    %67 = vector.load %arg2[%c0_58, %66, %c1_59, %c0_60] : memref<1x18x18x128xbf16, #tpu.memory_space<vmem>>, vector<1x16x16x128xbf16>
    %68 = vector.shape_cast %67 : vector<1x16x16x128xbf16> to vector<16x16x128xbf16>
    %69 = vector.shape_cast %68 : vector<16x16x128xbf16> to vector<256x128xbf16>
    %c2_61 = arith.constant 2 : index
    %c1_62 = arith.constant 1 : index
    %c0_63 = arith.constant 0 : index
    %c0_64 = arith.constant 0 : index
    %70 = vector.load %arg3[%c2_61, %c1_62, %c0_63, %c0_64] : memref<3x3x128x128xbf16, #tpu.memory_space<vmem>>, vector<1x1x128x128xbf16>
    %71 = vector.shape_cast %70 : vector<1x1x128x128xbf16> to vector<128x128xbf16>
    %cst_65 = arith.constant dense<0.000000e+00> : vector<256x128xf32>
    %72 = tpu.matmul %69, %71, %cst_65 {dimension_numbers = #tpu.dot_dimension_numbers<[1], [0], [0], [1], [0, 0, 1, 1], [], []>} : vector<256x128xbf16>, vector<128x128xbf16>, vector<256x128xf32> -> vector<256x128xf32>
    %73 = arith.addf %64, %72 : vector<256x128xf32>
    %c2_i32_66 = arith.constant 2 : i32
    %74 = arith.addi %0, %c2_i32_66 : i32
    %c0_67 = arith.constant 0 : index
    %75 = arith.index_cast %74 : i32 to index
    %c2_68 = arith.constant 2 : index
    %c0_69 = arith.constant 0 : index
    %76 = vector.load %arg2[%c0_67, %75, %c2_68, %c0_69] : memref<1x18x18x128xbf16, #tpu.memory_space<vmem>>, vector<1x16x16x128xbf16>
    %77 = vector.shape_cast %76 : vector<1x16x16x128xbf16> to vector<16x16x128xbf16>
    %78 = vector.shape_cast %77 : vector<16x16x128xbf16> to vector<256x128xbf16>
    %c2_70 = arith.constant 2 : index
    %c2_71 = arith.constant 2 : index
    %c0_72 = arith.constant 0 : index
    %c0_73 = arith.constant 0 : index
    %79 = vector.load %arg3[%c2_70, %c2_71, %c0_72, %c0_73] : memref<3x3x128x128xbf16, #tpu.memory_space<vmem>>, vector<1x1x128x128xbf16>
    %80 = vector.shape_cast %79 : vector<1x1x128x128xbf16> to vector<128x128xbf16>
    %cst_74 = arith.constant dense<0.000000e+00> : vector<256x128xf32>
    %81 = tpu.matmul %78, %80, %cst_74 {dimension_numbers = #tpu.dot_dimension_numbers<[1], [0], [0], [1], [0, 0, 1, 1], [], []>} : vector<256x128xbf16>, vector<128x128xbf16>, vector<256x128xf32> -> vector<256x128xf32>
    %82 = arith.addf %73, %81 : vector<256x128xf32>
    %83 = vector.shape_cast %82 : vector<256x128xf32> to vector<1x256x128xf32>
    %c0_75 = arith.constant 0 : index
    %c0_76 = arith.constant 0 : index
    %c0_77 = arith.constant 0 : index
    %84 = vector.load %arg4[%c0_75, %c0_76, %c0_77] : memref<1x256x128xf32, #tpu.memory_space<vmem>>, vector<1x256x128xf32>
    tpu.vector_store %arg4[%c0_75, %c0_76, %c0_77], %83 {strides = array<i32>} : memref<1x256x128xf32, #tpu.memory_space<vmem>>, vector<1x256x128xf32>,
    %c0_i32_78 = arith.constant 0 : i32
    %85 = arith.cmpi eq, %arg1, %c0_i32_78 : i32
    %86 = arith.extui %85 : i1 to i32
    %c0_i32_79 = arith.constant 0 : i32
    %87 = arith.cmpi ne, %86, %c0_i32_79 : i32
    scf.if %87 {
      %cst_94 = arith.constant 0.000000e+00 : f32
      %101 = vector.broadcast %cst_94 : f32 to vector<1x1x128xf32>
      %c0_95 = arith.constant 0 : index
      %c0_96 = arith.constant 0 : index
      %c0_97 = arith.constant 0 : index
      %102 = vector.load %arg5[%c0_95, %c0_96, %c0_97] : memref<1x1x128xf32, #tpu.memory_space<vmem>>, vector<1x1x128xf32>
      tpu.vector_store %arg5[%c0_95, %c0_96, %c0_97], %101 {strides = array<i32>} : memref<1x1x128xf32, #tpu.memory_space<vmem>>, vector<1x1x128xf32>,
      %cst_98 = arith.constant 0.000000e+00 : f32
      %103 = vector.broadcast %cst_98 : f32 to vector<1x1x128xf32>
      %c0_99 = arith.constant 0 : index
      %c0_100 = arith.constant 0 : index
      %c0_101 = arith.constant 0 : index
      %104 = vector.load %arg6[%c0_99, %c0_100, %c0_101] : memref<1x1x128xf32, #tpu.memory_space<vmem>>, vector<1x1x128xf32>
      tpu.vector_store %arg6[%c0_99, %c0_100, %c0_101], %103 {strides = array<i32>} : memref<1x1x128xf32, #tpu.memory_space<vmem>>, vector<1x1x128xf32>,
    } else {
    }
    %c0_80 = arith.constant 0 : index
    %c0_81 = arith.constant 0 : index
    %c0_82 = arith.constant 0 : index
    %88 = vector.load %arg5[%c0_80, %c0_81, %c0_82] : memref<1x1x128xf32, #tpu.memory_space<vmem>>, vector<1x1x128xf32>
    %cst_83 = arith.constant dense<0.000000e+00> : vector<128xf32>
    %89 = vector.multi_reduction <add>, %82, %cst_83 [0] : vector<256x128xf32> to vector<128xf32>
    %90 = vector.shape_cast %89 : vector<128xf32> to vector<1x128xf32>
    %91 = vector.shape_cast %90 : vector<1x128xf32> to vector<1x1x128xf32>
    %92 = arith.addf %88, %91 : vector<1x1x128xf32>
    %c0_84 = arith.constant 0 : index
    %c0_85 = arith.constant 0 : index
    %c0_86 = arith.constant 0 : index
    %93 = vector.load %arg5[%c0_84, %c0_85, %c0_86] : memref<1x1x128xf32, #tpu.memory_space<vmem>>, vector<1x1x128xf32>
    tpu.vector_store %arg5[%c0_84, %c0_85, %c0_86], %92 {strides = array<i32>} : memref<1x1x128xf32, #tpu.memory_space<vmem>>, vector<1x1x128xf32>,
    %c0_87 = arith.constant 0 : index
    %c0_88 = arith.constant 0 : index
    %c0_89 = arith.constant 0 : index
    %94 = vector.load %arg6[%c0_87, %c0_88, %c0_89] : memref<1x1x128xf32, #tpu.memory_space<vmem>>, vector<1x1x128xf32>
    %95 = arith.mulf %82, %82 : vector<256x128xf32>
    %cst_90 = arith.constant dense<0.000000e+00> : vector<128xf32>
    %96 = vector.multi_reduction <add>, %95, %cst_90 [0] : vector<256x128xf32> to vector<128xf32>
    %97 = vector.shape_cast %96 : vector<128xf32> to vector<1x128xf32>
    %98 = vector.shape_cast %97 : vector<1x128xf32> to vector<1x1x128xf32>
    %99 = arith.addf %94, %98 : vector<1x1x128xf32>
    %c0_91 = arith.constant 0 : index
    %c0_92 = arith.constant 0 : index
    %c0_93 = arith.constant 0 : index
    %100 = vector.load %arg6[%c0_91, %c0_92, %c0_93] : memref<1x1x128xf32, #tpu.memory_space<vmem>>, vector<1x1x128xf32>
    tpu.vector_store %arg6[%c0_91, %c0_92, %c0_93], %99 {strides = array<i32>} : memref<1x1x128xf32, #tpu.memory_space<vmem>>, vector<1x1x128xf32>,
    return
  }
  func.func @transform_0(%arg0: i32, %arg1: i32) -> (i32, i32, i32, i32) {
    %c0_i32 = arith.constant 0 : i32
    %c0_i32_0 = arith.constant 0 : i32
    %c0_i32_1 = arith.constant 0 : i32
    %c0_i32_2 = arith.constant 0 : i32
    return %arg0, %c0_i32, %c0_i32_0, %c0_i32_1 : i32, i32, i32, i32
  }
  func.func @transform_1(%arg0: i32, %arg1: i32) -> (i32, i32, i32, i32) {
    %c0_i32 = arith.constant 0 : i32
    %c0_i32_0 = arith.constant 0 : i32
    %c0_i32_1 = arith.constant 0 : i32
    %c0_i32_2 = arith.constant 0 : i32
    %c0_i32_3 = arith.constant 0 : i32
    return %c0_i32, %c0_i32_0, %c0_i32_1, %c0_i32_2 : i32, i32, i32, i32
  }
  func.func @transform_2(%arg0: i32, %arg1: i32) -> (i32, i32, i32) {
    %c0_i32 = arith.constant 0 : i32
    %c0_i32_0 = arith.constant 0 : i32
    return %arg0, %arg1, %c0_i32 : i32, i32, i32
  }
  func.func @transform_3(%arg0: i32, %arg1: i32) -> (i32, i32, i32) {
    %c0_i32 = arith.constant 0 : i32
    %c0_i32_0 = arith.constant 0 : i32
    %c0_i32_1 = arith.constant 0 : i32
    return %arg0, %c0_i32, %c0_i32_0 : i32, i32, i32
  }
  func.func @transform_4(%arg0: i32, %arg1: i32) -> (i32, i32, i32) {
    %c0_i32 = arith.constant 0 : i32
    %c0_i32_0 = arith.constant 0 : i32
    %c0_i32_1 = arith.constant 0 : i32
    return %arg0, %c0_i32, %c0_i32_0 : i32, i32, i32
  }
}

module attributes {stable_mosaic.version = 11 : i64} {
  func.func @_bn_relu_kernel(%arg0: i32, %arg1: memref<512x128xf32, #tpu.memory_space<vmem>>, %arg2: memref<1x128xf32, #tpu.memory_space<vmem>>, %arg3: memref<1x128xf32, #tpu.memory_space<vmem>>, %arg4: memref<512x128xbf16, #tpu.memory_space<vmem>>) attributes {dimension_semantics = [#tpu.dimension_semantics<parallel>], iteration_bounds = array<i64: 1>, scalar_prefetch = 0 : i64, scratch_operands = 0 : i64, tpu.core_type = #tpu.core_type<tc>, window_params = [{transform_indices = @transform_0, window_bounds = array<i64: 512, 128>}, {pipeline_mode = #tpu.pipeline_mode<synchronous>, transform_indices = @transform_1, window_bounds = array<i64: 1, 128>}, {pipeline_mode = #tpu.pipeline_mode<synchronous>, transform_indices = @transform_2, window_bounds = array<i64: 1, 128>}, {transform_indices = @transform_3, window_bounds = array<i64: 512, 128>}]} {
    %c0 = arith.constant 0 : index
    %c0_0 = arith.constant 0 : index
    %0 = vector.load %arg1[%c0, %c0_0] : memref<512x128xf32, #tpu.memory_space<vmem>>, vector<512x128xf32>
    %c0_1 = arith.constant 0 : index
    %c0_2 = arith.constant 0 : index
    %1 = vector.load %arg2[%c0_1, %c0_2] : memref<1x128xf32, #tpu.memory_space<vmem>>, vector<1x128xf32>
    %2 = vector.broadcast %1 : vector<1x128xf32> to vector<512x128xf32>
    %3 = arith.mulf %0, %2 : vector<512x128xf32>
    %c0_3 = arith.constant 0 : index
    %c0_4 = arith.constant 0 : index
    %4 = vector.load %arg3[%c0_3, %c0_4] : memref<1x128xf32, #tpu.memory_space<vmem>>, vector<1x128xf32>
    %5 = vector.broadcast %4 : vector<1x128xf32> to vector<512x128xf32>
    %6 = arith.addf %3, %5 : vector<512x128xf32>
    %cst = arith.constant 0.000000e+00 : f32
    %7 = vector.broadcast %cst : f32 to vector<512x128xf32>
    %8 = arith.maximumf %6, %7 : vector<512x128xf32>
    %9 = arith.truncf %8 : vector<512x128xf32> to vector<512x128xbf16>
    %c0_5 = arith.constant 0 : index
    %c0_6 = arith.constant 0 : index
    %10 = vector.load %arg4[%c0_5, %c0_6] : memref<512x128xbf16, #tpu.memory_space<vmem>>, vector<512x128xbf16>
    tpu.vector_store %arg4[%c0_5, %c0_6], %9 {strides = array<i32>} : memref<512x128xbf16, #tpu.memory_space<vmem>>, vector<512x128xbf16>,
    return
  }
  func.func @transform_0(%arg0: i32) -> (i32, i32) {
    %c0_i32 = arith.constant 0 : i32
    %c0_i32_0 = arith.constant 0 : i32
    return %arg0, %c0_i32 : i32, i32
  }
  func.func @transform_1(%arg0: i32) -> (i32, i32) {
    %c0_i32 = arith.constant 0 : i32
    %c0_i32_0 = arith.constant 0 : i32
    %c0_i32_1 = arith.constant 0 : i32
    return %c0_i32, %c0_i32_0 : i32, i32
  }
  func.func @transform_2(%arg0: i32) -> (i32, i32) {
    %c0_i32 = arith.constant 0 : i32
    %c0_i32_0 = arith.constant 0 : i32
    %c0_i32_1 = arith.constant 0 : i32
    return %c0_i32, %c0_i32_0 : i32, i32
  }
  func.func @transform_3(%arg0: i32) -> (i32, i32) {
    %c0_i32 = arith.constant 0 : i32
    %c0_i32_0 = arith.constant 0 : i32
    return %arg0, %c0_i32 : i32, i32
  }
}

module attributes {stable_mosaic.version = 11 : i64} {
  func.func @_bn_relu_kernel(%arg0: i32, %arg1: memref<512x128xf32, #tpu.memory_space<vmem>>, %arg2: memref<1x128xf32, #tpu.memory_space<vmem>>, %arg3: memref<1x128xf32, #tpu.memory_space<vmem>>, %arg4: memref<512x128xf32, #tpu.memory_space<vmem>>) attributes {dimension_semantics = [#tpu.dimension_semantics<parallel>], iteration_bounds = array<i64: 1>, scalar_prefetch = 0 : i64, scratch_operands = 0 : i64, tpu.core_type = #tpu.core_type<tc>, window_params = [{transform_indices = @transform_0, window_bounds = array<i64: 512, 128>}, {pipeline_mode = #tpu.pipeline_mode<synchronous>, transform_indices = @transform_1, window_bounds = array<i64: 1, 128>}, {pipeline_mode = #tpu.pipeline_mode<synchronous>, transform_indices = @transform_2, window_bounds = array<i64: 1, 128>}, {transform_indices = @transform_3, window_bounds = array<i64: 512, 128>}]} {
    %c0 = arith.constant 0 : index
    %c0_0 = arith.constant 0 : index
    %0 = vector.load %arg1[%c0, %c0_0] : memref<512x128xf32, #tpu.memory_space<vmem>>, vector<512x128xf32>
    %c0_1 = arith.constant 0 : index
    %c0_2 = arith.constant 0 : index
    %1 = vector.load %arg2[%c0_1, %c0_2] : memref<1x128xf32, #tpu.memory_space<vmem>>, vector<1x128xf32>
    %2 = vector.broadcast %1 : vector<1x128xf32> to vector<512x128xf32>
    %3 = arith.mulf %0, %2 : vector<512x128xf32>
    %c0_3 = arith.constant 0 : index
    %c0_4 = arith.constant 0 : index
    %4 = vector.load %arg3[%c0_3, %c0_4] : memref<1x128xf32, #tpu.memory_space<vmem>>, vector<1x128xf32>
    %5 = vector.broadcast %4 : vector<1x128xf32> to vector<512x128xf32>
    %6 = arith.addf %3, %5 : vector<512x128xf32>
    %cst = arith.constant 0.000000e+00 : f32
    %7 = vector.broadcast %cst : f32 to vector<512x128xf32>
    %8 = arith.maximumf %6, %7 : vector<512x128xf32>
    %c0_5 = arith.constant 0 : index
    %c0_6 = arith.constant 0 : index
    %9 = vector.load %arg4[%c0_5, %c0_6] : memref<512x128xf32, #tpu.memory_space<vmem>>, vector<512x128xf32>
    tpu.vector_store %arg4[%c0_5, %c0_6], %8 {strides = array<i32>} : memref<512x128xf32, #tpu.memory_space<vmem>>, vector<512x128xf32>,
    return
  }
  func.func @transform_0(%arg0: i32) -> (i32, i32) {
    %c0_i32 = arith.constant 0 : i32
    %c0_i32_0 = arith.constant 0 : i32
    return %arg0, %c0_i32 : i32, i32
  }
  func.func @transform_1(%arg0: i32) -> (i32, i32) {
    %c0_i32 = arith.constant 0 : i32
    %c0_i32_0 = arith.constant 0 : i32
    %c0_i32_1 = arith.constant 0 : i32
    return %c0_i32, %c0_i32_0 : i32, i32
  }
  func.func @transform_2(%arg0: i32) -> (i32, i32) {
    %c0_i32 = arith.constant 0 : i32
    %c0_i32_0 = arith.constant 0 : i32
    %c0_i32_1 = arith.constant 0 : i32
    return %c0_i32, %c0_i32_0 : i32, i32
  }
  func.func @transform_3(%arg0: i32) -> (i32, i32) {
    %c0_i32 = arith.constant 0 : i32
    %c0_i32_0 = arith.constant 0 : i32
    return %arg0, %c0_i32 : i32, i32
  }
}

</mosaic_0001>

<bundles_post_ra>
// kernel: vgg_block_forward.7
= control target key start
LH: loop header
LB: loop body
LE: loop exit
PB: predicated region body
PF: predicated region fallthrough
CT: control target
= control target key end

     0   :  { %s896_s0 = inlined_call_operand.vmem [shape: f32[512,128], index: 0, kind: input, shape index: {}]   ;;  %s897_s1 = inlined_call_operand.vmem [shape: f32[1,128], index: 1, kind: input, shape index: {}]   ;;  %s898_s2 = inlined_call_operand.vmem [shape: f32[1,128], index: 2, kind: input, shape index: {}]   ;;  %s899_s3 = inlined_call_operand.vmem [shape: f32[512,128], index: 3, kind: output, shape index: {}]  }
   0x1   :  { %v14_v0 = vld [vmem:[%s896_s0] sm:$0xff]  ;;  %v15_v4 = vld [vmem:[%s896_s0 + $0x8] sm:$0xff]  ;;  %v16_v5 = vld [vmem:[%s896_s0 + $0x10] sm:$0xff] }
   0x2   :  { %v380_v1 = vld [vmem:[%s897_s1] ss:$0 sm:$0xff]  ;;  %v17_v6 = vld [vmem:[%s896_s0 + $0x18] sm:$0xff]  ;;  %v19_v11 = vld [vmem:[%s896_s0 + $0x28] sm:$0xff] }
   0x3   :  { %v385_v2 = vld [vmem:[%s898_s2] ss:$0 sm:$0xff]  ;;  %v85_v3 = vmul.f32 %v380_v1, %v14_v0  ;;  %v86_v7 = vmul.f32 %v380_v1, %v15_v4  ;;  %v87_v8 = vmul.f32 %v380_v1, %v16_v5  ;;  %v88_v9 = vmul.f32 %v380_v1, %v17_v6  ;;  %v20_v12 = vld [vmem:[%s896_s0 + $0x30] sm:$0xff]  ;;  %v21_v17 = vld [vmem:[%s896_s0 + $0x38] sm:$0xff] }
   0x4   :  { %v18_v10 = vld [vmem:[%s896_s0 + $0x20] sm:$0xff]  ;;  %v90_v15 = vmul.f32 %v380_v1, %v19_v11  ;;  %v91_v16 = vmul.f32 %v380_v1, %v20_v12  ;;  %v92_v21 = vmul.f32 %v380_v1, %v21_v17  ;;  %v23_v27 = vld [vmem:[%s896_s0 + $0x48] sm:$0xff]  ;;  %v24_v28 = vld [vmem:[%s896_s0 + $0x50] sm:$0xff] }
   0x5   :  { %v156_v13 = vadd.f32 %v385_v2, %v85_v3  ;;  %v89_v14 = vmul.f32 %v380_v1, %v18_v10  ;;  %v157_v18 = vadd.f32 %v385_v2, %v86_v7  ;;  %v158_v19 = vadd.f32 %v385_v2, %v87_v8  ;;  %v22_v22 = vld [vmem:[%s896_s0 + $0x40] sm:$0xff]  ;;  %v25_v29 = vld [vmem:[%s896_s0 + $0x58] sm:$0xff]  ;;  %v27_v35 = vld [vmem:[%s896_s0 + $0x68] sm:$0xff] }
   0x6   :  { %v159_v20 = vadd.f32 %v385_v2, %v88_v9  ;;  %v161_v25 = vadd.f32 %v385_v2, %v90_v15  ;;  %v162_v26 = vadd.f32 %v385_v2, %v91_v16  ;;  %v163_v33 = vadd.f32 %v385_v2, %v92_v21  ;;  %v26_v34 = vld [vmem:[%s896_s0 + $0x60] sm:$0xff]  ;;  %v28_v36 = vld [vmem:[%s896_s0 + $0x70] sm:$0xff]  ;;  %v29_v41 = vld [vmem:[%s896_s0 + $0x78] sm:$0xff] }
   0x7   :  { %v220_v23 = vmax.f32 %v156_v13, 0.0  ;;  %v160_v24 = vadd.f32 %v385_v2, %v89_v14  ;;  %v221_v30 = vmax.f32 %v157_v18, 0.0  ;;  %v222_v31 = vmax.f32 %v158_v19, 0.0  ;;  %v30_v54 = vld [vmem:[%s896_s0 + $0x80] sm:$0xff]  ;;  %v31_v59 = vld [vmem:[%s896_s0 + $0x88] sm:$0xff]  ;;  %v32_v60 = vld [vmem:[%s896_s0 + $0x90] sm:$0xff] }
   0x8   :  { %v223_v32 = vmax.f32 %v159_v20, 0.0  ;;  %v225_v38 = vmax.f32 %v161_v25, 0.0  ;;  %v226_v39 = vmax.f32 %v162_v26, 0.0  ;;  %v93_v40 = vmul.f32 %v380_v1, %v22_v22  ;;  %v33_v61 = vld [vmem:[%s896_s0 + $0x98] sm:$0xff]  ;;  %v34_v4 = vld [vmem:[%s896_s0 + $0xa0] sm:$0xff]  ;;  %v35_v5 = vld [vmem:[%s896_s0 + $0xa8] sm:$0xff] }
   0x9   :  { %284 = vst [vmem:[%s899_s3] sm:$0xff] %v220_v23  ;;  %v224_v37 = vmax.f32 %v160_v24, 0.0  ;;  %285 = vst [vmem:[%s899_s3 + $0x8] sm:$0xff] %v221_v30  ;;  %v227_v42 = vmax.f32 %v163_v33, 0.0  ;;  %v94_v43 = vmul.f32 %v380_v1, %v23_v27  ;;  %v95_v44 = vmul.f32 %v380_v1, %v24_v28  ;;  %v36_v6 = vld [vmem:[%s896_s0 + $0xb0] sm:$0xff]  ;;  %v37_v11 = vld [vmem:[%s896_s0 + $0xb8] sm:$0xff] }
   0xa   :  { %286 = vst [vmem:[%s899_s3 + $0x10] sm:$0xff] %v222_v31  ;;  %287 = vst [vmem:[%s899_s3 + $0x18] sm:$0xff] %v223_v32  ;;  %v96_v45 = vmul.f32 %v380_v1, %v25_v29  ;;  %v164_v46 = vadd.f32 %v385_v2, %v93_v40  ;;  %v97_v47 = vmul.f32 %v380_v1, %v26_v34  ;;  %v38_v24 = vld [vmem:[%s896_s0 + $0xc0] sm:$0xff]  ;;  %v39_v29 = vld [vmem:[%s896_s0 + $0xc8] sm:$0xff] }
   0xb   :  { %288 = vst [vmem:[%s899_s3 + $0x20] sm:$0xff] %v224_v37  ;;  %289 = vst [vmem:[%s899_s3 + $0x28] sm:$0xff] %v225_v38  ;;  %v98_v48 = vmul.f32 %v380_v1, %v27_v35  ;;  %v99_v49 = vmul.f32 %v380_v1, %v28_v36  ;;  %v165_v50 = vadd.f32 %v385_v2, %v94_v43  ;;  %v40_v30 = vld [vmem:[%s896_s0 + $0xd0] sm:$0xff]  ;;  %v41_v31 = vld [vmem:[%s896_s0 + $0xd8] sm:$0xff] }
   0xc   :  { %290 = vst [vmem:[%s899_s3 + $0x30] sm:$0xff] %v226_v39  ;;  %291 = vst [vmem:[%s899_s3 + $0x38] sm:$0xff] %v227_v42  ;;  %v166_v51 = vadd.f32 %v385_v2, %v95_v44  ;;  %v167_v52 = vadd.f32 %v385_v2, %v96_v45  ;;  %v100_v53 = vmul.f32 %v380_v1, %v29_v41  ;;  %v228_v55 = vmax.f32 %v164_v46, 0.0  ;;  %v42_v36 = vld [vmem:[%s896_s0 + $0xe0] sm:$0xff]  ;;  %v43_v37 = vld [vmem:[%s896_s0 + $0xe8] sm:$0xff] }
   0xd   :  { %v168_v56 = vadd.f32 %v385_v2, %v97_v47  ;;  %v169_v57 = vadd.f32 %v385_v2, %v98_v48  ;;  %v170_v58 = vadd.f32 %v385_v2, %v99_v49  ;;  %v229_v62 = vmax.f32 %v165_v50, 0.0  ;;  %v44_v38 = vld [vmem:[%s896_s0 + $0xf0] sm:$0xff]  ;;  %v45_v43 = vld [vmem:[%s896_s0 + $0xf8] sm:$0xff] }
   0xe   :  { %v230_v63 = vmax.f32 %v166_v51, 0.0  ;;  %v231_v0 = vmax.f32 %v167_v52, 0.0  ;;  %v171_v3 = vadd.f32 %v385_v2, %v100_v53  ;;  %292 = vst [vmem:[%s899_s3 + $0x40] sm:$0xff] %v228_v55  ;;  %v101_v10 = vmul.f32 %v380_v1, %v30_v54 }
   0xf   :  { %v232_v7 = vmax.f32 %v168_v56, 0.0  ;;  %v233_v8 = vmax.f32 %v169_v57, 0.0  ;;  %v234_v9 = vmax.f32 %v170_v58, 0.0  ;;  %293 = vst [vmem:[%s899_s3 + $0x48] sm:$0xff] %v229_v62  ;;  %v102_v13 = vmul.f32 %v380_v1, %v31_v59  ;;  %v46_v56 = vld [vmem:[%s896_s0 + $0x100] sm:$0xff]  ;;  %v48_v62 = vld [vmem:[%s896_s0 + $0x110] sm:$0xff] }
  0x10   :  { %294 = vst [vmem:[%s899_s3 + $0x50] sm:$0xff] %v230_v63  ;;  %295 = vst [vmem:[%s899_s3 + $0x58] sm:$0xff] %v231_v0  ;;  %v235_v12 = vmax.f32 %v171_v3, 0.0  ;;  %v103_v14 = vmul.f32 %v380_v1, %v32_v60  ;;  %v104_v15 = vmul.f32 %v380_v1, %v33_v61  ;;  %v172_v16 = vadd.f32 %v385_v2, %v101_v10  ;;  %v47_v61 = vld [vmem:[%s896_s0 + $0x108] sm:$0xff]  ;;  %v49_v63 = vld [vmem:[%s896_s0 + $0x118] sm:$0xff] }
  0x11   :  { %296 = vst [vmem:[%s899_s3 + $0x60] sm:$0xff] %v232_v7  ;;  %297 = vst [vmem:[%s899_s3 + $0x68] sm:$0xff] %v233_v8  ;;  %v105_v17 = vmul.f32 %v380_v1, %v34_v4  ;;  %v106_v18 = vmul.f32 %v380_v1, %v35_v5  ;;  %v107_v19 = vmul.f32 %v380_v1, %v36_v6  ;;  %v50_v6 = vld [vmem:[%s896_s0 + $0x120] sm:$0xff]  ;;  %v51_v7 = vld [vmem:[%s896_s0 + $0x128] sm:$0xff] }
  0x12   :  { %298 = vst [vmem:[%s899_s3 + $0x70] sm:$0xff] %v234_v9  ;;  %299 = vst [vmem:[%s899_s3 + $0x78] sm:$0xff] %v235_v12  ;;  %v173_v20 = vadd.f32 %v385_v2, %v102_v13  ;;  %v174_v21 = vadd.f32 %v385_v2, %v103_v14  ;;  %v175_v22 = vadd.f32 %v385_v2, %v104_v15  ;;  %v236_v25 = vmax.f32 %v172_v16, 0.0  ;;  %v52_v8 = vld [vmem:[%s896_s0 + $0x130] sm:$0xff]  ;;  %v53_v13 = vld [vmem:[%s896_s0 + $0x138] sm:$0xff] }
  0x13   :  { %v108_v23 = vmul.f32 %v380_v1, %v37_v11  ;;  %v176_v26 = vadd.f32 %v385_v2, %v105_v17  ;;  %v177_v27 = vadd.f32 %v385_v2, %v106_v18  ;;  %v178_v28 = vadd.f32 %v385_v2, %v107_v19 }
  0x14   :  { %v237_v32 = vmax.f32 %v173_v20, 0.0  ;;  %v238_v33 = vmax.f32 %v174_v21, 0.0  ;;  %v239_v34 = vmax.f32 %v175_v22, 0.0  ;;  %300 = vst [vmem:[%s899_s3 + $0x80] sm:$0xff] %v236_v25  ;;  %v109_v42 = vmul.f32 %v380_v1, %v38_v24 }
  0x15   :  { %v179_v35 = vadd.f32 %v385_v2, %v108_v23  ;;  %v240_v39 = vmax.f32 %v176_v26, 0.0  ;;  %v241_v40 = vmax.f32 %v177_v27, 0.0  ;;  %v242_v41 = vmax.f32 %v178_v28, 0.0  ;;  %v54_v26 = vld [vmem:[%s896_s0 + $0x140] sm:$0xff] }
  0x16   :  { %301 = vst [vmem:[%s899_s3 + $0x88] sm:$0xff] %v237_v32  ;;  %302 = vst [vmem:[%s899_s3 + $0x90] sm:$0xff] %v238_v33  ;;  %v110_v45 = vmul.f32 %v380_v1, %v39_v29  ;;  %v111_v46 = vmul.f32 %v380_v1, %v40_v30  ;;  %v112_v47 = vmul.f32 %v380_v1, %v41_v31  ;;  %v55_v31 = vld [vmem:[%s896_s0 + $0x148] sm:$0xff]  ;;  %v56_v32 = vld [vmem:[%s896_s0 + $0x150] sm:$0xff] }
  0x17   :  { %303 = vst [vmem:[%s899_s3 + $0x98] sm:$0xff] %v239_v34  ;;  %v243_v44 = vmax.f32 %v179_v35, 0.0  ;;  %304 = vst [vmem:[%s899_s3 + $0xa0] sm:$0xff] %v240_v39  ;;  %v180_v48 = vadd.f32 %v385_v2, %v109_v42  ;;  %v113_v49 = vmul.f32 %v380_v1, %v42_v36  ;;  %v114_v50 = vmul.f32 %v380_v1, %v43_v37  ;;  %v57_v33 = vld [vmem:[%s896_s0 + $0x158] sm:$0xff]  ;;  %v59_v39 = vld [vmem:[%s896_s0 + $0x168] sm:$0xff] }
  0x18   :  { %305 = vst [vmem:[%s899_s3 + $0xa8] sm:$0xff] %v241_v40  ;;  %306 = vst [vmem:[%s899_s3 + $0xb0] sm:$0xff] %v242_v41  ;;  %v115_v51 = vmul.f32 %v380_v1, %v44_v38  ;;  %v181_v52 = vadd.f32 %v385_v2, %v110_v45  ;;  %v182_v53 = vadd.f32 %v385_v2, %v111_v46  ;;  %v58_v38 = vld [vmem:[%s896_s0 + $0x160] sm:$0xff]  ;;  %v60_v40 = vld [vmem:[%s896_s0 + $0x170] sm:$0xff] }
  0x19   :  { %307 = vst [vmem:[%s899_s3 + $0xb8] sm:$0xff] %v243_v44  ;;  %v183_v54 = vadd.f32 %v385_v2, %v112_v47  ;;  %v116_v55 = vmul.f32 %v380_v1, %v45_v43  ;;  %v244_v57 = vmax.f32 %v180_v48, 0.0  ;;  %v184_v58 = vadd.f32 %v385_v2, %v113_v49  ;;  %v61_v45 = vld [vmem:[%s896_s0 + $0x178] sm:$0xff] }
  0x1a   :  { %v185_v59 = vadd.f32 %v385_v2, %v114_v50  ;;  %v186_v60 = vadd.f32 %v385_v2, %v115_v51  ;;  %v245_v0 = vmax.f32 %v181_v52, 0.0  ;;  %v246_v3 = vmax.f32 %v182_v53, 0.0 }
  0x1b   :  { %v247_v4 = vmax.f32 %v183_v54, 0.0  ;;  %v187_v5 = vadd.f32 %v385_v2, %v116_v55  ;;  %308 = vst [vmem:[%s899_s3 + $0xc0] sm:$0xff] %v244_v57  ;;  %v248_v9 = vmax.f32 %v184_v58, 0.0  ;;  %v117_v12 = vmul.f32 %v380_v1, %v46_v56  ;;  %v62_v58 = vld [vmem:[%s896_s0 + $0x180] sm:$0xff] }
  0x1c   :  { %v249_v10 = vmax.f32 %v185_v59, 0.0  ;;  %v250_v11 = vmax.f32 %v186_v60, 0.0  ;;  %309 = vst [vmem:[%s899_s3 + $0xc8] sm:$0xff] %v245_v0  ;;  %310 = vst [vmem:[%s899_s3 + $0xd0] sm:$0xff] %v246_v3  ;;  %v118_v15 = vmul.f32 %v380_v1, %v47_v61  ;;  %v119_v16 = vmul.f32 %v380_v1, %v48_v62  ;;  %v64_v0 = vld [vmem:[%s896_s0 + $0x190] sm:$0xff]  ;;  %v65_v3 = vld [vmem:[%s896_s0 + $0x198] sm:$0xff] }
  0x1d   :  { %311 = vst [vmem:[%s899_s3 + $0xd8] sm:$0xff] %v247_v4  ;;  %v251_v14 = vmax.f32 %v187_v5, 0.0  ;;  %v120_v17 = vmul.f32 %v380_v1, %v49_v63  ;;  %312 = vst [vmem:[%s899_s3 + $0xe0] sm:$0xff] %v248_v9  ;;  %v188_v18 = vadd.f32 %v385_v2, %v117_v12  ;;  %v121_v19 = vmul.f32 %v380_v1, %v50_v6  ;;  %v63_v63 = vld [vmem:[%s896_s0 + $0x188] sm:$0xff] }
  0x1e   :  { %313 = vst [vmem:[%s899_s3 + $0xe8] sm:$0xff] %v249_v10  ;;  %314 = vst [vmem:[%s899_s3 + $0xf0] sm:$0xff] %v250_v11  ;;  %v122_v20 = vmul.f32 %v380_v1, %v51_v7  ;;  %v123_v21 = vmul.f32 %v380_v1, %v52_v8  ;;  %v189_v22 = vadd.f32 %v385_v2, %v118_v15  ;;  %v66_v8 = vld [vmem:[%s896_s0 + $0x1a0] sm:$0xff]  ;;  %v67_v9 = vld [vmem:[%s896_s0 + $0x1a8] sm:$0xff] }
  0x1f   :  { %315 = vst [vmem:[%s899_s3 + $0xf8] sm:$0xff] %v251_v14  ;;  %v190_v23 = vadd.f32 %v385_v2, %v119_v16  ;;  %v191_v24 = vadd.f32 %v385_v2, %v120_v17  ;;  %v124_v25 = vmul.f32 %v380_v1, %v53_v13  ;;  %v252_v27 = vmax.f32 %v188_v18, 0.0  ;;  %v68_v10 = vld [vmem:[%s896_s0 + $0x1b0] sm:$0xff]  ;;  %v69_v15 = vld [vmem:[%s896_s0 + $0x1b8] sm:$0xff] }
  0x20   :  { %v192_v28 = vadd.f32 %v385_v2, %v121_v19  ;;  %v193_v29 = vadd.f32 %v385_v2, %v122_v20  ;;  %v194_v30 = vadd.f32 %v385_v2, %v123_v21  ;;  %v253_v34 = vmax.f32 %v189_v22, 0.0 }
  0x21   :  { %v254_v35 = vmax.f32 %v190_v23, 0.0  ;;  %v255_v36 = vmax.f32 %v191_v24, 0.0  ;;  %v195_v37 = vadd.f32 %v385_v2, %v124_v25  ;;  %316 = vst [vmem:[%s899_s3 + $0x100] sm:$0xff] %v252_v27  ;;  %v125_v44 = vmul.f32 %v380_v1, %v54_v26 }
  0x22   :  { %v256_v41 = vmax.f32 %v192_v28, 0.0  ;;  %v257_v42 = vmax.f32 %v193_v29, 0.0  ;;  %v258_v43 = vmax.f32 %v194_v30, 0.0  ;;  %317 = vst [vmem:[%s899_s3 + $0x108] sm:$0xff] %v253_v34  ;;  %v126_v47 = vmul.f32 %v380_v1, %v55_v31  ;;  %v70_v28 = vld [vmem:[%s896_s0 + $0x1c0] sm:$0xff]  ;;  %v72_v34 = vld [vmem:[%s896_s0 + $0x1d0] sm:$0xff] }
  0x23   :  { %318 = vst [vmem:[%s899_s3 + $0x110] sm:$0xff] %v254_v35  ;;  %319 = vst [vmem:[%s899_s3 + $0x118] sm:$0xff] %v255_v36  ;;  %v259_v46 = vmax.f32 %v195_v37, 0.0  ;;  %v127_v48 = vmul.f32 %v380_v1, %v56_v32  ;;  %v128_v49 = vmul.f32 %v380_v1, %v57_v33  ;;  %v196_v50 = vadd.f32 %v385_v2, %v125_v44  ;;  %v71_v33 = vld [vmem:[%s896_s0 + $0x1c8] sm:$0xff]  ;;  %v73_v35 = vld [vmem:[%s896_s0 + $0x1d8] sm:$0xff] }
  0x24   :  { %320 = vst [vmem:[%s899_s3 + $0x120] sm:$0xff] %v256_v41  ;;  %321 = vst [vmem:[%s899_s3 + $0x128] sm:$0xff] %v257_v42  ;;  %v129_v51 = vmul.f32 %v380_v1, %v58_v38  ;;  %v130_v52 = vmul.f32 %v380_v1, %v59_v39  ;;  %v131_v53 = vmul.f32 %v380_v1, %v60_v40  ;;  %v74_v40 = vld [vmem:[%s896_s0 + $0x1e0] sm:$0xff]  ;;  %v75_v41 = vld [vmem:[%s896_s0 + $0x1e8] sm:$0xff] }
  0x25   :  { %322 = vst [vmem:[%s899_s3 + $0x130] sm:$0xff] %v258_v43  ;;  %323 = vst [vmem:[%s899_s3 + $0x138] sm:$0xff] %v259_v46  ;;  %v197_v54 = vadd.f32 %v385_v2, %v126_v47  ;;  %v198_v55 = vadd.f32 %v385_v2, %v127_v48  ;;  %v199_v56 = vadd.f32 %v385_v2, %v128_v49  ;;  %v260_v59 = vmax.f32 %v196_v50, 0.0  ;;  %v76_v42 = vld [vmem:[%s896_s0 + $0x1f0] sm:$0xff]  ;;  %v77_v47 = vld [vmem:[%s896_s0 + $0x1f8] sm:$0xff] }
  0x26   :  { %v132_v57 = vmul.f32 %v380_v1, %v61_v45  ;;  %v200_v60 = vadd.f32 %v385_v2, %v129_v51  ;;  %v201_v61 = vadd.f32 %v385_v2, %v130_v52  ;;  %v202_v62 = vadd.f32 %v385_v2, %v131_v53 }
  0x27   :  { %v261_v4 = vmax.f32 %v197_v54, 0.0  ;;  %v262_v5 = vmax.f32 %v198_v55, 0.0  ;;  %v263_v6 = vmax.f32 %v199_v56, 0.0  ;;  %324 = vst [vmem:[%s899_s3 + $0x140] sm:$0xff] %v260_v59  ;;  %v133_v14 = vmul.f32 %v380_v1, %v62_v58 }
  0x28   :  { %v203_v7 = vadd.f32 %v385_v2, %v132_v57  ;;  %v264_v11 = vmax.f32 %v200_v60, 0.0  ;;  %v265_v12 = vmax.f32 %v201_v61, 0.0  ;;  %v266_v13 = vmax.f32 %v202_v62, 0.0 }
  0x29   :  { %325 = vst [vmem:[%s899_s3 + $0x148] sm:$0xff] %v261_v4  ;;  %326 = vst [vmem:[%s899_s3 + $0x150] sm:$0xff] %v262_v5  ;;  %v134_v17 = vmul.f32 %v380_v1, %v63_v63  ;;  %v135_v18 = vmul.f32 %v380_v1, %v64_v0  ;;  %v136_v19 = vmul.f32 %v380_v1, %v65_v3 }
  0x2a   :  { %327 = vst [vmem:[%s899_s3 + $0x158] sm:$0xff] %v263_v6  ;;  %v267_v16 = vmax.f32 %v203_v7, 0.0  ;;  %328 = vst [vmem:[%s899_s3 + $0x160] sm:$0xff] %v264_v11  ;;  %v204_v20 = vadd.f32 %v385_v2, %v133_v14  ;;  %v137_v21 = vmul.f32 %v380_v1, %v66_v8  ;;  %v138_v22 = vmul.f32 %v380_v1, %v67_v9 }
  0x2b   :  { %329 = vst [vmem:[%s899_s3 + $0x168] sm:$0xff] %v265_v12  ;;  %330 = vst [vmem:[%s899_s3 + $0x170] sm:$0xff] %v266_v13  ;;  %v139_v23 = vmul.f32 %v380_v1, %v68_v10  ;;  %v205_v24 = vadd.f32 %v385_v2, %v134_v17  ;;  %v206_v25 = vadd.f32 %v385_v2, %v135_v18 }
  0x2c   :  { %331 = vst [vmem:[%s899_s3 + $0x178] sm:$0xff] %v267_v16  ;;  %v207_v26 = vadd.f32 %v385_v2, %v136_v19  ;;  %v140_v27 = vmul.f32 %v380_v1, %v69_v15  ;;  %v268_v29 = vmax.f32 %v204_v20, 0.0  ;;  %v208_v30 = vadd.f32 %v385_v2, %v137_v21 }
  0x2d   :  { %v209_v31 = vadd.f32 %v385_v2, %v138_v22  ;;  %v210_v32 = vadd.f32 %v385_v2, %v139_v23  ;;  %v269_v36 = vmax.f32 %v205_v24, 0.0  ;;  %v270_v37 = vmax.f32 %v206_v25, 0.0 }
  0x2e   :  { %v271_v38 = vmax.f32 %v207_v26, 0.0  ;;  %v211_v39 = vadd.f32 %v385_v2, %v140_v27  ;;  %332 = vst [vmem:[%s899_s3 + $0x180] sm:$0xff] %v268_v29  ;;  %v272_v43 = vmax.f32 %v208_v30, 0.0  ;;  %v141_v46 = vmul.f32 %v380_v1, %v70_v28 }
  0x2f   :  { %v273_v44 = vmax.f32 %v209_v31, 0.0  ;;  %v274_v45 = vmax.f32 %v210_v32, 0.0  ;;  %333 = vst [vmem:[%s899_s3 + $0x188] sm:$0xff] %v269_v36  ;;  %334 = vst [vmem:[%s899_s3 + $0x190] sm:$0xff] %v270_v37  ;;  %v142_v49 = vmul.f32 %v380_v1, %v71_v33  ;;  %v143_v50 = vmul.f32 %v380_v1, %v72_v34 }
  0x30   :  { %335 = vst [vmem:[%s899_s3 + $0x198] sm:$0xff] %v271_v38  ;;  %v275_v48 = vmax.f32 %v211_v39, 0.0  ;;  %v144_v51 = vmul.f32 %v380_v1, %v73_v35  ;;  %336 = vst [vmem:[%s899_s3 + $0x1a0] sm:$0xff] %v272_v43  ;;  %v212_v52 = vadd.f32 %v385_v2, %v141_v46  ;;  %v145_v53 = vmul.f32 %v380_v1, %v74_v40 }
  0x31   :  { %337 = vst [vmem:[%s899_s3 + $0x1a8] sm:$0xff] %v273_v44  ;;  %338 = vst [vmem:[%s899_s3 + $0x1b0] sm:$0xff] %v274_v45  ;;  %v146_v54 = vmul.f32 %v380_v1, %v75_v41  ;;  %v147_v55 = vmul.f32 %v380_v1, %v76_v42  ;;  %v213_v56 = vadd.f32 %v385_v2, %v142_v49 }
  0x32   :  { %339 = vst [vmem:[%s899_s3 + $0x1b8] sm:$0xff] %v275_v48  ;;  %v214_v57 = vadd.f32 %v385_v2, %v143_v50  ;;  %v215_v58 = vadd.f32 %v385_v2, %v144_v51  ;;  %v148_v59 = vmul.f32 %v380_v1, %v77_v47  ;;  %v276_v60 = vmax.f32 %v212_v52, 0.0 }
  0x33   :  { %v216_v61 = vadd.f32 %v385_v2, %v145_v53  ;;  %v217_v62 = vadd.f32 %v385_v2, %v146_v54  ;;  %v218_v63 = vadd.f32 %v385_v2, %v147_v55  ;;  %v277_v0 = vmax.f32 %v213_v56, 0.0 }
  0x34   :  { %v278_v3 = vmax.f32 %v214_v57, 0.0  ;;  %v279_v4 = vmax.f32 %v215_v58, 0.0  ;;  %v219_v5 = vadd.f32 %v385_v2, %v148_v59  ;;  %340 = vst [vmem:[%s899_s3 + $0x1c0] sm:$0xff] %v276_v60 }
  0x35   :  { %v280_v6 = vmax.f32 %v216_v61, 0.0  ;;  %v281_v7 = vmax.f32 %v217_v62, 0.0  ;;  %v282_v8 = vmax.f32 %v218_v63, 0.0  ;;  %341 = vst [vmem:[%s899_s3 + $0x1c8] sm:$0xff] %v277_v0 }
  0x36   :  { %342 = vst [vmem:[%s899_s3 + $0x1d0] sm:$0xff] %v278_v3  ;;  %343 = vst [vmem:[%s899_s3 + $0x1d8] sm:$0xff] %v279_v4  ;;  %v283_v1 = vmax.f32 %v219_v5, 0.0 }
  0x37   :  { %344 = vst [vmem:[%s899_s3 + $0x1e0] sm:$0xff] %v280_v6  ;;  %345 = vst [vmem:[%s899_s3 + $0x1e8] sm:$0xff] %v281_v7 }
  0x38   :  { %346 = vst [vmem:[%s899_s3 + $0x1f0] sm:$0xff] %v282_v8  ;;  %347 = vst [vmem:[%s899_s3 + $0x1f8] sm:$0xff] %v283_v1 }

// kernel: vgg_block_forward.5
= control target key start
LH: loop header
LB: loop body
LE: loop exit
PB: predicated region body
PF: predicated region fallthrough
CT: control target
= control target key end

     0   :  { %s1375_s0 = inlined_call_operand.vmem [shape: f32[512,128], index: 0, kind: input, shape index: {}]   ;;  %s1376_s1 = inlined_call_operand.vmem [shape: f32[1,128], index: 1, kind: input, shape index: {}]   ;;  %s1377_s2 = inlined_call_operand.vmem [shape: f32[1,128], index: 2, kind: input, shape index: {}]   ;;  %s1378_s3 = inlined_call_operand.vmem [shape: bf16[512,128], index: 3, kind: output, shape index: {}]  }
   0x1   :  { %v14_v0 = vld [vmem:[%s1375_s0] sm:$0xff]  ;;  %v15_v1 = vld [vmem:[%s1375_s0 + $0x8] sm:$0xff]  ;;  %v16_v6 = vld [vmem:[%s1375_s0 + $0x10] sm:$0xff] }
   0x2   :  { %v958_v2 = vld [vmem:[%s1376_s1] ss:$0 sm:$0xff]  ;;  %v17_v7 = vld [vmem:[%s1375_s0 + $0x18] sm:$0xff]  ;;  %v19_v11 = vld [vmem:[%s1375_s0 + $0x28] sm:$0xff] }
   0x3   :  { %v85_v3 = vmul.f32 %v958_v2, %v14_v0  ;;  %v86_v4 = vmul.f32 %v958_v2, %v15_v1  ;;  %v965_v5 = vld [vmem:[%s1377_s2] ss:$0 sm:$0xff]  ;;  %v87_v8 = vmul.f32 %v958_v2, %v16_v6  ;;  %v88_v9 = vmul.f32 %v958_v2, %v17_v7  ;;  %v20_v12 = vld [vmem:[%s1375_s0 + $0x30] sm:$0xff]  ;;  %v21_v17 = vld [vmem:[%s1375_s0 + $0x38] sm:$0xff] }
   0x4   :  { %v18_v10 = vld [vmem:[%s1375_s0 + $0x20] sm:$0xff]  ;;  %v90_v16 = vmul.f32 %v958_v2, %v19_v11  ;;  %v91_v20 = vmul.f32 %v958_v2, %v20_v12  ;;  %v92_v21 = vmul.f32 %v958_v2, %v21_v17  ;;  %v23_v27 = vld [vmem:[%s1375_s0 + $0x48] sm:$0xff]  ;;  %v24_v32 = vld [vmem:[%s1375_s0 + $0x50] sm:$0xff] }
   0x5   :  { %v156_v13 = vadd.f32 %v965_v5, %v85_v3  ;;  %v157_v14 = vadd.f32 %v965_v5, %v86_v4  ;;  %v89_v15 = vmul.f32 %v958_v2, %v18_v10  ;;  %v158_v18 = vadd.f32 %v965_v5, %v87_v8  ;;  %v22_v22 = vld [vmem:[%s1375_s0 + $0x40] sm:$0xff]  ;;  %v25_v33 = vld [vmem:[%s1375_s0 + $0x58] sm:$0xff]  ;;  %v27_v39 = vld [vmem:[%s1375_s0 + $0x68] sm:$0xff] }
   0x6   :  { %v159_v19 = vadd.f32 %v965_v5, %v88_v9  ;;  %v161_v26 = vadd.f32 %v965_v5, %v90_v16  ;;  %v162_v30 = vadd.f32 %v965_v5, %v91_v20  ;;  %v163_v31 = vadd.f32 %v965_v5, %v92_v21  ;;  %v26_v38 = vld [vmem:[%s1375_s0 + $0x60] sm:$0xff]  ;;  %v28_v44 = vld [vmem:[%s1375_s0 + $0x70] sm:$0xff]  ;;  %v29_v49 = vld [vmem:[%s1375_s0 + $0x78] sm:$0xff] }
   0x7   :  { %v220_v23 = vmax.f32 %v156_v13, 0.0  ;;  %v221_v24 = vmax.f32 %v157_v14, 0.0  ;;  %v160_v25 = vadd.f32 %v965_v5, %v89_v15  ;;  %v222_v28 = vmax.f32 %v158_v18, 0.0  ;;  %v30_v54 = vld [vmem:[%s1375_s0 + $0x80] sm:$0xff]  ;;  %v31_v63 = vld [vmem:[%s1375_s0 + $0x88] sm:$0xff]  ;;  %v32_v6 = vld [vmem:[%s1375_s0 + $0x90] sm:$0xff] }
   0x8   :  { %v223_v29 = vmax.f32 %v159_v19, 0.0  ;;  %v225_v36 = vmax.f32 %v161_v26, 0.0  ;;  %v93_v37 = vmul.f32 %v958_v2, %v22_v22  ;;  %v226_v41 = vmax.f32 %v162_v30, 0.0  ;;  %v33_v7 = vld [vmem:[%s1375_s0 + $0x98] sm:$0xff]  ;;  %v34_v12 = vld [vmem:[%s1375_s0 + $0xa0] sm:$0xff]  ;;  %v35_v13 = vld [vmem:[%s1375_s0 + $0xa8] sm:$0xff] }
   0x9   :  { %v741_v34 = vpack.c.bf16 %v221_v24, %v220_v23  ;;  %v224_v35 = vmax.f32 %v160_v25, 0.0  ;;  %v227_v42 = vmax.f32 %v163_v31, 0.0  ;;  %v94_v43 = vmul.f32 %v958_v2, %v23_v27  ;;  %v36_v18 = vld [vmem:[%s1375_s0 + $0xb0] sm:$0xff]  ;;  %v37_v23 = vld [vmem:[%s1375_s0 + $0xb8] sm:$0xff] }
   0xa   :  { %v746_v40 = vpack.c.bf16 %v223_v29, %v222_v28  ;;  %v164_v46 = vadd.f32 %v965_v5, %v93_v37  ;;  %v95_v47 = vmul.f32 %v958_v2, %v24_v32  ;;  %v96_v48 = vmul.f32 %v958_v2, %v25_v33  ;;  %v38_v28 = vld [vmem:[%s1375_s0 + $0xc0] sm:$0xff]  ;;  %v39_v37 = vld [vmem:[%s1375_s0 + $0xc8] sm:$0xff] }
   0xb   :  { %742 = vst [vmem:[%s1378_s3] sm:$0xff] %v741_v34   ;;  %v751_v45 = vpack.c.bf16 %v225_v36, %v224_v35  ;;  %v756_v50 = vpack.c.bf16 %v227_v42, %v226_v41  ;;  %v165_v51 = vadd.f32 %v965_v5, %v94_v43  ;;  %v97_v52 = vmul.f32 %v958_v2, %v26_v38  ;;  %v40_v42 = vld [vmem:[%s1375_s0 + $0xd0] sm:$0xff]  ;;  %v41_v43 = vld [vmem:[%s1375_s0 + $0xd8] sm:$0xff] }
   0xc   :  { %898 = vst [vmem:[%s1378_s3 + $0x8] sm:$0xff] %v746_v40   ;;  %v98_v53 = vmul.f32 %v958_v2, %v27_v39  ;;  %v228_v55 = vmax.f32 %v164_v46, 0.0  ;;  %v166_v56 = vadd.f32 %v965_v5, %v95_v47  ;;  %v167_v57 = vadd.f32 %v965_v5, %v96_v48  ;;  %v42_v48 = vld [vmem:[%s1375_s0 + $0xe0] sm:$0xff] }
   0xd   :  { %899 = vst [vmem:[%s1378_s3 + $0x10] sm:$0xff] %v751_v45   ;;  %v99_v58 = vmul.f32 %v958_v2, %v28_v44  ;;  %900 = vst [vmem:[%s1378_s3 + $0x18] sm:$0xff] %v756_v50   ;;  %v229_v59 = vmax.f32 %v165_v51, 0.0  ;;  %v168_v60 = vadd.f32 %v965_v5, %v97_v52  ;;  %v100_v62 = vmul.f32 %v958_v2, %v29_v49  ;;  %v43_v49 = vld [vmem:[%s1375_s0 + $0xe8] sm:$0xff] }
   0xe   :  { %v169_v61 = vadd.f32 %v965_v5, %v98_v53  ;;  %v230_v0 = vmax.f32 %v166_v56, 0.0  ;;  %v231_v1 = vmax.f32 %v167_v57, 0.0  ;;  %v101_v4 = vmul.f32 %v958_v2, %v30_v54  ;;  %v44_v54 = vld [vmem:[%s1375_s0 + $0xf0] sm:$0xff] }
   0xf   :  { %v170_v3 = vadd.f32 %v965_v5, %v99_v58  ;;  %v761_v8 = vpack.c.bf16 %v229_v59, %v228_v55  ;;  %v232_v9 = vmax.f32 %v168_v60, 0.0  ;;  %v171_v11 = vadd.f32 %v965_v5, %v100_v62  ;;  %v45_v59 = vld [vmem:[%s1375_s0 + $0xf8] sm:$0xff] }
  0x10   :  { %v233_v10 = vmax.f32 %v169_v61, 0.0  ;;  %v766_v14 = vpack.c.bf16 %v231_v1, %v230_v0  ;;  %v102_v16 = vmul.f32 %v958_v2, %v31_v63  ;;  %v172_v17 = vadd.f32 %v965_v5, %v101_v4  ;;  %v46_v0 = vld [vmem:[%s1375_s0 + $0x100] sm:$0xff] }
  0x11   :  { %v234_v15 = vmax.f32 %v170_v3, 0.0  ;;  %901 = vst [vmem:[%s1378_s3 + $0x20] sm:$0xff] %v761_v8   ;;  %v235_v20 = vmax.f32 %v171_v11, 0.0  ;;  %v103_v21 = vmul.f32 %v958_v2, %v32_v6  ;;  %v104_v22 = vmul.f32 %v958_v2, %v33_v7  ;;  %v47_v11 = vld [vmem:[%s1375_s0 + $0x108] sm:$0xff] }
  0x12   :  { %v771_v19 = vpack.c.bf16 %v233_v10, %v232_v9  ;;  %902 = vst [vmem:[%s1378_s3 + $0x28] sm:$0xff] %v766_v14   ;;  %v173_v24 = vadd.f32 %v965_v5, %v102_v16  ;;  %v236_v25 = vmax.f32 %v172_v17, 0.0  ;;  %v105_v26 = vmul.f32 %v958_v2, %v34_v12  ;;  %v48_v16 = vld [vmem:[%s1375_s0 + $0x110] sm:$0xff]  ;;  %v49_v17 = vld [vmem:[%s1375_s0 + $0x118] sm:$0xff] }
  0x13   :  { %v106_v27 = vmul.f32 %v958_v2, %v35_v13  ;;  %v776_v29 = vpack.c.bf16 %v235_v20, %v234_v15  ;;  %v174_v30 = vadd.f32 %v965_v5, %v103_v21  ;;  %v175_v31 = vadd.f32 %v965_v5, %v104_v22  ;;  %v50_v22 = vld [vmem:[%s1375_s0 + $0x120] sm:$0xff] }
  0x14   :  { %903 = vst [vmem:[%s1378_s3 + $0x30] sm:$0xff] %v771_v19   ;;  %v107_v32 = vmul.f32 %v958_v2, %v36_v18  ;;  %v237_v33 = vmax.f32 %v173_v24, 0.0  ;;  %v176_v34 = vadd.f32 %v965_v5, %v105_v26  ;;  %v108_v36 = vmul.f32 %v958_v2, %v37_v23  ;;  %v51_v23 = vld [vmem:[%s1375_s0 + $0x128] sm:$0xff] }
  0x15   :  { %v177_v35 = vadd.f32 %v965_v5, %v106_v27  ;;  %904 = vst [vmem:[%s1378_s3 + $0x38] sm:$0xff] %v776_v29   ;;  %v238_v38 = vmax.f32 %v174_v30, 0.0  ;;  %v239_v39 = vmax.f32 %v175_v31, 0.0  ;;  %v109_v41 = vmul.f32 %v958_v2, %v38_v28  ;;  %v52_v28 = vld [vmem:[%s1375_s0 + $0x130] sm:$0xff] }
  0x16   :  { %v178_v40 = vadd.f32 %v965_v5, %v107_v32  ;;  %v781_v44 = vpack.c.bf16 %v237_v33, %v236_v25  ;;  %v240_v45 = vmax.f32 %v176_v34, 0.0  ;;  %v179_v47 = vadd.f32 %v965_v5, %v108_v36  ;;  %v53_v33 = vld [vmem:[%s1375_s0 + $0x138] sm:$0xff] }
  0x17   :  { %v241_v46 = vmax.f32 %v177_v35, 0.0  ;;  %v786_v50 = vpack.c.bf16 %v239_v39, %v238_v38  ;;  %v110_v52 = vmul.f32 %v958_v2, %v39_v37  ;;  %v180_v53 = vadd.f32 %v965_v5, %v109_v41  ;;  %v54_v38 = vld [vmem:[%s1375_s0 + $0x140] sm:$0xff] }
  0x18   :  { %v242_v51 = vmax.f32 %v178_v40, 0.0  ;;  %905 = vst [vmem:[%s1378_s3 + $0x40] sm:$0xff] %v781_v44   ;;  %v243_v56 = vmax.f32 %v179_v47, 0.0  ;;  %v111_v57 = vmul.f32 %v958_v2, %v40_v42  ;;  %v112_v58 = vmul.f32 %v958_v2, %v41_v43  ;;  %v55_v47 = vld [vmem:[%s1375_s0 + $0x148] sm:$0xff] }
  0x19   :  { %v791_v55 = vpack.c.bf16 %v241_v46, %v240_v45  ;;  %906 = vst [vmem:[%s1378_s3 + $0x48] sm:$0xff] %v786_v50   ;;  %v181_v60 = vadd.f32 %v965_v5, %v110_v52  ;;  %v244_v61 = vmax.f32 %v180_v53, 0.0  ;;  %v113_v62 = vmul.f32 %v958_v2, %v42_v48  ;;  %v56_v52 = vld [vmem:[%s1375_s0 + $0x150] sm:$0xff]  ;;  %v57_v53 = vld [vmem:[%s1375_s0 + $0x158] sm:$0xff] }
  0x1a   :  { %v114_v63 = vmul.f32 %v958_v2, %v43_v49  ;;  %v796_v1 = vpack.c.bf16 %v243_v56, %v242_v51  ;;  %v182_v3 = vadd.f32 %v965_v5, %v111_v57  ;;  %v183_v4 = vadd.f32 %v965_v5, %v112_v58  ;;  %v58_v58 = vld [vmem:[%s1375_s0 + $0x160] sm:$0xff] }
  0x1b   :  { %907 = vst [vmem:[%s1378_s3 + $0x50] sm:$0xff] %v791_v55   ;;  %v115_v6 = vmul.f32 %v958_v2, %v44_v54  ;;  %v245_v7 = vmax.f32 %v181_v60, 0.0  ;;  %v184_v8 = vadd.f32 %v965_v5, %v113_v62  ;;  %v116_v10 = vmul.f32 %v958_v2, %v45_v59  ;;  %v59_v59 = vld [vmem:[%s1375_s0 + $0x168] sm:$0xff] }
  0x1c   :  { %v185_v9 = vadd.f32 %v965_v5, %v114_v63  ;;  %908 = vst [vmem:[%s1378_s3 + $0x58] sm:$0xff] %v796_v1   ;;  %v246_v12 = vmax.f32 %v182_v3, 0.0  ;;  %v247_v13 = vmax.f32 %v183_v4, 0.0  ;;  %v117_v15 = vmul.f32 %v958_v2, %v46_v0  ;;  %v60_v0 = vld [vmem:[%s1375_s0 + $0x170] sm:$0xff] }
  0x1d   :  { %v186_v14 = vadd.f32 %v965_v5, %v115_v6  ;;  %v801_v18 = vpack.c.bf16 %v245_v7, %v244_v61  ;;  %v248_v19 = vmax.f32 %v184_v8, 0.0  ;;  %v187_v21 = vadd.f32 %v965_v5, %v116_v10  ;;  %v61_v7 = vld [vmem:[%s1375_s0 + $0x178] sm:$0xff] }
  0x1e   :  { %v249_v20 = vmax.f32 %v185_v9, 0.0  ;;  %v806_v24 = vpack.c.bf16 %v247_v13, %v246_v12  ;;  %v118_v26 = vmul.f32 %v958_v2, %v47_v11  ;;  %v188_v27 = vadd.f32 %v965_v5, %v117_v15  ;;  %v62_v12 = vld [vmem:[%s1375_s0 + $0x180] sm:$0xff] }
  0x1f   :  { %v250_v25 = vmax.f32 %v186_v14, 0.0  ;;  %909 = vst [vmem:[%s1378_s3 + $0x60] sm:$0xff] %v801_v18   ;;  %v251_v30 = vmax.f32 %v187_v21, 0.0  ;;  %v119_v31 = vmul.f32 %v958_v2, %v48_v16  ;;  %v120_v32 = vmul.f32 %v958_v2, %v49_v17  ;;  %v63_v21 = vld [vmem:[%s1375_s0 + $0x188] sm:$0xff] }
  0x20   :  { %v811_v29 = vpack.c.bf16 %v249_v20, %v248_v19  ;;  %910 = vst [vmem:[%s1378_s3 + $0x68] sm:$0xff] %v806_v24   ;;  %v189_v34 = vadd.f32 %v965_v5, %v118_v26  ;;  %v252_v35 = vmax.f32 %v188_v27, 0.0  ;;  %v121_v36 = vmul.f32 %v958_v2, %v50_v22  ;;  %v64_v26 = vld [vmem:[%s1375_s0 + $0x190] sm:$0xff]  ;;  %v65_v27 = vld [vmem:[%s1375_s0 + $0x198] sm:$0xff] }
  0x21   :  { %v122_v37 = vmul.f32 %v958_v2, %v51_v23  ;;  %v816_v39 = vpack.c.bf16 %v251_v30, %v250_v25  ;;  %v190_v40 = vadd.f32 %v965_v5, %v119_v31  ;;  %v191_v41 = vadd.f32 %v965_v5, %v120_v32  ;;  %v66_v32 = vld [vmem:[%s1375_s0 + $0x1a0] sm:$0xff] }
  0x22   :  { %911 = vst [vmem:[%s1378_s3 + $0x70] sm:$0xff] %v811_v29   ;;  %v123_v42 = vmul.f32 %v958_v2, %v52_v28  ;;  %v253_v43 = vmax.f32 %v189_v34, 0.0  ;;  %v192_v44 = vadd.f32 %v965_v5, %v121_v36  ;;  %v124_v46 = vmul.f32 %v958_v2, %v53_v33  ;;  %v67_v33 = vld [vmem:[%s1375_s0 + $0x1a8] sm:$0xff] }
  0x23   :  { %v193_v45 = vadd.f32 %v965_v5, %v122_v37  ;;  %912 = vst [vmem:[%s1378_s3 + $0x78] sm:$0xff] %v816_v39   ;;  %v254_v48 = vmax.f32 %v190_v40, 0.0  ;;  %v255_v49 = vmax.f32 %v191_v41, 0.0  ;;  %v125_v51 = vmul.f32 %v958_v2, %v54_v38  ;;  %v68_v38 = vld [vmem:[%s1375_s0 + $0x1b0] sm:$0xff] }
  0x24   :  { %v194_v50 = vadd.f32 %v965_v5, %v123_v42  ;;  %v821_v54 = vpack.c.bf16 %v253_v43, %v252_v35  ;;  %v256_v55 = vmax.f32 %v192_v44, 0.0  ;;  %v195_v57 = vadd.f32 %v965_v5, %v124_v46  ;;  %v69_v43 = vld [vmem:[%s1375_s0 + $0x1b8] sm:$0xff] }
  0x25   :  { %v257_v56 = vmax.f32 %v193_v45, 0.0  ;;  %v826_v60 = vpack.c.bf16 %v255_v49, %v254_v48  ;;  %v126_v62 = vmul.f32 %v958_v2, %v55_v47  ;;  %v196_v63 = vadd.f32 %v965_v5, %v125_v51  ;;  %v70_v48 = vld [vmem:[%s1375_s0 + $0x1c0] sm:$0xff] }
  0x26   :  { %v258_v61 = vmax.f32 %v194_v50, 0.0  ;;  %913 = vst [vmem:[%s1378_s3 + $0x80] sm:$0xff] %v821_v54   ;;  %v259_v3 = vmax.f32 %v195_v57, 0.0  ;;  %v127_v4 = vmul.f32 %v958_v2, %v56_v52  ;;  %v128_v6 = vmul.f32 %v958_v2, %v57_v53  ;;  %v71_v57 = vld [vmem:[%s1375_s0 + $0x1c8] sm:$0xff] }
  0x27   :  { %v831_v1 = vpack.c.bf16 %v257_v56, %v256_v55  ;;  %914 = vst [vmem:[%s1378_s3 + $0x88] sm:$0xff] %v826_v60   ;;  %v197_v8 = vadd.f32 %v965_v5, %v126_v62  ;;  %v260_v9 = vmax.f32 %v196_v63, 0.0  ;;  %v129_v10 = vmul.f32 %v958_v2, %v58_v58  ;;  %v72_v62 = vld [vmem:[%s1375_s0 + $0x1d0] sm:$0xff]  ;;  %v73_v63 = vld [vmem:[%s1375_s0 + $0x1d8] sm:$0xff] }
  0x28   :  { %v130_v11 = vmul.f32 %v958_v2, %v59_v59  ;;  %v836_v13 = vpack.c.bf16 %v259_v3, %v258_v61  ;;  %v198_v14 = vadd.f32 %v965_v5, %v127_v4  ;;  %v199_v15 = vadd.f32 %v965_v5, %v128_v6  ;;  %v74_v6 = vld [vmem:[%s1375_s0 + $0x1e0] sm:$0xff] }
  0x29   :  { %915 = vst [vmem:[%s1378_s3 + $0x90] sm:$0xff] %v831_v1   ;;  %v131_v16 = vmul.f32 %v958_v2, %v60_v0  ;;  %v261_v17 = vmax.f32 %v197_v8, 0.0  ;;  %v200_v18 = vadd.f32 %v965_v5, %v129_v10  ;;  %v132_v20 = vmul.f32 %v958_v2, %v61_v7  ;;  %v75_v7 = vld [vmem:[%s1375_s0 + $0x1e8] sm:$0xff] }
  0x2a   :  { %v201_v19 = vadd.f32 %v965_v5, %v130_v11  ;;  %916 = vst [vmem:[%s1378_s3 + $0x98] sm:$0xff] %v836_v13   ;;  %v262_v22 = vmax.f32 %v198_v14, 0.0  ;;  %v263_v23 = vmax.f32 %v199_v15, 0.0  ;;  %v133_v25 = vmul.f32 %v958_v2, %v62_v12  ;;  %v76_v12 = vld [vmem:[%s1375_s0 + $0x1f0] sm:$0xff] }
  0x2b   :  { %v202_v24 = vadd.f32 %v965_v5, %v131_v16  ;;  %v841_v28 = vpack.c.bf16 %v261_v17, %v260_v9  ;;  %v264_v29 = vmax.f32 %v200_v18, 0.0  ;;  %v203_v31 = vadd.f32 %v965_v5, %v132_v20  ;;  %v77_v17 = vld [vmem:[%s1375_s0 + $0x1f8] sm:$0xff] }
  0x2c   :  { %v265_v30 = vmax.f32 %v201_v19, 0.0  ;;  %v846_v34 = vpack.c.bf16 %v263_v23, %v262_v22  ;;  %v134_v36 = vmul.f32 %v958_v2, %v63_v21  ;;  %v204_v37 = vadd.f32 %v965_v5, %v133_v25 }
  0x2d   :  { %v266_v35 = vmax.f32 %v202_v24, 0.0  ;;  %917 = vst [vmem:[%s1378_s3 + $0xa0] sm:$0xff] %v841_v28   ;;  %v267_v40 = vmax.f32 %v203_v31, 0.0  ;;  %v135_v41 = vmul.f32 %v958_v2, %v64_v26  ;;  %v136_v42 = vmul.f32 %v958_v2, %v65_v27 }
  0x2e   :  { %v851_v39 = vpack.c.bf16 %v265_v30, %v264_v29  ;;  %918 = vst [vmem:[%s1378_s3 + $0xa8] sm:$0xff] %v846_v34   ;;  %v205_v44 = vadd.f32 %v965_v5, %v134_v36  ;;  %v268_v45 = vmax.f32 %v204_v37, 0.0  ;;  %v137_v46 = vmul.f32 %v958_v2, %v66_v32 }
  0x2f   :  { %v138_v47 = vmul.f32 %v958_v2, %v67_v33  ;;  %v856_v49 = vpack.c.bf16 %v267_v40, %v266_v35  ;;  %v206_v50 = vadd.f32 %v965_v5, %v135_v41  ;;  %v207_v51 = vadd.f32 %v965_v5, %v136_v42 }
  0x30   :  { %919 = vst [vmem:[%s1378_s3 + $0xb0] sm:$0xff] %v851_v39   ;;  %v139_v52 = vmul.f32 %v958_v2, %v68_v38  ;;  %v269_v53 = vmax.f32 %v205_v44, 0.0  ;;  %v208_v54 = vadd.f32 %v965_v5, %v137_v46  ;;  %v140_v56 = vmul.f32 %v958_v2, %v69_v43 }
  0x31   :  { %v209_v55 = vadd.f32 %v965_v5, %v138_v47  ;;  %920 = vst [vmem:[%s1378_s3 + $0xb8] sm:$0xff] %v856_v49   ;;  %v270_v58 = vmax.f32 %v206_v50, 0.0  ;;  %v271_v59 = vmax.f32 %v207_v51, 0.0  ;;  %v141_v61 = vmul.f32 %v958_v2, %v70_v48 }
  0x32   :  { %v210_v60 = vadd.f32 %v965_v5, %v139_v52  ;;  %v861_v0 = vpack.c.bf16 %v269_v53, %v268_v45  ;;  %v272_v1 = vmax.f32 %v208_v54, 0.0  ;;  %v211_v4 = vadd.f32 %v965_v5, %v140_v56 }
  0x33   :  { %v273_v3 = vmax.f32 %v209_v55, 0.0  ;;  %v866_v8 = vpack.c.bf16 %v271_v59, %v270_v58  ;;  %v142_v10 = vmul.f32 %v958_v2, %v71_v57  ;;  %v212_v11 = vadd.f32 %v965_v5, %v141_v61 }
  0x34   :  { %v274_v9 = vmax.f32 %v210_v60, 0.0  ;;  %921 = vst [vmem:[%s1378_s3 + $0xc0] sm:$0xff] %v861_v0   ;;  %v275_v14 = vmax.f32 %v211_v4, 0.0  ;;  %v143_v15 = vmul.f32 %v958_v2, %v72_v62  ;;  %v144_v16 = vmul.f32 %v958_v2, %v73_v63 }
  0x35   :  { %v871_v13 = vpack.c.bf16 %v273_v3, %v272_v1  ;;  %922 = vst [vmem:[%s1378_s3 + $0xc8] sm:$0xff] %v866_v8   ;;  %v213_v18 = vadd.f32 %v965_v5, %v142_v10  ;;  %v276_v19 = vmax.f32 %v212_v11, 0.0  ;;  %v145_v20 = vmul.f32 %v958_v2, %v74_v6 }
  0x36   :  { %v146_v21 = vmul.f32 %v958_v2, %v75_v7  ;;  %v876_v22 = vpack.c.bf16 %v275_v14, %v274_v9  ;;  %v214_v23 = vadd.f32 %v965_v5, %v143_v15  ;;  %v215_v24 = vadd.f32 %v965_v5, %v144_v16 }
  0x37   :  { %923 = vst [vmem:[%s1378_s3 + $0xd0] sm:$0xff] %v871_v13   ;;  %v147_v25 = vmul.f32 %v958_v2, %v76_v12  ;;  %v277_v26 = vmax.f32 %v213_v18, 0.0  ;;  %v216_v27 = vadd.f32 %v965_v5, %v145_v20  ;;  %v148_v29 = vmul.f32 %v958_v2, %v77_v17 }
  0x38   :  { %v217_v28 = vadd.f32 %v965_v5, %v146_v21  ;;  %924 = vst [vmem:[%s1378_s3 + $0xd8] sm:$0xff] %v876_v22   ;;  %v278_v30 = vmax.f32 %v214_v23, 0.0  ;;  %v279_v31 = vmax.f32 %v215_v24, 0.0 }
  0x39   :  { %v218_v32 = vadd.f32 %v965_v5, %v147_v25  ;;  %v881_v33 = vpack.c.bf16 %v277_v26, %v276_v19  ;;  %v280_v34 = vmax.f32 %v216_v27, 0.0  ;;  %v219_v36 = vadd.f32 %v965_v5, %v148_v29 }
  0x3a   :  { %v281_v35 = vmax.f32 %v217_v28, 0.0  ;;  %v886_v37 = vpack.c.bf16 %v279_v31, %v278_v30 }
  0x3b   :  { %v282_v38 = vmax.f32 %v218_v32, 0.0  ;;  %925 = vst [vmem:[%s1378_s3 + $0xe0] sm:$0xff] %v881_v33   ;;  %v283_v39 = vmax.f32 %v219_v36, 0.0 }
  0x3c   :  { %v891_v2 = vpack.c.bf16 %v281_v35, %v280_v34  ;;  %926 = vst [vmem:[%s1378_s3 + $0xe8] sm:$0xff] %v886_v37  }
  0x3d   :  { %v896_v40 = vpack.c.bf16 %v283_v39, %v282_v38 }
  0x3e   :  { %927 = vst [vmem:[%s1378_s3 + $0xf0] sm:$0xff] %v891_v2  }
  0x3f   :  { %928 = vst [vmem:[%s1378_s3 + $0xf8] sm:$0xff] %v896_v40  }

// kernel: vgg_block_forward.4
= control target key start
LH: loop header
LB: loop body
LE: loop exit
PB: predicated region body
PF: predicated region fallthrough
CT: control target
= control target key end

     0   :  { %s7130_s15 = smov 0   ;;  %s7132_s16 = smov 0   ;;  %s8992_s0 = inlined_call_operand.vmem [shape: bf16[2,18,18,128], index: 0, kind: input, shape index: {}]   ;;  %s8993_s1 = inlined_call_operand.vmem [shape: bf16[3,3,128,128], index: 1, kind: input, shape index: {}]   ;;  %s8994_s2 = inlined_call_operand.vmem [shape: f32[2,256,128], index: 2, kind: output, shape index: {0}]   ;;  %s8995_s3 = inlined_call_operand.vmem [shape: f32[2,1,128], index: 3, kind: output, shape index: {1}]   ;;  %s8996_s4 = inlined_call_operand.vmem [shape: f32[2,1,128], index: 4, kind: output, shape index: {2}]  }
   0x1   :  { %s7134_s17 = smov 0  }
   0x2 LB: > { %s27_s18 = sadd.s32 1, %s7098_s16  ;;  %p5353_p0 = scmp.ge.s32.totalorder %s7102_s17, 1  ;;  %s7102_s17 = sphi %s7134_s17, %s15_s17   ;;  %s7098_s16 = sphi %s7132_s16, %s9064_s16   ;;  %s7094_s15 = sphi %s7130_s15, %s9063_s15  }
   0x3   : > { %p29_p1 = scmp.ge.s32.totalorder %s27_s18, 2  ;;  %p181_p2 = scmp.lt.s32.totalorder %s7102_s17, 3 }
   0x5   : > { %s9066_s18 = smov (%p29_p1, %s27_s18), 0  ;;  %p182_p3 = pnand %p5353_p0, %p181_p2 }
   0x7   : > { %185 = sbr.rel (%p182_p3) target bundleno = 606 (0x25e), region = 28 }
   0xe   : > { %v6890_v0 = vld [vmem:[%s8993_s1 + $0x40] sm:$0xff]   ;;  %p217_p4 = scmp.lt.s32.totalorder %s7094_s15, 1  ;;  %v6892_v2 = vld [vmem:[%s8993_s1 + $0x48] sm:$0xff]   ;;  %v6894_v4 = vld [vmem:[%s8993_s1 + $0x50] sm:$0xff]   ;;  %vm307_vm0 = vsmask.f32 3328 }
   0xf   : > { %v6891_v1 = vld [vmem:[%s8993_s1 + $0x100] sm:$0xff]   ;;  %6160 = vmatprep.subr.bf16.mxu1 %v6890_v0  ;;  %v6893_v3 = vld [vmem:[%s8993_s1 + $0x108] sm:$0xff]   ;;  %v6895_v5 = vld [vmem:[%s8993_s1 + $0x110] sm:$0xff]   ;;  %vm308_vm1 = vsmask.f32 7440  ;;  %vm1337_vm3 = vcmask 1042432  }
  0x10   : > { %6352 = vmatprep.subr.bf16.mxu0 %v6891_v1  ;;  %6161 = vmatpush3.bf16.msra.mxu1 %v6890_v0  ;;  %s9068_s15 = smov (!%p217_p4, %s7094_s15), 1  ;;  %v6896_v6 = vld [vmem:[%s8993_s1 + $0x58] sm:$0xff]   ;;  %v6898_v8 = vld [vmem:[%s8993_s1 + $0x60] sm:$0xff]   ;;  %v6900_v10 = vld [vmem:[%s8993_s1 + $0x68] sm:$0xff]   ;;  %vm1338_vm4 = vcmask 1046532   ;;  %v7104_v37 = vmov 0.0  }
  0x11   : > { %6353 = vmatpush3.bf16.msra.mxu0 %v6891_v1  ;;  %6162 = vmatprep.subr.bf16.mxu1 %v6892_v2  ;;  %v6897_v7 = vld [vmem:[%s8993_s1 + $0x118] sm:$0xff]   ;;  %s6864_s9 = smul.u32 216, %s9068_s15  ;;  %v6899_v9 = vld [vmem:[%s8993_s1 + $0x120] sm:$0xff]   ;;  %v6901_v11 = vld [vmem:[%s8993_s1 + $0x128] sm:$0xff]   ;;  %s8916_s10 = scalar_lea.vmem %s8995_s3, %s9068_s15 }
  0x12   : > { %6354 = vmatprep.subr.bf16.mxu0 %v6893_v3  ;;  %v6902_v25 = vld [vmem:[%s8993_s1 + $0x70] sm:$0xff]   ;;  %v6904_v36 = vld [vmem:[%s8993_s1 + $0x78] sm:$0xff]   ;;  %vm7216_vm2 = vmor %vm307_vm0, %vm308_vm1  ;;  %s8922_s13 = scalar_lea.vmem %s8996_s4, %s9068_s15  ;;  %5094 = vst [vmem:[%s8916_s10] sm:$0x1] %v7104_v37  ;;  %s5943_s14 = sshll.u32 %s9068_s15, 8 }
  0x13   : > { %s7184_s20 = scalar_lea.vmem %s8992_s0, %s6864_s9  ;;  %v6903_v30 = vld [vmem:[%s8993_s1 + $0x130] sm:$0xff]   ;;  %v6905_v51 = vld [vmem:[%s8993_s1 + $0x138] sm:$0xff]   ;;  %vm7462_vm5 = vmor %vm1337_vm3, %vm1338_vm4  ;;  %5095 = vst [vmem:[%s8922_s13] sm:$0x1] %v7104_v37  ;;  %s8940_s22 = scalar_lea.vmem %s8994_s2, %s5943_s14 }
  0x14   : > { %6163 = vmatpush3.bf16.msra.mxu1 %v6892_v2  ;;  %v243_v12 = vld [vmem:[%s7184_s20] sm:$0xf]  ;;  %v244_v13 = vld [vmem:[%s7184_s20 + $0x4] sm:$0xf]  ;;  %v291_v14 = vld [vmem:[%s7184_s20 + $0x8] sm:$0x1] }
  0x15   : > { %6355 = vmatpush3.bf16.msra.mxu0 %v6893_v3  ;;  %6164 = vmatprep.subr.bf16.mxu1 %v6894_v4  ;;  %v311_v15 = vshrl.u32 %v243_v12, 16  ;;  %v314_v16 = vshll.u32 %v243_v12, 16  ;;  %v320_v17 = vshll.u32 %v244_v13, 16  ;;  %v324_v18 = vshrl.u32 %v244_v13, 16  ;;  %v5549_v20 = vld [vmem:[%s7184_s20 + $0xc] sm:$0xf] }
  0x16   : > { %6356 = vmatprep.subr.bf16.mxu0 %v6895_v5  ;;  %v330_v19 = vshll.u32 %v291_v14, 16  ;;  %v7197_v23 = vld [vmem:[%s7184_s20 + $0x10] sm:$0xf]  ;;  %v7200_v24 = vld [vmem:[%s7184_s20 + $0x14] sm:$0x1]  ;;  %v2213_v29 = vshrl.u32 %v5549_v20, 16 }
  0x17   : > { %v313_v21 = vrot.slane %v311_v15, 4  ;;  %v316_v22 = vrot.slane %v314_v16, 5  ;;  %v322_v26 = vrot.slane %v320_v17, 5  ;;  %v326_v27 = vrot.slane %v324_v18, 4  ;;  %v245_v35 = vld [vmem:[%s7184_s20 + $0xc] sm:$0xf] }
  0x18   : > { %6165 = vmatpush3.bf16.msra.mxu1 %v6894_v4  ;;  %v332_v28 = vrot.slane %v330_v19, 5  ;;  %v2216_v32 = vshll.u32 %v5549_v20, 16  ;;  %v2222_v33 = vshll.u32 %v7197_v23, 16  ;;  %v2226_v34 = vshrl.u32 %v7197_v23, 16  ;;  %v246_v42 = vld [vmem:[%s7184_s20 + $0x10] sm:$0xf] }
  0x19   : > { %6357 = vmatpush3.bf16.msra.mxu0 %v6895_v5  ;;  %6166 = vmatprep.subr.bf16.mxu1 %v6896_v6  ;;  %v317_v31 = vor.u32 %v316_v22, %v313_v21  ;;  %v327_v38 = vor.u32 %v326_v27, %v322_v26  ;;  %v2215_v39 = vrot.slane %v2213_v29, 4  ;;  %v2232_v40 = vshll.u32 %v7200_v24, 16  ;;  %v292_v55 = vld [vmem:[%s7184_s20 + $0x14] sm:$0x1]  ;;  %v5552_v57 = vld [vmem:[%s7184_s20 + $0x18] sm:$0xf] }
  0x1a   : > { %6358 = vmatprep.subr.bf16.mxu0 %v6897_v7  ;;  %v2987_v41 = vrot.slane %v7200_v24, 5  ;;  %v2218_v44 = vrot.slane %v2216_v32, 5  ;;  %v2224_v45 = vrot.slane %v2222_v33, 5  ;;  %v2228_v46 = vrot.slane %v2226_v34, 4  ;;  %v7233_v62 = vld [vmem:[%s7184_s20 + $0x1c] sm:$0xf] }
  0x1b   : > { %v318_v43 = vrot.slane %v317_v31, 4  ;;  %v328_v47 = vrot.slane %v327_v38, 4  ;;  %v2234_v48 = vrot.slane %v2232_v40, 5  ;;  %v335_v49 = vshrl.u32 %v245_v35, 16  ;;  %v6906_v3 = vld [vmem:[%s8993_s1] sm:$0xff]  }
  0x1c   : > { %6167 = vmatpush3.bf16.msra.mxu1 %v6896_v6  ;;  %v338_v50 = vshll.u32 %v245_v35, 16  ;;  %v2219_v53 = vor.u32 %v2218_v44, %v2215_v39  ;;  %v2229_v54 = vor.u32 %v2228_v46, %v2224_v45  ;;  %v344_v56 = vshll.u32 %v246_v42, 16  ;;  %v7241_v4 = vld [vmem:[%s8993_s1 + $0x140] sm:$0xff]   ;;  %v247_v21 = vld [vmem:[%s7184_s20 + $0x18] sm:$0xf]  ;;  %v6909_v46 = vld [vmem:[%s8993_s1 + $0x8] sm:$0xff]  }
  0x1d   : > { %6359 = vmatpush3.bf16.msra.mxu0 %v6897_v7  ;;  %6168 = vmatprep.subr.bf16.mxu1 %v6898_v8  ;;  %v323_v52 = vsel %vm7216_vm2, %v318_v43, %v322_v26  ;;  %v333_v58 = vsel %vm7216_vm2, %v328_v47, %v332_v28  ;;  %v337_v59 = vrot.slane %v335_v49, 4  ;;  %v348_v61 = vshrl.u32 %v246_v42, 16  ;;  %v248_v28 = vld [vmem:[%s7184_s20 + $0x1c] sm:$0xf]  ;;  %v293_v33 = vld [vmem:[%s7184_s20 + $0x20] sm:$0x1] }
  0x1e   : > { %6360 = vmatprep.subr.bf16.mxu0 %v6899_v9  ;;  %v340_v60 = vrot.slane %v338_v50, 5  ;;  %v5373_v63 = vcombine.low %v323_v52, %v333_v58  ;;  %v2220_v0 = vrot.slane %v2219_v53, 4  ;;  %v2230_v1 = vrot.slane %v2229_v54, 4  ;;  %v5555_v39 = vld [vmem:[%s7184_s20 + $0x24] sm:$0xf] }
  0x1f   : > { %v346_v2 = vrot.slane %v344_v56, 5  ;;  %v350_v6 = vrot.slane %v348_v61, 4  ;;  %v354_v7 = vshll.u32 %v292_v55, 16  ;;  %v2240_v12 = vshll.u32 %v5552_v57, 16  ;;  %v249_v52 = vld [vmem:[%s7184_s20 + $0x24] sm:$0xf] }
  0x20   : > { %6169 = vmatpush3.bf16.msra.mxu1 %v6898_v8  ;;  %v341_v5 = vor.u32 %v340_v60, %v337_v59  ;;  %v7244_v8 = vld [vmem:[%s7184_s20 + $0x20] sm:$0x1]  ;;  %6176 = vmatprep.mubr.bf16.mxu1 %v5373_v63  ;;  %v2246_v19 = vshll.u32 %v7233_v62, 16  ;;  %v2250_v20 = vshrl.u32 %v7233_v62, 16  ;;  %v2991_v27 = vrot.slane %v7233_v62, 5  ;;  %v6908_v63 = vld [vmem:[%s8993_s1 + $0x148] sm:$0xff]  }
  0x21   : > { %6361 = vmatpush3.bf16.msra.mxu0 %v6899_v9  ;;  %6170 = vmatprep.subr.bf16.mxu1 %v6900_v10  ;;  %v2225_v9 = vsel %vm7216_vm2, %v2220_v0, %v2224_v45  ;;  %v351_v15 = vor.u32 %v350_v6, %v346_v2  ;;  %v356_v16 = vrot.slane %v354_v7, 5  ;;  %v2242_v18 = vrot.slane %v2240_v12, 5  ;;  %v7269_v45 = vld [vmem:[%s7184_s20 + $0x28] sm:$0xf] }
  0x22   : > { %6362 = vmatprep.subr.bf16.mxu0 %v6901_v11  ;;  %v342_v14 = vrot.slane %v341_v5, 4  ;;  %v2256_v26 = vshll.u32 %v7244_v8, 16  ;;  %v2252_v31 = vrot.slane %v2250_v20, 4  ;;  %v2994_v32 = vrot.slane %v7244_v8, 5  ;;  %v250_v5 = vld [vmem:[%s7184_s20 + $0x28] sm:$0xf] }
  0x23   : > { %v359_v38 = vshrl.u32 %v247_v21, 16  ;;  %v362_v44 = vshll.u32 %v247_v21, 16  ;;  %v372_v49 = vshrl.u32 %v248_v28, 16  ;;  %v378_v50 = vshll.u32 %v293_v33, 16  ;;  %v7300_v33 = vld [vmem:[%s7184_s20 + $0x34] sm:$0xf] }
  0x24   : > { %6171 = vmatpush3.bf16.msra.mxu1 %v6900_v10  ;;  %v2235_v10 = vsel %vm7216_vm2, %v2230_v1, %v2234_v48  ;;  %v347_v22 = vsel %vm7216_vm2, %v342_v14, %v346_v2  ;;  %v2258_v35 = vrot.slane %v2256_v26, 5  ;;  %v368_v48 = vshll.u32 %v248_v28, 16 }
  0x25   : > { %6363 = vmatpush3.bf16.msra.mxu0 %v6901_v11  ;;  %6172 = vmatprep.subr.bf16.mxu1 %v6902_v25  ;;  %v2237_v11 = vshrl.u32 %v5552_v57, 16  ;;  %v5613_v13 = vcombine.low %v2225_v9, %v2235_v10  ;;  %v361_v47 = vrot.slane %v359_v38, 4  ;;  %v364_v55 = vrot.slane %v362_v44, 5 }
  0x26   : > { %6364 = vmatprep.subr.bf16.mxu0 %v6903_v30  ;;  %v2261_v56 = vshrl.u32 %v5555_v39, 16  ;;  %v370_v57 = vrot.slane %v368_v48, 5  ;;  %v374_v58 = vrot.slane %v372_v49, 4  ;;  %v380_v59 = vrot.slane %v378_v50, 5  ;;  %v6911_v48 = vld [vmem:[%s8993_s1 + $0x158] sm:$0xff]  }
  0x27   : > { %v2239_v17 = vrot.slane %v2237_v11, 4  ;;  %6368 = vmatprep.mubr.bf16.mxu0 %v5613_v13  ;;  %v2264_v60 = vshll.u32 %v5555_v39, 16  ;;  %v365_v0 = vor.u32 %v364_v55, %v361_v47  ;;  %v2270_v2 = vshll.u32 %v7269_v45, 16  ;;  %v294_v11 = vld [vmem:[%s7184_s20 + $0x2c] sm:$0x1] }
  0x28   : > { %6173 = vmatpush3.bf16.msra.mxu1 %v6902_v25  ;;  %v352_v25 = vrot.slane %v351_v15, 4  ;;  %v2263_v1 = vrot.slane %v2261_v56, 4  ;;  %v375_v7 = vor.u32 %v374_v58, %v370_v57  ;;  %v2274_v10 = vshrl.u32 %v7269_v45, 16 }
  0x29   : > { %6365 = vmatpush3.bf16.msra.mxu0 %v6903_v30  ;;  %6174 = vmatprep.subr.bf16.mxu1 %v6904_v36  ;;  %v2243_v29 = vor.u32 %v2242_v18, %v2239_v17  ;;  %v2248_v30 = vrot.slane %v2246_v19, 5  ;;  %v2266_v9 = vrot.slane %v2264_v60, 5  ;;  %v366_v12 = vrot.slane %v365_v0, 4  ;;  %v6918_v60 = vld [vmem:[%s8993_s1 + $0x20] sm:$0xff]  }
  0x2a   : > { %6366 = vmatprep.subr.bf16.mxu0 %v6905_v51  ;;  %v357_v34 = vsel %vm7216_vm2, %v352_v25, %v356_v16  ;;  %v2272_v13 = vrot.slane %v2270_v2, 5  ;;  %v383_v15 = vshrl.u32 %v249_v52, 16  ;;  %v5558_v16 = vld [vmem:[%s7184_s20 + $0x30] sm:$0xf]  ;;  %v376_v17 = vrot.slane %v375_v7, 4 }
  0x2b   : > { %v5374_v40 = vcombine.low %v347_v22, %v357_v34  ;;  %v2244_v42 = vrot.slane %v2243_v29, 4  ;;  %v2253_v43 = vor.u32 %v2252_v31, %v2248_v30  ;;  %v2267_v18 = vor.u32 %v2266_v9, %v2263_v1  ;;  %v6915_v34 = vld [vmem:[%s8993_s1 + $0x18] sm:$0xff]  }
  0x2c   : > { %6175 = vmatpush3.bf16.msra.mxu1 %v6904_v36  ;;  %v7265_v36 = vrot.slane %v2991_v27, 4  ;;  %v2276_v19 = vrot.slane %v2274_v10, 4  ;;  %v386_v20 = vshll.u32 %v249_v52, 16  ;;  %v371_v21 = vsel %vm7216_vm2, %v366_v12, %v370_v57  ;;  %v295_v2 = vld [vmem:[%s7184_s20 + $0x38] sm:$0x1] }
  0x2d   : > { %6367 = vmatpush3.bf16.msra.mxu0 %v6905_v51  ;;  %6208 = vmatprep.subr.bf16.mxu1 %v6906_v3  ;;  %v7275_v51 = vld [vmem:[%s7184_s20 + $0x2c] sm:$0x1]  ;;  %v2249_v53 = vsel %vm7216_vm2, %v2244_v42, %v2248_v30  ;;  %v2254_v54 = vrot.slane %v2253_v43, 4  ;;  %v385_v25 = vrot.slane %v383_v15, 4  ;;  %v392_v26 = vshll.u32 %v250_v5, 16 }
  0x2e   : > { %6400 = vmatprep.subr.bf16.mxu0 %v7241_v4  ;;  %v2280_v14 = vshll.u32 %v7275_v51, 16  ;;  %v381_v28 = vsel %vm7216_vm2, %v376_v17, %v380_v59  ;;  %v2268_v29 = vrot.slane %v2267_v18, 4  ;;  %v2277_v30 = vor.u32 %v2276_v19, %v2272_v13  ;;  %v252_v59 = vld [vmem:[%s7184_s20 + $0x34] sm:$0xf]  ;;  %v5561_v9 = vld [vmem:[%s7184_s20 + $0x3c] sm:$0xf] }
  0x2f   : > { %6177 = vmatmul.mubr.bf16.vlgmr.msra.gmra.mrb[0].mxu1 %v5374_v40  ;;  %v2259_v61 = vsel %vm7216_vm2, %v2254_v54, %v2258_v35  ;;  %v388_v31 = vrot.slane %v386_v20, 5  ;;  %v5375_v35 = vcombine.low %v371_v21, %v381_v28  ;;  %v394_v38 = vrot.slane %v392_v26, 5  ;;  %v251_v54 = vld [vmem:[%s7184_s20 + $0x30] sm:$0xf]  ;;  %v7334_v19 = vld [vmem:[%s7184_s20 + $0x40] sm:$0xf] }
  0x30   : > { %6209 = vmatpush3.bf16.msra.mxu1 %v6906_v3  ;;  %v6912_v3 = vld [vmem:[%s8993_s1 + $0x10] sm:$0xff]   ;;  %v5614_v6 = vcombine.low %v2249_v53, %v2259_v61  ;;  %v2282_v22 = vrot.slane %v2280_v14, 5  ;;  %v396_v39 = vshrl.u32 %v250_v5, 16  ;;  %v402_v40 = vshll.u32 %v294_v11, 16  ;;  %v6920_v14 = vld [vmem:[%s8993_s1 + $0x28] sm:$0xff]   ;;  %v6913_v20 = vld [vmem:[%s8993_s1 + $0x160] sm:$0xff]  }
  0x31   : > { %6210 = vmatprep.subr.bf16.mxu1 %v6909_v46  ;;  %v2273_v42 = vsel %vm7216_vm2, %v2268_v29, %v2272_v13  ;;  %v2278_v43 = vrot.slane %v2277_v30, 4  ;;  %v389_v44 = vor.u32 %v388_v31, %v385_v25  ;;  %v2285_v47 = vshrl.u32 %v5558_v16, 16  ;;  %6180 = vmatprep.mubr.bf16.mxu1 %v5375_v35  ;;  %v7342_v28 = vld [vmem:[%s7184_s20 + $0x44] sm:$0x1]  ;;  %v6922_v35 = vld [vmem:[%s8993_s1 + $0x30] sm:$0xff]  }
  0x32   : > { %6369 = vmatmul.mubr.bf16.vlgmr.msra.gmra.mrb[0].mxu0 %v5614_v6  ;;  %v398_v49 = vrot.slane %v396_v39, 4  ;;  %v404_v50 = vrot.slane %v402_v40, 5  ;;  %v2288_v52 = vshll.u32 %v5558_v16, 16  ;;  %v2294_v53 = vshll.u32 %v7300_v33, 16 }
  0x33   : > { %6401 = vmatpush3.bf16.msra.mxu0 %v7241_v4  ;;  %v6910_v4 = vld [vmem:[%s8993_s1 + $0x150] sm:$0xff]   ;;  %v2283_v55 = vsel %vm7216_vm2, %v2278_v43, %v2282_v22  ;;  %v390_v56 = vrot.slane %v389_v44, 4  ;;  %v2287_v57 = vrot.slane %v2285_v47, 4  ;;  %v2298_v58 = vshrl.u32 %v7300_v33, 16 }
  0x34   : > { %6211 = vmatpush3.bf16.msra.mxu1 %v6909_v46  ;;  %6402 = vmatprep.subr.bf16.mxu0 %v6908_v63  ;;  %v7311_v46 = vld [vmem:[%s7184_s20 + $0x38] sm:$0x1]  ;;  %v5615_v61 = vcombine.low %v2273_v42, %v2283_v55  ;;  %v2290_v0 = vrot.slane %v2288_v52, 5  ;;  %v2296_v1 = vrot.slane %v2294_v53, 5  ;;  %v407_v7 = vshrl.u32 %v251_v54, 16 }
  0x35   : > { %6212 = vmatprep.subr.bf16.mxu1 %v6912_v3  ;;  %v395_v5 = vsel %vm7216_vm2, %v390_v56, %v394_v38  ;;  %v2304_v6 = vshll.u32 %v7311_v46, 16  ;;  %v410_v12 = vshll.u32 %v251_v54, 16  ;;  %v416_v13 = vshll.u32 %v252_v59, 16  ;;  %v254_v55 = vld [vmem:[%s7184_s20 + $0x40] sm:$0xf] }
  0x36   : > { %6372 = vmatprep.mubr.bf16.mxu0 %v5615_v61  ;;  %v2291_v11 = vor.u32 %v2290_v0, %v2287_v57  ;;  %v409_v17 = vrot.slane %v407_v7, 4  ;;  %v420_v18 = vshrl.u32 %v252_v59, 16  ;;  %v2309_v40 = vshrl.u32 %v5561_v9, 16 }
  0x37   : > { %6403 = vmatpush3.bf16.msra.mxu0 %v6908_v63  ;;  %v399_v63 = vor.u32 %v398_v49, %v394_v38  ;;  %v2306_v16 = vrot.slane %v2304_v6, 5  ;;  %v412_v25 = vrot.slane %v410_v12, 5  ;;  %v418_v26 = vrot.slane %v416_v13, 5 }
  0x38   : > { %6213 = vmatpush3.bf16.msra.mxu1 %v6912_v3  ;;  %6404 = vmatprep.subr.bf16.mxu0 %v6910_v4  ;;  %v2300_v3 = vrot.slane %v2298_v58, 4  ;;  %v2292_v22 = vrot.slane %v2291_v11, 4  ;;  %v422_v31 = vrot.slane %v420_v18, 4  ;;  %v2312_v42 = vshll.u32 %v5561_v9, 16  ;;  %v5564_v9 = vld [vmem:[%s7184_s20 + $0x48] sm:$0xf] }
  0x39   : > { %6214 = vmatprep.subr.bf16.mxu1 %v6915_v34  ;;  %v400_v10 = vrot.slane %v399_v63, 4  ;;  %v413_v39 = vor.u32 %v412_v25, %v409_v17  ;;  %v2318_v49 = vshll.u32 %v7334_v19, 16  ;;  %v2311_v53 = vrot.slane %v2309_v40, 4  ;;  %v296_v63 = vld [vmem:[%s7184_s20 + $0x44] sm:$0x1] }
  0x3a   : > { %v2301_v15 = vor.u32 %v2300_v3, %v2296_v1  ;;  %v2297_v38 = vsel %vm7216_vm2, %v2292_v22, %v2296_v1  ;;  %v423_v44 = vor.u32 %v422_v31, %v418_v26  ;;  %v2314_v54 = vrot.slane %v2312_v42, 5  ;;  %v7375_v22 = vld [vmem:[%s7184_s20 + $0x50] sm:$0x1]  ;;  %v6917_v31 = vld [vmem:[%s8993_s1 + $0x178] sm:$0xff]  }
  0x3b   : > { %6405 = vmatpush3.bf16.msra.mxu0 %v6910_v4  ;;  %v405_v21 = vsel %vm7216_vm2, %v400_v10, %v404_v50  ;;  %v426_v4 = vshll.u32 %v295_v2, 16  ;;  %v414_v52 = vrot.slane %v413_v39, 4  ;;  %v2320_v57 = vrot.slane %v2318_v49, 5  ;;  %v6924_v2 = vld [vmem:[%s8993_s1 + $0x38] sm:$0xff]  }
  0x3c   : > { %6215 = vmatpush3.bf16.msra.mxu1 %v6915_v34  ;;  %6406 = vmatprep.subr.bf16.mxu0 %v6911_v48  ;;  %v5376_v29 = vcombine.low %v395_v5, %v405_v21  ;;  %v2302_v30 = vrot.slane %v2301_v15, 4  ;;  %v253_v34 = vld [vmem:[%s7184_s20 + $0x3c] sm:$0xf]  ;;  %v424_v56 = vrot.slane %v423_v44, 4  ;;  %v2322_v58 = vshrl.u32 %v7334_v19, 16  ;;  %v6916_v15 = vld [vmem:[%s8993_s1 + $0x170] sm:$0xff]  }
  0x3d   : > { %6216 = vmatprep.subr.bf16.mxu1 %v6918_v60  ;;  %v428_v47 = vrot.slane %v426_v4, 5  ;;  %v2328_v59 = vshll.u32 %v7342_v28, 16  ;;  %v2315_v61 = vor.u32 %v2314_v54, %v2311_v53  ;;  %v431_v0 = vshrl.u32 %v253_v34, 16  ;;  %v7386_v4 = vld [vmem:[%s8993_s1 + $0x80] sm:$0xff]   ;;  %v256_v53 = vld [vmem:[%s7184_s20 + $0x4c] sm:$0xf] }
  0x3e   : > { %6181 = vmatmul.mubr.bf16.gmra.mrb[4].mxu1 %v5376_v29  ;;  %v2307_v43 = vsel %vm7216_vm2, %v2302_v30, %v2306_v16  ;;  %v434_v1 = vshll.u32 %v253_v34, 16  ;;  %v2324_v3 = vrot.slane %v2322_v58, 4  ;;  %v440_v7 = vshll.u32 %v254_v55, 16  ;;  %v255_v30 = vld [vmem:[%s7184_s20 + $0x48] sm:$0xf] }
  0x3f   : > { %6407 = vmatpush3.bf16.msra.mxu0 %v6911_v48  ;;  %v5616_v50 = vcombine.low %v2297_v38, %v2307_v43  ;;  %v6914_v48 = vld [vmem:[%s8993_s1 + $0x168] sm:$0xff]   ;;  %v429_v5 = vsel %vm7216_vm2, %v424_v56, %v428_v47  ;;  %v2330_v6 = vrot.slane %v2328_v59, 5  ;;  %v2316_v11 = vrot.slane %v2315_v61, 4  ;;  %v297_v54 = vld [vmem:[%s7184_s20 + $0x50] sm:$0x1] }
  0x40   : > { %6217 = vmatpush3.bf16.msra.mxu1 %v6918_v60  ;;  %6408 = vmatprep.subr.bf16.mxu0 %v6913_v20  ;;  %v419_v60 = vsel %vm7216_vm2, %v414_v52, %v418_v26  ;;  %v433_v12 = vrot.slane %v431_v0, 4  ;;  %v436_v13 = vrot.slane %v434_v1, 5  ;;  %v2325_v16 = vor.u32 %v2324_v3, %v2320_v57  ;;  %v5567_v58 = vld [vmem:[%s7184_s20 + $0x54] sm:$0xf]  ;;  %v7400_v0 = vld [vmem:[%s7184_s20 + $0x58] sm:$0xf] }
  0x41   : > { %6218 = vmatprep.subr.bf16.mxu1 %v6920_v14  ;;  %6373 = vmatmul.mubr.bf16.gmra.mrb[4].mxu0 %v5616_v50  ;;  %v5377_v10 = vcombine.low %v419_v60, %v429_v5  ;;  %v442_v17 = vrot.slane %v440_v7, 5  ;;  %v444_v18 = vshrl.u32 %v254_v55, 16  ;;  %v450_v21 = vshll.u32 %v296_v63, 16 }
  0x42   : > { %v437_v25 = vor.u32 %v436_v13, %v433_v12  ;;  %v2333_v26 = vshrl.u32 %v5564_v9, 16  ;;  %v2336_v29 = vshll.u32 %v5564_v9, 16  ;;  %v2326_v34 = vrot.slane %v2325_v16, 4 }
  0x43   : > { %6409 = vmatpush3.bf16.msra.mxu0 %v6913_v20  ;;  %6184 = vmatprep.mubr.bf16.mxu1 %v5377_v10  ;;  %v2321_v20 = vsel %vm7216_vm2, %v2316_v11, %v2320_v57  ;;  %v452_v38 = vrot.slane %v450_v21, 5  ;;  %v2352_v52 = vshll.u32 %v7375_v22, 16  ;;  %v455_v61 = vshrl.u32 %v255_v30, 16 }
  0x44   : > { %6219 = vmatpush3.bf16.msra.mxu1 %v6920_v14  ;;  %v7369_v14 = vld [vmem:[%s7184_s20 + $0x4c] sm:$0xf]  ;;  %6410 = vmatprep.subr.bf16.mxu0 %v6914_v48  ;;  %v438_v40 = vrot.slane %v437_v25, 4  ;;  %v2335_v42 = vrot.slane %v2333_v26, 4  ;;  %v2338_v43 = vrot.slane %v2336_v29, 5  ;;  %v2331_v47 = vsel %vm7216_vm2, %v2326_v34, %v2330_v6  ;;  %v7405_v6 = vld [vmem:[%s8993_s1 + $0x180] sm:$0xff]  }
  0x45   : > { %6220 = vmatprep.subr.bf16.mxu1 %v6922_v35  ;;  %v2342_v39 = vshll.u32 %v7369_v14, 16  ;;  %v2346_v44 = vshrl.u32 %v7369_v14, 16  ;;  %v5617_v55 = vcombine.low %v2321_v20, %v2331_v47  ;;  %v2354_v60 = vrot.slane %v2352_v52, 5  ;;  %v7412_v20 = vld [vmem:[%s7184_s20 + $0x5c] sm:$0x1] }
  0x46   : > { %v2339_v56 = vor.u32 %v2338_v43, %v2335_v42  ;;  %v458_v63 = vshll.u32 %v255_v30, 16  ;;  %v468_v3 = vshrl.u32 %v256_v53, 16  ;;  %v457_v9 = vrot.slane %v455_v61, 4  ;;  %v258_v43 = vld [vmem:[%s7184_s20 + $0x58] sm:$0xf] }
  0x47   : > { %6411 = vmatpush3.bf16.msra.mxu0 %v6914_v48  ;;  %v2344_v50 = vrot.slane %v2342_v39, 5  ;;  %v443_v48 = vsel %vm7216_vm2, %v438_v40, %v442_v17  ;;  %v2348_v57 = vrot.slane %v2346_v44, 4  ;;  %6376 = vmatprep.mubr.bf16.mxu0 %v5617_v55  ;;  %v474_v11 = vshll.u32 %v297_v54, 16  ;;  %v5570_v52 = vld [vmem:[%s7184_s20 + $0x60] sm:$0xf] }
  0x48   : > { %6221 = vmatpush3.bf16.msra.mxu1 %v6922_v35  ;;  %v446_v35 = vrot.slane %v444_v18, 4  ;;  %6412 = vmatprep.subr.bf16.mxu0 %v6916_v15  ;;  %v2340_v1 = vrot.slane %v2339_v56, 4  ;;  %v460_v10 = vrot.slane %v458_v63, 5  ;;  %v470_v18 = vrot.slane %v468_v3, 4 }
  0x49   : > { %6222 = vmatprep.subr.bf16.mxu1 %v6924_v2  ;;  %v2349_v5 = vor.u32 %v2348_v57, %v2344_v50  ;;  %v476_v21 = vrot.slane %v474_v11, 5  ;;  %v2357_v25 = vshrl.u32 %v5567_v58, 16  ;;  %v2360_v29 = vshll.u32 %v5567_v58, 16 }
  0x4a   : > { %v447_v49 = vor.u32 %v446_v35, %v442_v17  ;;  %v2345_v13 = vsel %vm7216_vm2, %v2340_v1, %v2344_v50  ;;  %v461_v17 = vor.u32 %v460_v10, %v457_v9  ;;  %v2366_v30 = vshll.u32 %v7400_v0, 16  ;;  %v257_v35 = vld [vmem:[%s7184_s20 + $0x54] sm:$0xf]  ;;  %v298_v50 = vld [vmem:[%s7184_s20 + $0x5c] sm:$0x1] }
  0x4b   : > { %6413 = vmatpush3.bf16.msra.mxu0 %v6916_v15  ;;  %v2350_v15 = vrot.slane %v2349_v5, 4  ;;  %v2370_v34 = vshrl.u32 %v7400_v0, 16  ;;  %v2359_v42 = vrot.slane %v2357_v25, 4  ;;  %v479_v55 = vshrl.u32 %v257_v35, 16  ;;  %v7440_v25 = vld [vmem:[%s7184_s20 + $0x60] sm:$0xf] }
  0x4c   : > { %6223 = vmatpush3.bf16.msra.mxu1 %v6924_v2  ;;  %v448_v59 = vrot.slane %v447_v49, 4  ;;  %v464_v2 = vshll.u32 %v256_v53, 16  ;;  %6414 = vmatprep.subr.bf16.mxu0 %v6917_v31  ;;  %v462_v39 = vrot.slane %v461_v17, 4  ;;  %v2368_v44 = vrot.slane %v2366_v30, 5  ;;  %v7436_v17 = vld [vmem:[%s7184_s20 + $0x68] sm:$0x1] }
  0x4d   : > { %6256 = vmatprep.subr.bf16.mxu1 %v7386_v4  ;;  %v2355_v26 = vsel %vm7216_vm2, %v2350_v15, %v2354_v60  ;;  %v2372_v47 = vrot.slane %v2370_v34, 4  ;;  %v2376_v49 = vshll.u32 %v7412_v20, 16  ;;  %v7427_v60 = vld [vmem:[%s7184_s20 + $0x64] sm:$0xf]  ;;  %v481_v63 = vrot.slane %v479_v55, 4 }
  0x4e   : > { %v453_v7 = vsel %vm7216_vm2, %v448_v59, %v452_v38  ;;  %v466_v16 = vrot.slane %v464_v2, 5  ;;  %v5618_v38 = vcombine.low %v2345_v13, %v2355_v26  ;;  %v488_v59 = vshll.u32 %v258_v43, 16 }
  0x4f   : > { %v5378_v12 = vcombine.low %v443_v48, %v453_v7  ;;  %6415 = vmatpush3.bf16.msra.mxu0 %v6917_v31  ;;  %v2362_v31 = vrot.slane %v2360_v29, 5  ;;  %v482_v48 = vshll.u32 %v257_v35, 16  ;;  %v2373_v57 = vor.u32 %v2372_v47, %v2368_v44  ;;  %v7443_v35 = vld [vmem:[%s7184_s20 + $0x64] sm:$0xf] }
  0x50   : > { %6448 = vmatprep.subr.bf16.mxu0 %v7405_v6  ;;  %v471_v40 = vor.u32 %v470_v18, %v466_v16  ;;  %6377 = vmatmul.mubr.bf16.gmra.mrb[8].mxu0 %v5618_v38  ;;  %v467_v53 = vsel %vm7216_vm2, %v462_v39, %v466_v16  ;;  %v2378_v58 = vrot.slane %v2376_v49, 5  ;;  %v492_v5 = vshrl.u32 %v258_v43, 16  ;;  %v299_v43 = vld [vmem:[%s7184_s20 + $0x68] sm:$0x1] }
  0x51   : > { %6185 = vmatmul.mubr.bf16.gmra.mrb[8].mxu1 %v5378_v12  ;;  %v2363_v56 = vor.u32 %v2362_v31, %v2359_v42  ;;  %v484_v1 = vrot.slane %v482_v48, 5  ;;  %v2374_v7 = vrot.slane %v2373_v57, 4  ;;  %v490_v9 = vrot.slane %v488_v59, 5 }
  0x52   : > { %v472_v54 = vrot.slane %v471_v40, 4  ;;  %v494_v11 = vrot.slane %v492_v5, 4  ;;  %v498_v12 = vshll.u32 %v298_v50, 16  ;;  %v2381_v13 = vshrl.u32 %v5570_v52, 16  ;;  %v5637_v50 = vld [vmem:[%s7184_s20 + $0xc] sm:$0xe] }
  0x53   : > { %v2364_v3 = vrot.slane %v2363_v56, 4  ;;  %v485_v10 = vor.u32 %v484_v1, %v481_v63  ;;  %v2379_v16 = vsel %vm7216_vm2, %v2374_v7, %v2378_v58  ;;  %v2384_v18 = vshll.u32 %v5570_v52, 16  ;;  %v7458_v5 = vld [vmem:[%s7184_s20 + $0x6c] sm:$0xf] }
  0x54   : > { %v477_v61 = vsel %vm7216_vm2, %v472_v54, %v476_v21  ;;  %v2390_v21 = vshll.u32 %v7427_v60, 16  ;;  %v495_v30 = vor.u32 %v494_v11, %v490_v9  ;;  %v500_v34 = vrot.slane %v498_v12, 5 }
  0x55   : > { %v5379_v2 = vcombine.low %v467_v53, %v477_v61  ;;  %v2369_v15 = vsel %vm7216_vm2, %v2364_v3, %v2368_v44  ;;  %v486_v29 = vrot.slane %v485_v10, 4  ;;  %v2383_v38 = vrot.slane %v2381_v13, 4 }
  0x56   : > { %v5619_v26 = vcombine.low %v2369_v15, %v2379_v16  ;;  %v2386_v39 = vrot.slane %v2384_v18, 5  ;;  %v2392_v40 = vrot.slane %v2390_v21, 5  ;;  %v2394_v42 = vshrl.u32 %v7427_v60, 16  ;;  %v7470_v21 = vld [vmem:[%s7184_s20 + $0x70] sm:$0xf] }
  0x57   : > { %6188 = vmatprep.mubr.bf16.mxu1 %v5379_v2  ;;  %v491_v31 = vsel %vm7216_vm2, %v486_v29, %v490_v9  ;;  %v496_v44 = vrot.slane %v495_v30, 4  ;;  %v2400_v47 = vshll.u32 %v7436_v17, 16  ;;  %v503_v49 = vshrl.u32 %v7440_v25, 16  ;;  %v7008_v9 = vld [vmem:[%s7184_s20 + $0xb4] sm:$0xff]  }
  0x58   : > { %6380 = vmatprep.mubr.bf16.mxu0 %v5619_v26  ;;  %v2387_v52 = vor.u32 %v2386_v39, %v2383_v38  ;;  %v2396_v53 = vrot.slane %v2394_v42, 4  ;;  %v506_v54 = vshll.u32 %v7440_v25, 16  ;;  %v512_v55 = vshll.u32 %v7443_v35, 16 }
  0x59   : > { %v501_v48 = vsel %vm7216_vm2, %v496_v44, %v500_v34  ;;  %v2402_v56 = vrot.slane %v2400_v47, 5  ;;  %v505_v57 = vrot.slane %v503_v49, 4  ;;  %v516_v58 = vshrl.u32 %v7443_v35, 16  ;;  %v7481_v47 = vld [vmem:[%s7184_s20 + $0x78] sm:$0xf] }
  0x5a   : > { %v5380_v59 = vcombine.low %v491_v31, %v501_v48  ;;  %v2388_v61 = vrot.slane %v2387_v52, 4  ;;  %v2397_v63 = vor.u32 %v2396_v53, %v2392_v40  ;;  %v508_v1 = vrot.slane %v506_v54, 5  ;;  %v7492_v54 = vld [vmem:[%s7184_s20 + $0x7c] sm:$0xf] }
  0x5b   : > { %v514_v2 = vrot.slane %v512_v55, 5  ;;  %v518_v3 = vrot.slane %v516_v58, 4  ;;  %v522_v7 = vshll.u32 %v299_v43, 16  ;;  %v5653_v10 = vrot.slane %v5637_v50, 9  ;;  %v301_v58 = vld [vmem:[%s7184_s20 + $0x80] sm:$0x1] }
  0x5c   : > { %6189 = vmatmul.mubr.bf16.gmra.mrb[12].mxu1 %v5380_v59  ;;  %v2393_v11 = vsel %vm7216_vm2, %v2388_v61, %v2392_v40  ;;  %v2398_v12 = vrot.slane %v2397_v63, 4  ;;  %v509_v13 = vor.u32 %v508_v1, %v505_v57  ;;  %v2984_v15 = vrot.slane %v7197_v23, 5  ;;  %v300_v40 = vld [vmem:[%s7184_s20 + $0x74] sm:$0x1]  ;;  %v5638_v23 = vld [vmem:[%s7184_s20 + $0x18] sm:$0xe] }
  0x5d   : > { %v519_v16 = vor.u32 %v518_v3, %v514_v2  ;;  %v524_v18 = vrot.slane %v522_v7, 5  ;;  %v527_v26 = vshrl.u32 %v7458_v5, 16  ;;  %v530_v29 = vshll.u32 %v7458_v5, 16 }
  0x5e   : > { %v2403_v30 = vsel %vm7216_vm2, %v2398_v12, %v2402_v56  ;;  %v510_v34 = vrot.slane %v509_v13, 4  ;;  %v2985_v38 = vsel %vm7462_vm5, %v5653_v10, %v2984_v15  ;;  %v2986_v39 = vrot.slane %v2984_v15, 4  ;;  %v5639_v13 = vld [vmem:[%s7184_s20 + $0x24] sm:$0xe] }
  0x5f   : > { %v5620_v42 = vcombine.low %v2393_v11, %v2403_v30  ;;  %v520_v43 = vrot.slane %v519_v16, 4  ;;  %v529_v31 = vrot.slane %v527_v26, 4  ;;  %v532_v44 = vrot.slane %v530_v29, 5  ;;  %v7514_v16 = vld [vmem:[%s7184_s20 + $0x84] sm:$0xf]  ;;  %v6921_v29 = vld [vmem:[%s8993_s1 + $0x188] sm:$0xff]  }
  0x60   : > { %v515_v49 = vsel %vm7216_vm2, %v510_v34, %v514_v2  ;;  %v2988_v50 = vsel %vm7462_vm5, %v2986_v39, %v2987_v41  ;;  %v536_v52 = vshll.u32 %v7470_v21, 16  ;;  %v540_v53 = vshrl.u32 %v7470_v21, 16 }
  0x61   : > { %6381 = vmatmul.mubr.bf16.gmra.mrb[12].mxu0 %v5620_v42  ;;  %v525_v55 = vsel %vm7216_vm2, %v520_v43, %v524_v18  ;;  %v5685_v48 = vcombine.low %v2985_v38, %v2988_v50  ;;  %v533_v56 = vor.u32 %v532_v44, %v529_v31  ;;  %v546_v57 = vshll.u32 %v300_v40, 16  ;;  %v7522_v40 = vld [vmem:[%s7184_s20 + $0x88] sm:$0xf]  ;;  %v302_v31 = vld [vmem:[%s7184_s20 + $0x8c] sm:$0x1] }
  0x62   : > { %v5381_v59 = vcombine.low %v515_v49, %v525_v55  ;;  %v538_v24 = vrot.slane %v536_v52, 5  ;;  %v542_v61 = vrot.slane %v540_v53, 4  ;;  %v5654_v63 = vrot.slane %v5638_v23, 9 }
  0x63   : > { %6416 = vmatprep.mubr.bf16.mxu0 %v5685_v48  ;;  %v534_v41 = vrot.slane %v533_v56, 4  ;;  %v548_v1 = vrot.slane %v546_v57, 5  ;;  %v2995_v2 = vsel %vm7462_vm5, %v7265_v36, %v2994_v32  ;;  %v551_v3 = vshrl.u32 %v7481_v47, 16 }
  0x64   : > { %6192 = vmatprep.mubr.bf16.mxu1 %v5381_v59  ;;  %v543_v7 = vor.u32 %v542_v61, %v538_v24  ;;  %v2992_v10 = vsel %vm7462_vm5, %v5654_v63, %v2991_v27  ;;  %v554_v11 = vshll.u32 %v7481_v47, 16  ;;  %v560_v12 = vshll.u32 %v7492_v54, 16 }
  0x65   : > { %v539_v8 = vsel %vm7216_vm2, %v534_v41, %v538_v24  ;;  %v5686_v15 = vcombine.low %v2992_v10, %v2995_v2  ;;  %v553_v32 = vrot.slane %v551_v3, 4  ;;  %v564_v36 = vshrl.u32 %v7492_v54, 16  ;;  %v7543_v2 = vld [vmem:[%s7184_s20 + $0x90] sm:$0xf]  ;;  %v7546_v3 = vld [vmem:[%s7184_s20 + $0x94] sm:$0xf] }
  0x66   : > { %v544_v62 = vrot.slane %v543_v7, 4  ;;  %v556_v18 = vrot.slane %v554_v11, 5  ;;  %v562_v26 = vrot.slane %v560_v12, 5  ;;  %v570_v27 = vshll.u32 %v301_v58, 16 }
  0x67   : > { %v566_v30 = vrot.slane %v564_v36, 4  ;;  %v5655_v34 = vrot.slane %v5639_v13, 9  ;;  %v2998_v38 = vrot.slane %v7269_v45, 5  ;;  %v3001_v39 = vrot.slane %v7275_v51, 5  ;;  %v5640_v45 = vld [vmem:[%s7184_s20 + $0x30] sm:$0xe] }
  0x68   : > { %v549_v23 = vsel %vm7216_vm2, %v544_v62, %v548_v1  ;;  %v557_v42 = vor.u32 %v556_v18, %v553_v32  ;;  %v572_v43 = vrot.slane %v570_v27, 5  ;;  %v575_v44 = vshrl.u32 %v7514_v16, 16  ;;  %v303_v62 = vld [vmem:[%s7184_s20 + $0x98] sm:$0x1] }
  0x69   : > { %v5382_v49 = vcombine.low %v539_v8, %v549_v23  ;;  %6417 = vmatmul.mubr.bf16.vlgmr.msra.gmra.mrb[0].mxu0 %v5686_v15  ;;  %v567_v50 = vor.u32 %v566_v30, %v562_v26  ;;  %v2999_v52 = vsel %vm7462_vm5, %v5655_v34, %v2998_v38  ;;  %v3000_v53 = vrot.slane %v2998_v38, 4  ;;  %v6925_v30 = vld [vmem:[%s8993_s1 + $0x198] sm:$0xff]  }
  0x6a   : > { %6449 = vmatpush3.bf16.msra.mxu0 %v7405_v6  ;;  %v558_v51 = vrot.slane %v557_v42, 4  ;;  %v577_v55 = vrot.slane %v575_v44, 4  ;;  %v578_v48 = vshll.u32 %v7514_v16, 16  ;;  %v584_v56 = vshll.u32 %v7522_v40, 16  ;;  %v6923_v6 = vld [vmem:[%s8993_s1 + $0x190] sm:$0xff]  }
  0x6b   : > { %6193 = vmatmul.mubr.bf16.gmra.mrb[16].mxu1 %v5382_v49  ;;  %v568_v57 = vrot.slane %v567_v50, 4  ;;  %v3002_v58 = vsel %vm7462_vm5, %v3000_v53, %v3001_v39  ;;  %v588_v59 = vshrl.u32 %v7522_v40, 16  ;;  %v594_v24 = vshll.u32 %v302_v31, 16  ;;  %6450 = vmatprep.subr.bf16.mxu0 %v6921_v29  ;;  %v5641_v38 = vld [vmem:[%s7184_s20 + $0x3c] sm:$0xe] }
  0x6c   : > { %v563_v61 = vsel %vm7216_vm2, %v558_v51, %v562_v26  ;;  %v5687_v63 = vcombine.low %v2999_v52, %v3002_v58  ;;  %v580_v41 = vrot.slane %v578_v48, 5  ;;  %v586_v1 = vrot.slane %v584_v56, 5  ;;  %v7564_v31 = vld [vmem:[%s7184_s20 + $0x9c] sm:$0xf]  ;;  %v7573_v48 = vld [vmem:[%s7184_s20 + $0xa0] sm:$0xf] }
  0x6d   : > { %v573_v7 = vsel %vm7216_vm2, %v568_v57, %v572_v43  ;;  %v590_v10 = vrot.slane %v588_v59, 4  ;;  %v596_v11 = vrot.slane %v594_v24, 5  ;;  %v5656_v12 = vrot.slane %v5640_v45, 9  ;;  %v6929_v56 = vld [vmem:[%s8993_s1 + $0x1a0] sm:$0xff]  }
  0x6e   : > { %v5383_v13 = vcombine.low %v563_v61, %v573_v7  ;;  %6420 = vmatprep.mubr.bf16.mxu0 %v5687_v63  ;;  %v581_v8 = vor.u32 %v580_v41, %v577_v55  ;;  %v3005_v15 = vrot.slane %v7300_v33, 5  ;;  %v3008_v32 = vrot.slane %v7311_v46, 5  ;;  %6451 = vmatpush3.bf16.msra.mxu0 %v6921_v29  ;;  %v304_v61 = vld [vmem:[%s7184_s20 + $0xa4] sm:$0x1] }
  0x6f   : > { %v591_v36 = vor.u32 %v590_v10, %v586_v1  ;;  %v599_v18 = vshrl.u32 %v7543_v2, 16  ;;  %v602_v26 = vshll.u32 %v7543_v2, 16  ;;  %v608_v27 = vshll.u32 %v7546_v3, 16  ;;  %6452 = vmatprep.subr.bf16.mxu0 %v6923_v6 }
  0x70   : > { %6196 = vmatprep.mubr.bf16.mxu1 %v5383_v13  ;;  %v582_v34 = vrot.slane %v581_v8, 4  ;;  %v3006_v33 = vsel %vm7462_vm5, %v5656_v12, %v3005_v15  ;;  %v3007_v46 = vrot.slane %v3005_v15, 4  ;;  %v612_v29 = vshrl.u32 %v7546_v3, 16  ;;  %v5642_v15 = vld [vmem:[%s7184_s20 + $0x48] sm:$0xe] }
  0x71   : > { %v592_v39 = vrot.slane %v591_v36, 4  ;;  %v601_v23 = vrot.slane %v599_v18, 4  ;;  %v604_v42 = vrot.slane %v602_v26, 5  ;;  %v610_v43 = vrot.slane %v608_v27, 5  ;;  %v7598_v27 = vld [vmem:[%s7184_s20 + $0xa8] sm:$0xf] }
  0x72   : > { %v587_v44 = vsel %vm7216_vm2, %v582_v34, %v586_v1  ;;  %v3009_v49 = vsel %vm7462_vm5, %v3007_v46, %v3008_v32  ;;  %v614_v50 = vrot.slane %v612_v29, 4  ;;  %v618_v52 = vshll.u32 %v303_v62, 16  ;;  %6453 = vmatpush3.bf16.msra.mxu0 %v6923_v6  ;;  %v6933_v32 = vld [vmem:[%s8993_s1 + $0x1a8] sm:$0xff]  }
  0x73   : > { %v597_v53 = vsel %vm7216_vm2, %v592_v39, %v596_v11  ;;  %v5688_v45 = vcombine.low %v3006_v33, %v3009_v49  ;;  %v605_v51 = vor.u32 %v604_v42, %v601_v23  ;;  %v5657_v55 = vrot.slane %v5641_v38, 9  ;;  %6454 = vmatprep.subr.bf16.mxu0 %v6925_v30  ;;  %v7601_v29 = vld [vmem:[%s7184_s20 + $0xac] sm:$0xf] }
  0x74   : > { %v5384_v57 = vcombine.low %v587_v44, %v597_v53  ;;  %v615_v58 = vor.u32 %v614_v50, %v610_v43  ;;  %v620_v59 = vrot.slane %v618_v52, 5  ;;  %v3012_v24 = vrot.slane %v7334_v19, 5  ;;  %v5643_v53 = vld [vmem:[%s7184_s20 + $0x54] sm:$0xe] }
  0x75   : > { %6421 = vmatmul.mubr.bf16.gmra.mrb[4].mxu0 %v5688_v45  ;;  %v606_v6 = vrot.slane %v605_v51, 4  ;;  %v3015_v63 = vrot.slane %v7342_v28, 5  ;;  %v623_v41 = vshrl.u32 %v7564_v31, 16  ;;  %v626_v1 = vshll.u32 %v7564_v31, 16  ;;  %v6937_v45 = vld [vmem:[%s8993_s1 + $0x1b0] sm:$0xff]  }
  0x76   : > { %6197 = vmatmul.mubr.bf16.gmra.mrb[20].mxu1 %v5384_v57  ;;  %v616_v7 = vrot.slane %v615_v58, 4  ;;  %v3013_v10 = vsel %vm7462_vm5, %v5657_v55, %v3012_v24  ;;  %v3014_v11 = vrot.slane %v3012_v24, 4  ;;  %v632_v12 = vshll.u32 %v7573_v48, 16  ;;  %6455 = vmatpush3.bf16.msra.mxu0 %v6925_v30 }
  0x77   : > { %v611_v19 = vsel %vm7216_vm2, %v606_v6, %v610_v43  ;;  %v625_v13 = vrot.slane %v623_v41, 4  ;;  %v628_v28 = vrot.slane %v626_v1, 5  ;;  %v636_v8 = vshrl.u32 %v7573_v48, 16  ;;  %6456 = vmatprep.subr.bf16.mxu0 %v6929_v56  ;;  %v305_v43 = vld [vmem:[%s7184_s20 + $0xb0] sm:$0x1] }
  0x78   : > { %v621_v36 = vsel %vm7216_vm2, %v616_v7, %v620_v59  ;;  %v3016_v62 = vsel %vm7462_vm5, %v3014_v11, %v3015_v63  ;;  %v634_v18 = vrot.slane %v632_v12, 5  ;;  %v642_v26 = vshll.u32 %v304_v61, 16  ;;  %v7621_v41 = vld [vmem:[%s7184_s20 + $0xb4] sm:$0xf]  ;;  %v7626_v12 = vld [vmem:[%s7184_s20 + $0xb8] sm:$0xf] }
  0x79   : > { %v5385_v30 = vcombine.low %v611_v19, %v621_v36  ;;  %v5689_v34 = vcombine.low %v3013_v10, %v3016_v62  ;;  %v629_v33 = vor.u32 %v628_v28, %v625_v13  ;;  %v638_v46 = vrot.slane %v636_v8, 4  ;;  %v306_v19 = vld [vmem:[%s7184_s20 + $0xbc] sm:$0x1] }
  0x7a   : > { %v644_v38 = vrot.slane %v642_v26, 5  ;;  %v5658_v39 = vrot.slane %v5642_v15, 9  ;;  %v3019_v23 = vrot.slane %v7369_v14, 5  ;;  %v3022_v42 = vrot.slane %v7375_v22, 5  ;;  %6457 = vmatpush3.bf16.msra.mxu0 %v6929_v56  ;;  %v6941_v13 = vld [vmem:[%s8993_s1 + $0x1b8] sm:$0xff]  }
  0x7b   : > { %6200 = vmatprep.mubr.bf16.mxu1 %v5385_v30  ;;  %6424 = vmatprep.mubr.bf16.mxu0 %v5689_v34  ;;  %v630_v44 = vrot.slane %v629_v33, 4  ;;  %v639_v49 = vor.u32 %v638_v46, %v634_v18  ;;  %v647_v50 = vshrl.u32 %v7598_v27, 16  ;;  %v650_v52 = vshll.u32 %v7598_v27, 16  ;;  %v5644_v30 = vld [vmem:[%s7184_s20 + $0x60] sm:$0xe] }
  0x7c   : > { %v3020_v14 = vsel %vm7462_vm5, %v5658_v39, %v3019_v23  ;;  %v3021_v22 = vrot.slane %v3019_v23, 4  ;;  %v656_v51 = vshll.u32 %v7601_v29, 16  ;;  %v660_v55 = vshrl.u32 %v7601_v29, 16  ;;  %6458 = vmatprep.subr.bf16.mxu0 %v6933_v32  ;;  %v5574_v39 = vld [vmem:[%s7184_s20 + $0x70] sm:$0xf] }
  0x7d   : > { %v635_v56 = vsel %vm7216_vm2, %v630_v44, %v634_v18  ;;  %v640_v57 = vrot.slane %v639_v49, 4  ;;  %v649_v58 = vrot.slane %v647_v50, 4  ;;  %v652_v59 = vrot.slane %v650_v52, 5  ;;  %v7648_v44 = vld [vmem:[%s8993_s1 + $0x1c0] sm:$0xff]  }
  0x7e   : > { %v3023_v24 = vsel %vm7462_vm5, %v3021_v22, %v3022_v42  ;;  %v658_v61 = vrot.slane %v656_v51, 5  ;;  %v662_v6 = vrot.slane %v660_v55, 4  ;;  %v666_v63 = vshll.u32 %v305_v43, 16  ;;  %6459 = vmatpush3.bf16.msra.mxu0 %v6933_v32  ;;  %v5645_v43 = vld [vmem:[%s7184_s20 + $0x6c] sm:$0xe] }
  0x7f   : > { %v645_v1 = vsel %vm7216_vm2, %v640_v57, %v644_v38  ;;  %v5690_v7 = vcombine.low %v3020_v14, %v3023_v24  ;;  %v653_v10 = vor.u32 %v652_v59, %v649_v58  ;;  %v5659_v11 = vrot.slane %v5643_v53, 9  ;;  %6460 = vmatprep.subr.bf16.mxu0 %v6937_v45  ;;  %v5575_v55 = vld [vmem:[%s7184_s20 + $0x74] sm:$0x1]  ;;  %v5646_v24 = vld [vmem:[%s7184_s20 + $0x78] sm:$0xe] }
  0x80   : > { %v5386_v28 = vcombine.low %v635_v56, %v645_v1  ;;  %v663_v8 = vor.u32 %v662_v6, %v658_v61  ;;  %v668_v15 = vrot.slane %v666_v63, 5  ;;  %v3026_v32 = vrot.slane %v7400_v0, 5 }
  0x81   : > { %6425 = vmatmul.mubr.bf16.gmra.mrb[8].mxu0 %v5690_v7  ;;  %v654_v36 = vrot.slane %v653_v10, 4  ;;  %v3029_v62 = vrot.slane %v7412_v20, 5  ;;  %v671_v18 = vshrl.u32 %v7621_v41, 16  ;;  %v674_v26 = vshll.u32 %v7621_v41, 16 }
  0x82   : > { %6201 = vmatmul.mubr.bf16.gmra.mrb[24].mxu1 %v5386_v28  ;;  %v664_v34 = vrot.slane %v663_v8, 4  ;;  %v3027_v33 = vsel %vm7462_vm5, %v5659_v11, %v3026_v32  ;;  %v3028_v46 = vrot.slane %v3026_v32, 4  ;;  %v680_v38 = vshll.u32 %v7626_v12, 16  ;;  %6461 = vmatpush3.bf16.msra.mxu0 %v6937_v45  ;;  %v7661_v11 = vld [vmem:[%s7184_s20 + $0x7c] sm:$0xf] }
  0x83   : > { %v659_v0 = vsel %vm7216_vm2, %v654_v36, %v658_v61  ;;  %v673_v20 = vrot.slane %v671_v18, 4  ;;  %v676_v23 = vrot.slane %v674_v26, 5  ;;  %v684_v42 = vshrl.u32 %v7626_v12, 16  ;;  %6462 = vmatprep.subr.bf16.mxu0 %v6941_v13  ;;  %v7010_v36 = vld [vmem:[%s7184_s20] sm:$0xf] }
  0x84   : > { %v669_v49 = vsel %vm7216_vm2, %v664_v34, %v668_v15  ;;  %v3030_v50 = vsel %vm7462_vm5, %v3028_v46, %v3029_v62  ;;  %v682_v52 = vrot.slane %v680_v38, 5  ;;  %v690_v53 = vshll.u32 %v306_v19, 16  ;;  %v5580_v15 = vld [vmem:[%s7184_s20 + $0x88] sm:$0xf]  ;;  %v7676_v62 = vld [vmem:[%s7184_s20 + $0x4] sm:$0xf] }
  0x85   : > { %v5387_v45 = vcombine.low %v659_v0, %v669_v49  ;;  %v5691_v14 = vcombine.low %v3027_v33, %v3030_v50  ;;  %v677_v22 = vor.u32 %v676_v23, %v673_v20  ;;  %v686_v51 = vrot.slane %v684_v42, 4  ;;  %v5581_v26 = vld [vmem:[%s7184_s20 + $0x8c] sm:$0x1]  ;;  %v5584_v23 = vld [vmem:[%s7184_s20 + $0x98] sm:$0x1] }
  0x86   : > { %v692_v56 = vrot.slane %v690_v53, 5  ;;  %v5660_v57 = vrot.slane %v5644_v30, 9  ;;  %v3033_v58 = vrot.slane %v7427_v60, 5  ;;  %v3036_v59 = vrot.slane %v7436_v17, 5  ;;  %6463 = vmatpush3.bf16.msra.mxu0 %v6941_v13  ;;  %v7664_v17 = vld [vmem:[%s7184_s20 + $0x80] sm:$0x1] }
  0x87   : > { %6204 = vmatprep.mubr.bf16.mxu1 %v5387_v45  ;;  %6428 = vmatprep.mubr.bf16.mxu0 %v5691_v14  ;;  %v678_v61 = vrot.slane %v677_v22, 4  ;;  %v687_v6 = vor.u32 %v686_v51, %v682_v52  ;;  %v5661_v63 = vrot.slane %v5645_v43, 9  ;;  %v3040_v1 = vrot.slane %v5574_v39, 5  ;;  %v5647_v30 = vld [vmem:[%s7184_s20 + $0x84] sm:$0xe] }
  0x88   : > { %v3034_v7 = vsel %vm7462_vm5, %v5660_v57, %v3033_v58  ;;  %v3035_v10 = vrot.slane %v3033_v58, 4  ;;  %v3043_v60 = vrot.slane %v5575_v55, 5  ;;  %6496 = vmatprep.subr.bf16.mxu0 %v7648_v44  ;;  %v5397_v18 = vcombine.low %v7010_v36, %v7676_v62  ;;  %v5583_v39 = vld [vmem:[%s7184_s20 + $0x94] sm:$0xf]  ;;  %v5648_v42 = vld [vmem:[%s7184_s20 + $0x90] sm:$0xe] }
  0x89   : > { %v683_v19 = vsel %vm7216_vm2, %v678_v61, %v682_v52  ;;  %v688_v13 = vrot.slane %v687_v6, 4  ;;  %v3041_v28 = vsel %vm7462_vm5, %v5661_v63, %v3040_v1  ;;  %v3042_v8 = vrot.slane %v3040_v1, 4  ;;  %v5649_v50 = vld [vmem:[%s7184_s20 + $0x9c] sm:$0xe]  ;;  %v5586_v14 = vld [vmem:[%s7184_s20 + $0xa0] sm:$0xf] }
  0x8a   : > { %v3037_v32 = vsel %vm7462_vm5, %v3035_v10, %v3036_v59  ;;  %v5662_v38 = vrot.slane %v5646_v24, 9  ;;  %v3047_v43 = vrot.slane %v7661_v11, 5  ;;  %v3050_v49 = vrot.slane %v7664_v17, 5  ;;  %v5587_v22 = vld [vmem:[%s7184_s20 + $0xa4] sm:$0x1] }
  0x8b   : > { %v693_v34 = vsel %vm7216_vm2, %v688_v13, %v692_v56  ;;  %v5692_v33 = vcombine.low %v3034_v7, %v3037_v32  ;;  %v3044_v46 = vsel %vm7462_vm5, %v3042_v8, %v3043_v60  ;;  %v5663_v52 = vrot.slane %v5647_v30, 9  ;;  %v5589_v59 = vld [vmem:[%s7184_s20 + $0xac] sm:$0xf]  ;;  %v7700_v61 = vld [vmem:[%s7184_s20 + $0x10] sm:$0xf] }
  0x8c   : > { %v5388_v0 = vcombine.low %v683_v19, %v693_v34  ;;  %v5693_v20 = vcombine.low %v3041_v28, %v3044_v46  ;;  %v3054_v53 = vrot.slane %v5580_v15, 5  ;;  %v3057_v45 = vrot.slane %v5581_v26, 5  ;;  %v7012_v24 = vld [vmem:[%s7184_s20 + $0xc] sm:$0xf]  ;;  %v7014_v8 = vld [vmem:[%s7184_s20 + $0x18] sm:$0xf] }
  0x8d   : > { %6429 = vmatmul.mubr.bf16.gmra.mrb[12].mxu0 %v5692_v33  ;;  %v3048_v51 = vsel %vm7462_vm5, %v5662_v38, %v3047_v43  ;;  %v3049_v55 = vrot.slane %v3047_v43, 4  ;;  %v3061_v58 = vrot.slane %v5583_v39, 5  ;;  %v5398_v6 = vcombine.low %v7012_v24, %v7700_v61  ;;  %v6932_v19 = vld [vmem:[%s8993_s1 + $0x88] sm:$0xff]   ;;  %v7712_v15 = vld [vmem:[%s7184_s20 + $0x1c] sm:$0xf] }
  0x8e   : > { %6205 = vmatmul.mubr.bf16.gmra.mrb[28].mxu1 %v5388_v0  ;;  %6432 = vmatprep.mubr.bf16.mxu0 %v5693_v20  ;;  %v3055_v56 = vsel %vm7462_vm5, %v5663_v52, %v3054_v53  ;;  %v3056_v57 = vrot.slane %v3054_v53, 4  ;;  %v5664_v1 = vrot.slane %v5648_v42, 9  ;;  %v3064_v7 = vrot.slane %v5584_v23, 5  ;;  %v5590_v30 = vld [vmem:[%s7184_s20 + $0xb0] sm:$0x1] }
  0x8f   : > { %6224 = vmatprep.mubr.bf16.mxu1 %v5397_v18  ;;  %v3051_v63 = vsel %vm7462_vm5, %v3049_v55, %v3050_v49  ;;  %v3063_v13 = vrot.slane %v3061_v58, 4  ;;  %v5665_v28 = vrot.slane %v5649_v50, 9  ;;  %v5399_v32 = vcombine.low %v7014_v8, %v7712_v15  ;;  %v5650_v34 = vld [vmem:[%s7184_s20 + $0xa8] sm:$0xe]  ;;  %v5592_v33 = vld [vmem:[%s7184_s20 + $0xb8] sm:$0xf] }
  0x90   : > { %v5694_v10 = vcombine.low %v3048_v51, %v3051_v63  ;;  %v3058_v60 = vsel %vm7462_vm5, %v3056_v57, %v3057_v45  ;;  %v3068_v18 = vrot.slane %v5586_v14, 5  ;;  %v3071_v26 = vrot.slane %v5587_v22, 5  ;;  %v5593_v20 = vld [vmem:[%s7184_s20 + $0xbc] sm:$0x1]  ;;  %v5651_v23 = vld [vmem:[%s7184_s20 + $0xb4] sm:$0xe] }
  0x91   : > { %v5695_v36 = vcombine.low %v3055_v56, %v3058_v60  ;;  %v3075_v38 = vrot.slane %v5589_v59, 5  ;;  %v3062_v39 = vsel %vm7462_vm5, %v5664_v1, %v3061_v58  ;;  %v3065_v0 = vsel %vm7462_vm5, %v3063_v13, %v3064_v7  ;;  %v6936_v50 = vld [vmem:[%s8993_s1 + $0x90] sm:$0xff]   ;;  %v5595_v53 = vld [vmem:[%s7184_s20 + $0xc4] sm:$0xf]  ;;  %v7735_v51 = vld [vmem:[%s7184_s20 + $0x28] sm:$0xf] }
  0x92   : > { %v3070_v46 = vrot.slane %v3068_v18, 4  ;;  %v3069_v42 = vsel %vm7462_vm5, %v5665_v28, %v3068_v18  ;;  %v3082_v49 = vrot.slane %v5592_v33, 5  ;;  %v5666_v52 = vrot.slane %v5650_v34, 9  ;;  %v7016_v22 = vld [vmem:[%s7184_s20 + $0x24] sm:$0xf]  ;;  %v6940_v1 = vld [vmem:[%s8993_s1 + $0x98] sm:$0xff]  }
  0x93   : > { %v5696_v45 = vcombine.low %v3062_v39, %v3065_v0  ;;  %v3077_v14 = vrot.slane %v3075_v38, 4  ;;  %v5400_v55 = vcombine.low %v7016_v22, %v7735_v51  ;;  %v7018_v57 = vld [vmem:[%s7184_s20 + $0x30] sm:$0xf]  ;;  %v7740_v58 = vld [vmem:[%s7184_s20 + $0x34] sm:$0xf]  ;;  %v5667_v24 = vrot.slane %v5651_v23, 9 }
  0x94   : > { %v3072_v43 = vsel %vm7462_vm5, %v3070_v46, %v3071_v26  ;;  %v5401_v59 = vcombine.low %v7018_v57, %v7740_v58  ;;  %v3085_v63 = vrot.slane %v5593_v20, 5  ;;  %v5652_v7 = vld [vmem:[%s7184_s20 + $0xc0] sm:$0xe]  ;;  %v3076_v60 = vsel %vm7462_vm5, %v5666_v52, %v3075_v38  ;;  %v5596_v8 = vld [vmem:[%s7184_s20 + $0xc8] sm:$0x1]  ;;  %v6943_v22 = vld [vmem:[%s7184_s20 + $0x18] sm:$0xff]  }
  0x95   : > { %6433 = vmatmul.mubr.bf16.gmra.mrb[16].mxu0 %v5694_v10  ;;  %v5697_v56 = vcombine.low %v3069_v42, %v3072_v43  ;;  %v3089_v10 = vrot.slane %v5595_v53, 5  ;;  %v3083_v13 = vsel %vm7462_vm5, %v5667_v24, %v3082_v49  ;;  %v5668_v18 = vrot.slane %v5652_v7, 9  ;;  %v7020_v26 = vld [vmem:[%s7184_s20 + $0x3c] sm:$0xf]  ;;  %v7022_v39 = vld [vmem:[%s7184_s20 + $0x48] sm:$0xf] }
  0x96   : > { %6225 = vmatmul.mubr.bf16.vlgmr.msra.gmra.mrb[0].mxu1 %v5398_v6  ;;  %6436 = vmatprep.mubr.bf16.mxu0 %v5695_v36  ;;  %v3084_v6 = vrot.slane %v3082_v49, 4  ;;  %v3092_v38 = vrot.slane %v5596_v8, 5  ;;  %v7766_v0 = vld [vmem:[%s7184_s20 + $0x4c] sm:$0xf]  ;;  %v6957_v49 = vld [vmem:[%s8993_s1 + $0xb0] sm:$0xff]   ;;  %v2442_v52 = vshrl.u32 %v7661_v11, 16 }
  0x97   : > { %6257 = vmatpush3.bf16.msra.mxu1 %v7386_v4  ;;  %6228 = vmatprep.mubr.bf16.mxu1 %v5399_v32  ;;  %v3078_v4 = vrot.slane %v5590_v30, 5  ;;  %v6945_v32 = vld [vmem:[%s8993_s1 + $0xa0] sm:$0xff]   ;;  %v3091_v46 = vrot.slane %v3089_v10, 4  ;;  %v5403_v20 = vcombine.low %v7022_v39, %v7766_v0  ;;  %v6951_v23 = vld [vmem:[%s8993_s1 + $0xa8] sm:$0xff]   ;;  %v3090_v42 = vsel %vm7462_vm5, %v5668_v18, %v3089_v10  ;;  %v6949_v18 = vld [vmem:[%s7184_s20 + $0x30] sm:$0xff]  }
  0x98   : > { %6258 = vmatprep.subr.bf16.mxu1 %v6932_v19  ;;  %v3086_v28 = vsel %vm7462_vm5, %v3084_v6, %v3085_v63  ;;  %v7761_v30 = vld [vmem:[%s7184_s20 + $0x40] sm:$0xf]  ;;  %v7794_v57 = vrot.slane %v2442_v52, 4  ;;  %v6946_v6 = vld [vmem:[%s7184_s20 + $0x24] sm:$0xff]   ;;  %v1349_v7 = vrot.slane %v7700_v61, 5  ;;  %v2448_v8 = vshll.u32 %v7664_v17, 16 }
  0x99   : > { %v5402_v34 = vcombine.low %v7020_v26, %v7761_v30  ;;  %v5699_v33 = vcombine.low %v3083_v13, %v3086_v28  ;;  %v3093_v43 = vsel %vm7462_vm5, %v3091_v46, %v3092_v38  ;;  %v1289_v63 = vld [vmem:[%s7184_s20] sm:$0xe]  ;;  %v1290_v10 = vld [vmem:[%s7184_s20 + $0xc] sm:$0xe]  ;;  %v1356_v13 = vrot.slane %v7712_v15, 5 }
  0x9a   : > { %v5700_v53 = vcombine.low %v3090_v42, %v3093_v43  ;;  %v1292_v61 = vld [vmem:[%s7184_s20 + $0x24] sm:$0xe]  ;;  %v5408_v15 = vcombine.low %v7514_v16, %v7522_v40  ;;  %v5409_v26 = vcombine.low %v7543_v2, %v7546_v3  ;;  %v5421_v17 = vrot.slane %v1289_v63, 9  ;;  %v7028_v38 = vld [vmem:[%s7184_s20 + $0x20] sm:$0x1]  ;;  %v6958_v2 = vld [vmem:[%s7184_s20 + $0x54] sm:$0xff]  }
  0x9b   : > { %6259 = vmatpush3.bf16.msra.mxu1 %v6932_v19  ;;  %v3079_v19 = vsel %vm7462_vm5, %v3077_v14, %v3078_v4  ;;  %v7783_v14 = vld [vmem:[%s7184_s20 + $0x58] sm:$0xf]  ;;  %v1358_v46 = vrot.slane %v1356_v13, 4  ;;  %v1359_v39 = vrot.slane %v7028_v38, 5  ;;  %v7029_v43 = vld [vmem:[%s7184_s20 + $0x2c] sm:$0x1] }
  0x9c   : > { %6260 = vmatprep.subr.bf16.mxu1 %v6936_v50  ;;  %v5698_v36 = vcombine.low %v3076_v60, %v3079_v19  ;;  %v7809_v60 = vld [vmem:[%s8993_s1 + $0xc0] sm:$0xff]   ;;  %v1291_v19 = vld [vmem:[%s7184_s20 + $0x18] sm:$0xe]  ;;  %v7032_v38 = vld [vmem:[%s7184_s20 + $0x50] sm:$0x1]  ;;  %v1391_v16 = vrot.slane %v7783_v14, 5 }
  0x9d   : > { %6437 = vmatmul.mubr.bf16.gmra.mrb[20].mxu0 %v5696_v45  ;;  %v7024_v45 = vld [vmem:[%s7184_s20 + $0x54] sm:$0xf]  ;;  %v7932_v40 = vld [vmem:[%s7184_s20 + $0x64] sm:$0xf] }
  0x9e   : > { %6229 = vmatmul.mubr.bf16.gmra.mrb[4].mxu1 %v5400_v55  ;;  %6440 = vmatprep.mubr.bf16.mxu0 %v5697_v56  ;;  %v5404_v4 = vcombine.low %v7024_v45, %v7783_v14  ;;  %v5405_v55 = vcombine.low %v7440_v25, %v7443_v35  ;;  %v6963_v56 = vld [vmem:[%s8993_s1 + $0xb8] sm:$0xff]   ;;  %v7027_v25 = vld [vmem:[%s7184_s20 + $0x14] sm:$0x1]  ;;  %v6961_v3 = vld [vmem:[%s7184_s20 + $0x60] sm:$0xff]  }
  0x9f   : > { %6232 = vmatprep.mubr.bf16.mxu1 %v5401_v59  ;;  %6261 = vmatpush3.bf16.msra.mxu1 %v6936_v50  ;;  %v2438_v50 = vshll.u32 %v7661_v11, 16  ;;  %v7797_v59 = vld [vmem:[%s7184_s20 + $0x8] sm:$0x1]  ;;  %v1352_v35 = vrot.slane %v7027_v25, 5 }
  0xa0   : > { %6262 = vmatprep.subr.bf16.mxu1 %v6940_v1  ;;  %v1345_v24 = vrot.slane %v7797_v59, 5 }
  0xa1   : > { %v7792_v11 = vrot.slane %v2438_v50, 5 }
  0xa3   : > { %6263 = vmatpush3.bf16.msra.mxu1 %v6940_v1  ;;  %v1342_v1 = vrot.slane %v7676_v62, 5  ;;  %v5406_v62 = vcombine.low %v7458_v5, %v7470_v21  ;;  %v5422_v21 = vrot.slane %v1290_v10, 9  ;;  %v5781_v10 = vld [vmem:[%s7184_s20 + $0x18] sm:$0xf] }
  0xa4   : > { %6264 = vmatprep.subr.bf16.mxu1 %v6945_v32 }
  0xa5   : > { %6441 = vmatmul.mubr.bf16.gmra.mrb[24].mxu0 %v5698_v36  ;;  %v5407_v36 = vcombine.low %v7481_v47, %v7492_v54  ;;  %v1344_v5 = vrot.slane %v1342_v1, 4  ;;  %v6953_v47 = vld [vmem:[%s8993_s1 + $0x1c8] sm:$0xff]   ;;  %v5423_v54 = vrot.slane %v1291_v19, 9  ;;  %v7852_v59 = vsel %vm7462_vm5, %v5421_v17, %v1342_v1  ;;  %v5782_v19 = vld [vmem:[%s7184_s20 + $0x1c] sm:$0xf] }
  0xa6   : > { %6233 = vmatmul.mubr.bf16.gmra.mrb[8].mxu1 %v5402_v34  ;;  %6444 = vmatprep.mubr.bf16.mxu0 %v5699_v33  ;;  %v1370_v34 = vrot.slane %v7740_v58, 5  ;;  %v1351_v33 = vrot.slane %v1349_v7, 4  ;;  %v5424_v58 = vrot.slane %v1292_v61, 9  ;;  %v1384_v1 = vrot.slane %v7766_v0, 5  ;;  %v6955_v0 = vld [vmem:[%s7184_s20 + $0x48] sm:$0xff]  }
  0xa7   : > { %6236 = vmatprep.mubr.bf16.mxu1 %v5403_v20  ;;  %6265 = vmatpush3.bf16.msra.mxu1 %v6945_v32  ;;  %v1363_v32 = vrot.slane %v7735_v51, 5  ;;  %v1293_v51 = vld [vmem:[%s7184_s20 + $0x30] sm:$0xe]  ;;  %v5410_v20 = vcombine.low %v7564_v31, %v7573_v48  ;;  %v7860_v25 = vsel %vm7462_vm5, %v1344_v5, %v1345_v24  ;;  %v7868_v63 = vsel %vm7462_vm5, %v5423_v54, %v1356_v13  ;;  %v1295_v13 = vld [vmem:[%s7184_s20 + $0x48] sm:$0xe] }
  0xa8   : > { %6266 = vmatprep.subr.bf16.mxu1 %v6951_v23  ;;  %v5425_v50 = vrot.slane %v1293_v51, 9  ;;  %v1372_v52 = vrot.slane %v1370_v34, 4  ;;  %v3855_v5 = vshrl.u32 %v5781_v10, 16  ;;  %v3868_v51 = vshrl.u32 %v5782_v19, 16  ;;  %v6964_v48 = vld [vmem:[%s7184_s20 + $0x6c] sm:$0xff]  }
  0xa9   : > { %v1365_v42 = vrot.slane %v1363_v32, 4  ;;  %v7880_v24 = vsel %vm7462_vm5, %v5424_v58, %v1363_v32  ;;  %v7031_v32 = vld [vmem:[%s7184_s20 + $0x44] sm:$0x1]  ;;  %v5427_v54 = vrot.slane %v1295_v13, 9  ;;  %v5785_v13 = vld [vmem:[%s7184_s20 + $0x28] sm:$0xf] }
  0xaa   : > { %v7890_v61 = vsel %vm7462_vm5, %v5425_v50, %v1370_v34  ;;  %v1380_v17 = vrot.slane %v7031_v32, 5  ;;  %v5783_v50 = vld [vmem:[%s7184_s20 + $0x20] sm:$0x1]  ;;  %v1297_v32 = vld [vmem:[%s7184_s20 + $0x60] sm:$0xe] }
  0xab   : > { %6267 = vmatpush3.bf16.msra.mxu1 %v6951_v23  ;;  %v5411_v23 = vcombine.low %v7598_v27, %v7601_v29 }
  0xac   : > { %6268 = vmatprep.subr.bf16.mxu1 %v6957_v49 }
  0xad   : > { %6445 = vmatmul.mubr.bf16.gmra.mrb[28].mxu0 %v5700_v53  ;;  %v7030_v53 = vld [vmem:[%s7184_s20 + $0x38] sm:$0x1] }
  0xae   : > { %6237 = vmatmul.mubr.bf16.gmra.mrb[12].mxu1 %v5404_v4  ;;  %6464 = vmatprep.mubr.bf16.mxu0 %v6943_v22  ;;  %v1373_v45 = vrot.slane %v7030_v53, 5  ;;  %v1294_v4 = vld [vmem:[%s7184_s20 + $0x3c] sm:$0xe]  ;;  %v1377_v22 = vrot.slane %v7761_v30, 5  ;;  %v7856_v30 = vsel %vm7462_vm5, %v5422_v21, %v1349_v7  ;;  %v3858_v21 = vshll.u32 %v5781_v10, 16  ;;  %v6969_v53 = vld [vmem:[%s8993_s1 + $0x1e0] sm:$0xff]  }
  0xaf   : > { %6240 = vmatprep.mubr.bf16.mxu1 %v5405_v55  ;;  %6269 = vmatpush3.bf16.msra.mxu1 %v6957_v49  ;;  %v1366_v49 = vrot.slane %v7029_v43, 5  ;;  %v7843_v55 = vrot.slane %v2448_v8, 5  ;;  %v6952_v7 = vld [vmem:[%s7184_s20 + $0x3c] sm:$0xff]   ;;  %v7876_v8 = vsel %vm7462_vm5, %v1358_v46, %v1359_v39  ;;  %v1386_v46 = vrot.slane %v1384_v1, 4  ;;  %v5787_v43 = vld [vmem:[%s7184_s20 + $0x30] sm:$0xf] }
  0xb0   : > { %6270 = vmatprep.subr.bf16.mxu1 %v6963_v56  ;;  %v1387_v39 = vrot.slane %v7032_v38, 5  ;;  %v3857_v10 = vrot.slane %v3855_v5, 4 }
  0xb1   : > { %9015 = vst [vmem:[#allocation2_spill] sm:$0xff] %v7843_v55 }
  0xb3   : > { %6271 = vmatpush3.bf16.msra.mxu1 %v6963_v56  ;;  %v6959_v56 = vld [vmem:[%s8993_s1 + $0x1d0] sm:$0xff]  }
  0xb4   : > { %6304 = vmatprep.subr.bf16.mxu1 %v7809_v60 }
  0xb5   : > { %6465 = vmatmul.mubr.bf16.vlgmr.msra.gmra.mrb[0].mxu0 %v6946_v6  ;;  %v7864_v6 = vsel %vm7462_vm5, %v1351_v33, %v1352_v35  ;;  %v7884_v35 = vsel %vm7462_vm5, %v1365_v42, %v1366_v49  ;;  %v3864_v33 = vshll.u32 %v5782_v19, 16  ;;  %v3860_v19 = vrot.slane %v3858_v21, 5  ;;  %v1298_v21 = vld [vmem:[%s7184_s20 + $0x6c] sm:$0xe] }
  0xb6   : > { %6241 = vmatmul.mubr.bf16.gmra.mrb[16].mxu1 %v5406_v62  ;;  %6497 = vmatpush3.bf16.msra.mxu0 %v7648_v44  ;;  %v5426_v62 = vrot.slane %v1294_v4, 9  ;;  %v5430_v58 = vrot.slane %v1298_v21, 9 }
  0xb7   : > { %6244 = vmatprep.mubr.bf16.mxu1 %v5407_v36  ;;  %6468 = vmatprep.mubr.bf16.mxu0 %v6949_v18  ;;  %v7894_v36 = vsel %vm7462_vm5, %v1372_v52, %v1373_v45  ;;  %v1379_v18 = vrot.slane %v1377_v22, 4  ;;  %v5784_v52 = vld [vmem:[%s7184_s20 + $0x24] sm:$0xf]  ;;  %v3892_v45 = vshrl.u32 %v5785_v13, 16 }
  0xb8   : > { %6498 = vmatprep.subr.bf16.mxu0 %v6953_v47  ;;  %v7911_v49 = vsel %vm7462_vm5, %v5426_v62, %v1377_v22  ;;  %v7928_v22 = vld [vmem:[%s7184_s20 + $0x54] sm:$0xe]  ;;  %v3870_v62 = vrot.slane %v3868_v51, 4  ;;  %v3879_v38 = vshrl.u32 %v5784_v52, 16  ;;  %v3882_v28 = vshll.u32 %v5784_v52, 16 }
  0xb9   : > { %v7925_v4 = vsel %vm7462_vm5, %v1379_v18, %v1380_v17  ;;  %v3874_v17 = vshll.u32 %v5783_v50, 16  ;;  %v5428_v5 = vrot.slane %v7928_v22, 9  ;;  %v6973_v50 = vld [vmem:[%s8993_s1 + $0x1e8] sm:$0xff]   ;;  %v1393_v52 = vrot.slane %v1391_v16, 4 }
  0xba   : > { %6499 = vmatpush3.bf16.msra.mxu0 %v6953_v47  ;;  %v6965_v47 = vld [vmem:[%s8993_s1 + $0x1d8] sm:$0xff]   ;;  %v3861_v22 = vor.u32 %v3860_v19, %v3857_v10  ;;  %v3881_v34 = vrot.slane %v3879_v38, 4  ;;  %v3884_v44 = vrot.slane %v3882_v28, 5  ;;  %v7037_v10 = vld [vmem:[%s7184_s20 + $0x74] sm:$0x1]  ;;  %v3894_v28 = vrot.slane %v3892_v45, 4 }
  0xbb   : > { %6500 = vmatprep.subr.bf16.mxu0 %v6959_v56  ;;  %v7966_v42 = vrot.slane %v3874_v17, 5  ;;  %v1408_v19 = vrot.slane %v7037_v10, 5  ;;  %v3903_v38 = vshrl.u32 %v5787_v43, 16  ;;  %v7991_v27 = vsel %vm7462_vm5, %v5428_v5, %v1391_v16 }
  0xbc   : > { %v3862_v21 = vrot.slane %v3861_v22, 4 }
  0xbd   : > { %6469 = vmatmul.mubr.bf16.gmra.mrb[4].mxu0 %v6952_v7  ;;  %v7938_v7 = vrot.slane %v3864_v33, 5  ;;  %v7035_v33 = vld [vmem:[%s7184_s20 + $0x70] sm:$0xf] }
  0xbe   : > { %6245 = vmatmul.mubr.bf16.gmra.mrb[20].mxu1 %v5408_v15  ;;  %6472 = vmatprep.mubr.bf16.mxu0 %v6955_v0  ;;  %v1398_v15 = vrot.slane %v7932_v40, 5  ;;  %v7034_v0 = vld [vmem:[%s7184_s20 + $0x5c] sm:$0x1]  ;;  %v1405_v51 = vrot.slane %v7035_v33, 5 }
  0xbf   : > { %6248 = vmatprep.mubr.bf16.mxu1 %v5409_v26  ;;  %6501 = vmatpush3.bf16.msra.mxu0 %v6959_v56  ;;  %v1394_v18 = vrot.slane %v7034_v0, 5  ;;  %v7947_v26 = vsel %vm7462_vm5, %v5427_v54, %v1384_v1  ;;  %v7951_v56 = vsel %vm7462_vm5, %v1386_v46, %v1387_v39  ;;  %v7036_v1 = vld [vmem:[%s7184_s20 + $0x68] sm:$0x1]  ;;  %v3888_v0 = vshll.u32 %v5785_v13, 16  ;;  %v6981_v40 = vld [vmem:[%s8993_s1 + $0x1f8] sm:$0xff]  }
  0xc0   : > { %6502 = vmatprep.subr.bf16.mxu0 %v6965_v47  ;;  %v1401_v54 = vrot.slane %v7036_v1, 5  ;;  %v5429_v46 = vrot.slane %v1297_v32, 9  ;;  %v1400_v39 = vrot.slane %v1398_v15, 4  ;;  %v3871_v33 = vor.u32 %v3870_v62, %v7938_v7  ;;  %v5788_v1 = vld [vmem:[%s7184_s20 + $0x34] sm:$0xf] }
  0xc1   : > { %v1407_v32 = vrot.slane %v1405_v51, 4  ;;  %v5786_v62 = vld [vmem:[%s7184_s20 + $0x2c] sm:$0x1]  ;;  %v7978_v17 = vrot.slane %v3888_v0, 5  ;;  %v3912_v13 = vshll.u32 %v5788_v1, 16  ;;  %v3916_v31 = vshrl.u32 %v5788_v1, 16 }
  0xc2   : > { %v3872_v10 = vrot.slane %v3871_v33, 4  ;;  %v7995_v29 = vsel %vm7462_vm5, %v1393_v52, %v1394_v18  ;;  %v8002_v45 = vsel %vm7462_vm5, %v5429_v46, %v1398_v15  ;;  %v8006_v14 = vsel %vm7462_vm5, %v1400_v39, %v1401_v54  ;;  %v1299_v18 = vld [vmem:[%s7184_s20 + $0x78] sm:$0xe] }
  0xc3   : > { %6503 = vmatpush3.bf16.msra.mxu0 %v6965_v47  ;;  %v8010_v16 = vsel %vm7462_vm5, %v5430_v58, %v1405_v51  ;;  %v8020_v15 = vsel %vm7462_vm5, %v1407_v32, %v1408_v19  ;;  %v3895_v5 = vor.u32 %v3894_v28, %v7978_v17  ;;  %v3905_v52 = vrot.slane %v3903_v38, 4  ;;  %v5790_v58 = vld [vmem:[%s7184_s20 + $0x3c] sm:$0xf]  ;;  %v5791_v51 = vld [vmem:[%s7184_s20 + $0x40] sm:$0xf] }
  0xc4   : > { %6504 = vmatprep.subr.bf16.mxu0 %v6969_v53  ;;  %v3867_v0 = vsel %vm7216_vm2, %v3862_v21, %v7938_v7  ;;  %v3877_v46 = vsel %vm7216_vm2, %v3872_v10, %v7966_v42  ;;  %v8031_v39 = vrot.slane %v3912_v13, 5  ;;  %v3918_v22 = vrot.slane %v3916_v31, 4  ;;  %v7039_v19 = vld [vmem:[%s7184_s20 + $0x80] sm:$0x1]  ;;  %v8190_v47 = vld [vmem:[%s7184_s20 + $0x68] sm:$0x1] }
  0xc5   : > { %6473 = vmatmul.mubr.bf16.gmra.mrb[8].mxu0 %v6958_v2  ;;  %v3906_v2 = vshll.u32 %v5787_v43, 16  ;;  %v3898_v43 = vshll.u32 %v5786_v62, 16  ;;  %v5431_v32 = vrot.slane %v1299_v18, 9  ;;  %v1300_v62 = vld [vmem:[%s7184_s20 + $0x84] sm:$0xe]  ;;  %v3927_v28 = vshrl.u32 %v5790_v58, 16 }
  0xc6   : > { %6249 = vmatmul.mubr.bf16.gmra.mrb[24].mxu1 %v5410_v20  ;;  %6476 = vmatprep.mubr.bf16.mxu0 %v6961_v3  ;;  %v6977_v20 = vld [vmem:[%s8993_s1 + $0x1f0] sm:$0xff]   ;;  %v7038_v3 = vld [vmem:[%s7184_s20 + $0x7c] sm:$0xf]  ;;  %v3930_v7 = vshll.u32 %v5790_v58, 16  ;;  %v3936_v38 = vshll.u32 %v5791_v51, 16  ;;  %v9016_v42 = vcombine.low %v7621_v41, %v7626_v12  ;;  %v8042_v13 = vrot.slane %v3895_v5, 4 }
  0xc7   : > { %6252 = vmatprep.mubr.bf16.mxu1 %v5411_v23  ;;  %6505 = vmatpush3.bf16.msra.mxu0 %v6969_v53  ;;  %v3885_v23 = vor.u32 %v3884_v44, %v3881_v34  ;;  %v6966_v53 = vld [vmem:[%s7184_s20 + $0x78] sm:$0xff]   ;;  %v1412_v44 = vrot.slane %v7038_v3, 5  ;;  %v3908_v54 = vrot.slane %v3906_v2, 5  ;;  %v8035_v1 = vrot.slane %v3898_v43, 5  ;;  %v8047_v21 = vld [vmem:[%s8993_s1 + $0x200] sm:$0xff]   ;;  %9024 = vst [vmem:[#allocation5_spill] sm:$0xff] %v8190_v47 }
  0xc8   : > { %6506 = vmatprep.subr.bf16.mxu0 %v6973_v50  ;;  %v5789_v34 = vld [vmem:[%s7184_s20 + $0x38] sm:$0x1]  ;;  %v3940_v2 = vshrl.u32 %v5791_v51, 16  ;;  %v6968_v43 = vld [vmem:[%s7184_s20 + $0x84] sm:$0xff]   ;;  %v3919_v12 = vor.u32 %v3918_v22, %v8031_v39  ;;  %v3932_v58 = vrot.slane %v3930_v7, 5  ;;  %v8069_v51 = vrot.slane %v3936_v38, 5 }
  0xc9   : > { %v8033_v33 = vrot.slane %v3885_v23, 4  ;;  %v1414_v10 = vrot.slane %v1412_v44, 4  ;;  %v3909_v31 = vor.u32 %v3908_v54, %v3905_v52  ;;  %v9017_v23 = vcombine.low %v7852_v59, %v7860_v25  ;;  %v7040_v18 = vld [vmem:[%s7184_s20 + $0x88] sm:$0xf]  ;;  %v5792_v5 = vld [vmem:[%s7184_s20 + $0x44] sm:$0x1] }
  0xca   : > { %v1419_v3 = vrot.slane %v7040_v18, 5  ;;  %v8060_v59 = vcombine.low %v3867_v0, %v3877_v46  ;;  %v5793_v52 = vld [vmem:[%s7184_s20 + $0x48] sm:$0xf]  ;;  %v3929_v54 = vrot.slane %v3927_v28, 4  ;;  %v3942_v22 = vrot.slane %v3940_v2, 4 }
  0xcb   : > { %6507 = vmatpush3.bf16.msra.mxu0 %v6973_v50  ;;  %v1415_v50 = vrot.slane %v7039_v19, 5  ;;  %v6970_v19 = vld [vmem:[%s7184_s20 + $0x90] sm:$0xff]   ;;  %v3891_v0 = vsel %vm7216_vm2, %v8033_v33, %v7978_v17  ;;  %v3910_v46 = vrot.slane %v3909_v31, 4  ;;  %v3901_v28 = vsel %vm7216_vm2, %v8042_v13, %v8035_v1  ;;  %v8091_v33 = vld [vmem:[%s7184_s20 + $0x58] sm:$0xf]  ;;  %v6971_v31 = vld [vmem:[%s8993_s1 + $0xc8] sm:$0xff]  }
  0xcc   : > { %6508 = vmatprep.subr.bf16.mxu0 %v6977_v20  ;;  %v3920_v38 = vrot.slane %v3919_v12, 4  ;;  %v1421_v2 = vrot.slane %v1419_v3, 4  ;;  %v5796_v17 = vld [vmem:[%s7184_s20 + $0x54] sm:$0xf]  ;;  %v3946_v1 = vshll.u32 %v5792_v5, 16  ;;  %v3951_v13 = vshrl.u32 %v5793_v52, 16 }
  0xcd   : > { %6477 = vmatmul.mubr.bf16.gmra.mrb[12].mxu0 %v6964_v48  ;;  %v3922_v48 = vshll.u32 %v5789_v34, 16  ;;  %v8087_v7 = vsel %vm7462_vm5, %v1414_v10, %v1415_v50  ;;  %v3954_v50 = vshll.u32 %v5793_v52, 16  ;;  %v3933_v10 = vor.u32 %v3932_v58, %v3929_v54  ;;  %v6972_v54 = vld [vmem:[%s7184_s20 + $0x9c] sm:$0xff]   ;;  %v7046_v41 = vld [vmem:[%s7184_s20 + $0xac] sm:$0xf] }
  0xce   : > { %6253 = vmatmul.mubr.bf16.gmra.mrb[28].mxu1 %v9016_v42  ;;  %6480 = vmatprep.mubr.bf16.mxu0 %v6966_v53  ;;  %v5432_v53 = vrot.slane %v1300_v62, 9  ;;  %v7041_v42 = vld [vmem:[%s7184_s20 + $0x8c] sm:$0x1]  ;;  %v3984_v5 = vshll.u32 %v8091_v33, 16  ;;  %v9019_v52 = vcombine.low %v7868_v63, %v7876_v8  ;;  %v8127_v63 = vld [vmem:[%s7184_s20 + $0x50] sm:$0x1] }
  0xcf   : > { %6272 = vmatprep.mubr.bf16.mxu1 %v9017_v23  ;;  %6509 = vmatpush3.bf16.msra.mxu0 %v6977_v20  ;;  %v8066_v20 = vsel %vm7462_vm5, %v5431_v32, %v1412_v44  ;;  %v3924_v62 = vrot.slane %v3922_v48, 5  ;;  %v1422_v23 = vrot.slane %v7041_v42, 5  ;;  %v1301_v44 = vld [vmem:[%s7184_s20 + $0x90] sm:$0xe]  ;;  %v8079_v32 = vld [vmem:[%s7184_s20 + $0x4c] sm:$0xf]  ;;  %v3943_v48 = vor.u32 %v3942_v22, %v8069_v51 }
  0xd0   : > { %6510 = vmatprep.subr.bf16.mxu0 %v6981_v40  ;;  %v3960_v12 = vshll.u32 %v8079_v32, 16  ;;  %v3964_v18 = vshrl.u32 %v8079_v32, 16  ;;  %v9018_v42 = vcombine.low %v7856_v30, %v7864_v6  ;;  %v6975_v30 = vld [vmem:[%s8993_s1 + $0xd0] sm:$0xff]   ;;  %v3915_v6 = vsel %vm7216_vm2, %v3910_v46, %v8031_v39  ;;  %v6974_v8 = vld [vmem:[%s7184_s20 + $0xa8] sm:$0xff]   ;;  %v8134_v39 = vld [vmem:[%s7184_s20 + $0x5c] sm:$0x1] }
  0xd1   : > { %v3925_v58 = vsel %vm7216_vm2, %v3920_v38, %v3924_v62  ;;  %v5433_v22 = vrot.slane %v1301_v44, 9  ;;  %v3956_v25 = vrot.slane %v3954_v50, 5  ;;  %9020 = vst [vmem:[#allocation3_spill] sm:$0xff] %v8134_v39  ;;  %v3934_v46 = vrot.slane %v3933_v10, 4 }
  0xd2   : > { %v3944_v62 = vrot.slane %v3943_v48, 4  ;;  %v8136_v38 = vrot.slane %v3960_v12, 5  ;;  %v8138_v34 = vrot.slane %v3984_v5, 5  ;;  %v8143_v50 = vcombine.low %v3891_v0, %v3901_v28  ;;  %v5799_v28 = vld [vmem:[%s7184_s20 + $0x60] sm:$0xf] }
  0xd3   : > { %6511 = vmatpush3.bf16.msra.mxu0 %v6981_v40  ;;  %v8099_v40 = vsel %vm7462_vm5, %v5432_v53, %v1419_v3  ;;  %v3975_v53 = vshrl.u32 %v5796_v17, 16  ;;  %v3978_v3 = vshll.u32 %v5796_v17, 16  ;;  %v7042_v17 = vld [vmem:[%s7184_s20 + $0x94] sm:$0xf]  ;;  %v8147_v48 = vcombine.low %v3915_v6, %v3925_v58 }
  0xd4   : > { %6544 = vmatprep.subr.bf16.mxu0 %v8047_v21  ;;  %v3970_v0 = vshll.u32 %v8127_v63, 16  ;;  %v3939_v6 = vsel %vm7216_vm2, %v3934_v46, %v8069_v51  ;;  %v9023_v46 = vcombine.low %v7890_v61, %v7894_v36 }
  0xd5   : > { %6481 = vmatmul.mubr.bf16.gmra.mrb[16].mxu0 %v6968_v43  ;;  %v3988_v43 = vshrl.u32 %v8091_v33, 16  ;;  %v3977_v44 = vrot.slane %v3975_v53, 4  ;;  %v7043_v53 = vld [vmem:[%s7184_s20 + $0x98] sm:$0x1] }
  0xd6   : > { %6273 = vmatmul.mubr.bf16.vlgmr.msra.gmra.mrb[0].mxu1 %v9018_v42  ;;  %6484 = vmatprep.mubr.bf16.mxu0 %v6970_v19  ;;  %v8130_v19 = vrot.slane %v3946_v1, 5  ;;  %v1426_v42 = vrot.slane %v7042_v17, 5  ;;  %v7044_v17 = vld [vmem:[%s7184_s20 + $0xa0] sm:$0xf]  ;;  %v3972_v36 = vrot.slane %v3970_v0, 5 }
  0xd7   : > { %6305 = vmatpush3.bf16.msra.mxu1 %v7809_v60  ;;  %6276 = vmatprep.mubr.bf16.mxu1 %v9019_v52  ;;  %v8124_v60 = vsel %vm7462_vm5, %v1421_v2, %v1422_v23  ;;  %v3953_v52 = vrot.slane %v3951_v13, 4  ;;  %v3966_v23 = vrot.slane %v3964_v18, 4  ;;  %v3980_v2 = vrot.slane %v3978_v3, 5  ;;  %v6979_v13 = vld [vmem:[%s8993_s1 + $0xd8] sm:$0xff]  }
  0xd8   : > { %6306 = vmatprep.subr.bf16.mxu1 %v6971_v31  ;;  %v3990_v1 = vrot.slane %v3988_v43, 4  ;;  %v1302_v18 = vld [vmem:[%s7184_s20 + $0x9c] sm:$0xe]  ;;  %v1429_v3 = vrot.slane %v7043_v53, 5  ;;  %v8160_v43 = vld [vmem:[%s7184_s20 + $0x64] sm:$0xf] }
  0xd9   : > { %v3957_v5 = vor.u32 %v3956_v25, %v3953_v52  ;;  %9021 = vst [vmem:[#allocation4_spill] sm:$0xff] %v8160_v43  ;;  %v3967_v58 = vor.u32 %v3966_v23, %v8136_v38  ;;  %v1433_v12 = vrot.slane %v7044_v17, 5  ;;  %v9022_v25 = vcombine.low %v7880_v24, %v7884_v35  ;;  %v6976_v23 = vld [vmem:[%s7184_s20 + $0xb4] sm:$0xff]   ;;  %v6982_v24 = vld [vmem:[%s8993_s1 + $0xe0] sm:$0xff]   ;;  %v5802_v17 = vld [vmem:[%s7184_s20 + $0x6c] sm:$0xf] }
  0xda   : > { %v1428_v52 = vrot.slane %v1426_v42, 4  ;;  %v3981_v53 = vor.u32 %v3980_v2, %v3977_v44  ;;  %v3991_v51 = vor.u32 %v3990_v1, %v8138_v34  ;;  %v3999_v35 = vshrl.u32 %v5799_v28, 16  ;;  %v7045_v2 = vld [vmem:[%s7184_s20 + $0xa4] sm:$0x1] }
  0xdb   : > { %6307 = vmatpush3.bf16.msra.mxu1 %v6971_v31  ;;  %v8154_v31 = vsel %vm7462_vm5, %v5433_v22, %v1426_v42  ;;  %v3994_v22 = vshll.u32 %v8134_v39, 16  ;;  %v4012_v42 = vshrl.u32 %v8160_v43, 16  ;;  %v3958_v61 = vrot.slane %v3957_v5, 4  ;;  %v8329_v39 = vld [vmem:[%s7184_s20 + $0x98] sm:$0x1] }
  0xdc   : > { %6308 = vmatprep.subr.bf16.mxu1 %v6975_v30  ;;  %v5434_v44 = vrot.slane %v1302_v18, 9  ;;  %v1436_v1 = vrot.slane %v7045_v2, 5  ;;  %v3982_v5 = vrot.slane %v3981_v53, 4  ;;  %v3992_v18 = vrot.slane %v3991_v51, 4  ;;  %9037 = vst [vmem:[#allocation14_spill] sm:$0xff] %v8329_v39 }
  0xdd   : > { %6485 = vmatmul.mubr.bf16.gmra.mrb[20].mxu0 %v6972_v54  ;;  %v3949_v54 = vsel %vm7216_vm2, %v3944_v62, %v8130_v19  ;;  %v4008_v19 = vshll.u32 %v8160_v43, 16  ;;  %v6978_v62 = vld [vmem:[%s7184_s20 + $0xc0] sm:$0xff]   ;;  %v3996_v10 = vrot.slane %v3994_v22, 5  ;;  %v8196_v43 = vsel %vm7462_vm5, %v1428_v52, %v1429_v3 }
  0xde   : > { %6277 = vmatmul.mubr.bf16.gmra.mrb[4].mxu1 %v9022_v25  ;;  %6488 = vmatprep.mubr.bf16.mxu0 %v6974_v8  ;;  %v4002_v8 = vshll.u32 %v5799_v28, 16  ;;  %v3968_v25 = vrot.slane %v3967_v58, 4  ;;  %v1440_v28 = vrot.slane %v7046_v41, 5  ;;  %v8192_v55 = vcombine.low %v3939_v6, %v3949_v54  ;;  %v6984_v41 = vld [vmem:[%s8993_s1 + $0xe8] sm:$0xff]  }
  0xdf   : > { %6280 = vmatprep.mubr.bf16.mxu1 %v9023_v46  ;;  %6309 = vmatpush3.bf16.msra.mxu1 %v6975_v30  ;;  %v1303_v30 = vld [vmem:[%s7184_s20 + $0xa8] sm:$0xe]  ;;  %v1435_v46 = vrot.slane %v1433_v12, 4  ;;  %v4001_v0 = vrot.slane %v3999_v35, 4  ;;  %v8198_v58 = vrot.slane %v4008_v19, 5  ;;  %v4014_v22 = vrot.slane %v4012_v42, 4 }
  0xe0   : > { %6310 = vmatprep.subr.bf16.mxu1 %v6979_v13  ;;  %v4004_v2 = vrot.slane %v4002_v8, 5  ;;  %v3963_v3 = vsel %vm7216_vm2, %v3958_v61, %v8136_v38  ;;  %v8208_v6 = vsel %vm7462_vm5, %v5434_v44, %v1433_v12  ;;  %v4023_v54 = vshrl.u32 %v5802_v17, 16  ;;  %v7047_v38 = vld [vmem:[%s7184_s20 + $0xb0] sm:$0x1]  ;;  %v1304_v19 = vld [vmem:[%s7184_s20 + $0xb4] sm:$0xe] }
  0xe1   : > { %v4026_v52 = vshll.u32 %v5802_v17, 16  ;;  %v3973_v53 = vsel %vm7216_vm2, %v3968_v25, %v3972_v36  ;;  %v8217_v51 = vsel %vm7462_vm5, %v1435_v46, %v1436_v1  ;;  %v5435_v35 = vrot.slane %v1303_v30, 9  ;;  %v8239_v30 = vld [vmem:[%s7184_s20 + $0x74] sm:$0x1]  ;;  %v7048_v25 = vld [vmem:[%s7184_s20 + $0xb8] sm:$0xf] }
  0xe2   : > { %v1443_v8 = vrot.slane %v7047_v38, 5  ;;  %v9026_v12 = vcombine.low %v7911_v49, %v7925_v4  ;;  %v3987_v42 = vsel %vm7216_vm2, %v3982_v5, %v8138_v34  ;;  %v3997_v61 = vsel %vm7216_vm2, %v3992_v18, %v3996_v10  ;;  %v6980_v4 = vld [vmem:[%s7184_s20 + $0xcc] sm:$0xff]   ;;  %9028 = vst [vmem:[#allocation7_spill] sm:$0xff] %v8239_v30  ;;  %v5808_v38 = vld [vmem:[%s7184_s20 + $0x84] sm:$0xf] }
  0xe3   : > { %6311 = vmatpush3.bf16.msra.mxu1 %v6979_v13  ;;  %v8211_v13 = vld [vmem:[%s7184_s20 + $0x70] sm:$0xf]  ;;  %v1442_v36 = vrot.slane %v1440_v28, 4  ;;  %v4018_v44 = vshll.u32 %v8190_v47, 16  ;;  %v9027_v49 = vcombine.low %v7947_v26, %v7951_v56  ;;  %v4015_v1 = vor.u32 %v4014_v22, %v8198_v58  ;;  %v8256_v22 = vld [vmem:[%s7184_s20 + $0x7c] sm:$0xf] }
  0xe4   : > { %6312 = vmatprep.subr.bf16.mxu1 %v6982_v24  ;;  %9025 = vst [vmem:[#allocation6_spill] sm:$0xff] %v8211_v13  ;;  %v4032_v34 = vshll.u32 %v8211_v13, 16  ;;  %v4036_v10 = vshrl.u32 %v8211_v13, 16  ;;  %v5436_v17 = vrot.slane %v1304_v19, 9  ;;  %v1447_v46 = vrot.slane %v7048_v25, 5  ;;  %9029 = vst [vmem:[#allocation8_spill] sm:$0xff] %v8256_v22 }
  0xe5   : > { %6489 = vmatmul.mubr.bf16.gmra.mrb[24].mxu0 %v6976_v23  ;;  %v6986_v23 = vld [vmem:[%s8993_s1 + $0xf0] sm:$0xff]   ;;  %v4025_v26 = vrot.slane %v4023_v54, 4  ;;  %v4028_v56 = vrot.slane %v4026_v52, 5  ;;  %v8247_v18 = vcombine.low %v3963_v3, %v3973_v53  ;;  %v8259_v19 = vcombine.low %v3987_v42, %v3997_v61  ;;  %v7049_v3 = vld [vmem:[%s7184_s20 + $0xbc] sm:$0x1] }
  0xe6   : > { %6281 = vmatmul.mubr.bf16.gmra.mrb[8].mxu1 %v9026_v12  ;;  %6492 = vmatprep.mubr.bf16.mxu0 %v6978_v62  ;;  %v4005_v62 = vor.u32 %v4004_v2, %v4001_v0  ;;  %v8253_v2 = vsel %vm7462_vm5, %v5435_v35, %v1440_v28  ;;  %v8263_v54 = vsel %vm7462_vm5, %v1442_v36, %v1443_v8  ;;  %v8265_v52 = vrot.slane %v4018_v44, 5  ;;  %v6988_v12 = vld [vmem:[%s8993_s1 + $0xf8] sm:$0xff]   ;;  %v8272_v28 = vld [vmem:[%s7184_s20 + $0x88] sm:$0xf] }
  0xe7   : > { %6284 = vmatprep.mubr.bf16.mxu1 %v9027_v49  ;;  %6313 = vmatpush3.bf16.msra.mxu1 %v6982_v24  ;;  %v5805_v24 = vld [vmem:[%s7184_s20 + $0x78] sm:$0xf]  ;;  %v1450_v53 = vrot.slane %v7049_v3, 5  ;;  %9030 = vst [vmem:[#allocation9_spill] sm:$0xff] %v8272_v28  ;;  %v8276_v42 = vrot.slane %v4015_v1, 4  ;;  %v8278_v61 = vrot.slane %v4032_v34, 5  ;;  %v8282_v36 = vsel %vm7462_vm5, %v5436_v17, %v1447_v46 }
  0xe8   : > { %6314 = vmatprep.subr.bf16.mxu1 %v6984_v41  ;;  %v8274_v35 = vrot.slane %v4005_v62, 4  ;;  %v4038_v8 = vrot.slane %v4036_v10, 4  ;;  %v1449_v44 = vrot.slane %v1447_v46, 4  ;;  %v4029_v49 = vor.u32 %v4028_v56, %v4025_v26  ;;  %v5811_v3 = vld [vmem:[%s7184_s20 + $0x90] sm:$0xf] }
  0xe9   : > { %v4042_v25 = vshll.u32 %v8239_v30, 16  ;;  %v4050_v0 = vshll.u32 %v5805_v24, 16  ;;  %v4056_v62 = vshll.u32 %v8256_v22, 16  ;;  %v4060_v1 = vshrl.u32 %v8256_v22, 16  ;;  %v8289_v34 = vld [vmem:[%s7184_s20 + $0x94] sm:$0xf] }
  0xea   : > { %9031 = vst [vmem:[#allocation10_spill] sm:$0xff] %v8289_v34  ;;  %v9032_v10 = vcombine.low %v7991_v27, %v7995_v29  ;;  %v4071_v17 = vshrl.u32 %v5808_v38, 16  ;;  %v4074_v46 = vshll.u32 %v5808_v38, 16  ;;  %v4084_v26 = vshrl.u32 %v8272_v28, 16  ;;  %v5814_v38 = vld [vmem:[%s7184_s20 + $0x9c] sm:$0xf] }
  0xeb   : > { %6315 = vmatpush3.bf16.msra.mxu1 %v6984_v41  ;;  %v4047_v41 = vshrl.u32 %v5805_v24, 16  ;;  %v9033_v56 = vcombine.low %v8002_v45, %v8006_v14  ;;  %v4039_v29 = vor.u32 %v4038_v8, %v8278_v61  ;;  %v4098_v24 = vshll.u32 %v5811_v3, 16  ;;  %v8311_v45 = vld [vmem:[%s7184_s20 + $0x80] sm:$0x1] }
  0xec   : > { %6316 = vmatprep.subr.bf16.mxu1 %v6986_v23  ;;  %v8308_v5 = vrot.slane %v4042_v25, 5  ;;  %9034 = vst [vmem:[#allocation11_spill] sm:$0xff] %v8311_v45  ;;  %v4104_v14 = vshll.u32 %v8289_v34, 16  ;;  %v4052_v27 = vrot.slane %v4050_v0, 5  ;;  %v4062_v8 = vrot.slane %v4060_v1, 4 }
  0xed   : > { %6493 = vmatmul.mubr.bf16.gmra.mrb[28].mxu0 %v6980_v4  ;;  %v4080_v4 = vshll.u32 %v8272_v28, 16  ;;  %v8315_v28 = vrot.slane %v4056_v62, 5  ;;  %v8321_v22 = vld [vmem:[%s7184_s20 + $0xa0] sm:$0xf]  ;;  %v4073_v25 = vrot.slane %v4071_v17, 4  ;;  %v4076_v30 = vrot.slane %v4074_v46, 5 }
  0xee   : > { %6285 = vmatmul.mubr.bf16.gmra.mrb[12].mxu1 %v9032_v10  ;;  %6512 = vmatprep.mubr.bf16.mxu0 %v8060_v59  ;;  %v4095_v59 = vshrl.u32 %v5811_v3, 16  ;;  %v8306_v10 = vrot.slane %v4029_v49, 4  ;;  %v8318_v3 = vld [vmem:[%s7184_s20 + $0x8c] sm:$0x1]  ;;  %9036 = vst [vmem:[#allocation13_spill] sm:$0xff] %v8321_v22  ;;  %v4086_v47 = vrot.slane %v4084_v26, 4  ;;  %v8338_v62 = vsel %vm7462_vm5, %v1449_v44, %v1450_v53 }
  0xef   : > { %6288 = vmatprep.mubr.bf16.mxu1 %v9033_v56  ;;  %6317 = vmatpush3.bf16.msra.mxu1 %v6986_v23  ;;  %v4108_v23 = vshrl.u32 %v8289_v34, 16  ;;  %v4049_v56 = vrot.slane %v4047_v41, 4  ;;  %9035 = vst [vmem:[#allocation12_spill] sm:$0xff] %v8318_v3  ;;  %v6985_v49 = vld [vmem:[%s8993_s1 + $0x208] sm:$0xff]   ;;  %v8326_v13 = vrot.slane %v4080_v4, 5  ;;  %v4100_v34 = vrot.slane %v4098_v24, 5 }
  0xf0   : > { %6318 = vmatprep.subr.bf16.mxu1 %v6988_v12  ;;  %v5817_v41 = vld [vmem:[%s7184_s20 + $0xa8] sm:$0xf]  ;;  %v4097_v1 = vrot.slane %v4095_v59, 4  ;;  %v8343_v17 = vld [vmem:[%s8993_s1 + $0x100] sm:$0xff]   ;;  %v8346_v46 = vrot.slane %v4104_v14, 5  ;;  %v4119_v26 = vshrl.u32 %v5814_v38, 16  ;;  %v9039_v24 = vcombine.low %v8010_v16, %v8020_v15 }
  0xf1   : > { %9038 = vst [vmem:[#allocation15_spill] sm:$0xff] %v8343_v17  ;;  %v4110_v4 = vrot.slane %v4108_v23, 4  ;;  %v4122_v0 = vshll.u32 %v5814_v38, 16  ;;  %v8349_v53 = vrot.slane %v4039_v29, 4  ;;  %v4128_v44 = vshll.u32 %v8321_v22, 16  ;;  %v6987_v16 = vld [vmem:[%s8993_s1 + $0x210] sm:$0xff]  }
  0xf2   : > { %v4132_v59 = vshrl.u32 %v8321_v22, 16  ;;  %v4053_v14 = vor.u32 %v4052_v27, %v4049_v56  ;;  %v4063_v38 = vor.u32 %v4062_v8, %v8315_v28  ;;  %v4077_v23 = vor.u32 %v4076_v30, %v4073_v25  ;;  %v8361_v29 = vld [vmem:[%s7184_s20 + $0xac] sm:$0xf]  ;;  %v8374_v25 = vld [vmem:[%s7184_s20 + $0xa4] sm:$0x1] }
  0xf3   : > { %6319 = vmatpush3.bf16.msra.mxu1 %v6988_v12  ;;  %v4066_v12 = vshll.u32 %v8311_v45, 16  ;;  %9040 = vst [vmem:[#allocation16_spill] sm:$0xff] %v8361_v29  ;;  %v4087_v15 = vor.u32 %v4086_v47, %v8326_v13  ;;  %v4143_v27 = vshrl.u32 %v5817_v41, 16  ;;  %v4146_v30 = vshll.u32 %v5817_v41, 16 }
  0xf4   : > { %6592 = vmatprep.subr.bf16.mxu1 %v8343_v17  ;;  %v9041_v17 = vcombine.low %v8066_v20, %v8087_v7  ;;  %v4101_v56 = vor.u32 %v4100_v34, %v4097_v1  ;;  %v4111_v8 = vor.u32 %v4110_v4, %v8346_v46  ;;  %v4121_v20 = vrot.slane %v4119_v26, 4 }
  0xf5   : > { %6513 = vmatmul.mubr.bf16.vlgmr.msra.gmra.mrb[0].mxu0 %v8143_v50  ;;  %v4090_v50 = vshll.u32 %v8318_v3, 16  ;;  %v4124_v7 = vrot.slane %v4122_v0, 5  ;;  %v4156_v22 = vshrl.u32 %v8361_v29, 16  ;;  %v4054_v47 = vrot.slane %v4053_v14, 4  ;;  %v6989_v0 = vld [vmem:[%s8993_s1 + $0x218] sm:$0xff]  }
  0xf6   : > { %6289 = vmatmul.mubr.bf16.gmra.mrb[16].mxu1 %v9039_v24  ;;  %6545 = vmatpush3.bf16.msra.mxu0 %v8047_v21  ;;  %v4114_v21 = vshll.u32 %v8329_v39, 16  ;;  %v4152_v24 = vshll.u32 %v8361_v29, 16  ;;  %v4064_v39 = vrot.slane %v4063_v38, 4  ;;  %v4068_v3 = vrot.slane %v4066_v12, 5 }
  0xf7   : > { %6292 = vmatprep.mubr.bf16.mxu1 %v9041_v17  ;;  %6516 = vmatprep.mubr.bf16.mxu0 %v8147_v48  ;;  %v8376_v17 = vrot.slane %v4128_v44, 5  ;;  %v4134_v48 = vrot.slane %v4132_v59, 4  ;;  %v4092_v41 = vrot.slane %v4090_v50, 5  ;;  %v4078_v34 = vrot.slane %v4077_v23, 4 }
  0xf8   : > { %6546 = vmatprep.subr.bf16.mxu0 %v6985_v49  ;;  %v4088_v1 = vrot.slane %v4087_v15, 4  ;;  %v4145_v4 = vrot.slane %v4143_v27, 4  ;;  %v4148_v45 = vrot.slane %v4146_v30, 5  ;;  %v4102_v26 = vrot.slane %v4101_v56, 4  ;;  %v8442_v27 = vld [vmem:[%s7184_s20 + $0xbc] sm:$0x1] }
  0xf9   : > { %v4116_v44 = vrot.slane %v4114_v21, 5  ;;  %v4125_v59 = vor.u32 %v4124_v7, %v4121_v20  ;;  %v4138_v29 = vshll.u32 %v8374_v25, 16  ;;  %v4135_v12 = vor.u32 %v4134_v48, %v8376_v17  ;;  %v8409_v21 = vld [vmem:[%s7184_s20 + $0xb0] sm:$0x1] }
  0xfa   : > { %6547 = vmatpush3.bf16.msra.mxu0 %v6985_v49  ;;  %v4112_v49 = vrot.slane %v4111_v8, 4  ;;  %v8386_v14 = vrot.slane %v4152_v24, 5  ;;  %v4158_v38 = vrot.slane %v4156_v22, 4  ;;  %v9042_v23 = vor.u32 %v7794_v57, %v7792_v11 }
  0xfb   : > { %6548 = vmatprep.subr.bf16.mxu0 %v6987_v16  ;;  %v9043_v15 = vcombine.low %v8099_v40, %v8124_v60  ;;  %v4045_v22 = vsel %vm7216_vm2, %v8349_v53, %v8308_v5  ;;  %v4059_v57 = vsel %vm7216_vm2, %v4054_v47, %v8315_v28  ;;  %v9044_v40 = vcombine.low %v8154_v31, %v8196_v43  ;;  %v6992_v31 = vld [vmem:[%s8993_s1 + $0x220] sm:$0xff]  }
  0xfc   : > { %v8391_v50 = vrot.slane %v9042_v23, 4  ;;  %v4069_v60 = vsel %vm7216_vm2, %v4064_v39, %v4068_v3  ;;  %v4149_v5 = vor.u32 %v4148_v45, %v4145_v4  ;;  %v4093_v28 = vsel %vm7216_vm2, %v4088_v1, %v4092_v41  ;;  %v5873_v41 = vld [vmem:[%s7184_s20 + $0x48] sm:$0xe] }
  0xfd   : > { %6517 = vmatmul.mubr.bf16.gmra.mrb[4].mxu0 %v8192_v55  ;;  %v4035_v55 = vsel %vm7216_vm2, %v8306_v10, %v8278_v61  ;;  %v5820_v61 = vld [vmem:[%s7184_s20 + $0xb4] sm:$0xf]  ;;  %v8421_v10 = vld [vmem:[%s7184_s20 + $0xb8] sm:$0xf]  ;;  %v4107_v39 = vsel %vm7216_vm2, %v4102_v26, %v8346_v46  ;;  %v8431_v43 = vrot.slane %v4125_v59, 4  ;;  %v8433_v3 = vrot.slane %v4138_v29, 5 }
  0xfe   : > { %6293 = vmatmul.mubr.bf16.gmra.mrb[20].mxu1 %v9043_v15  ;;  %6520 = vmatprep.mubr.bf16.mxu0 %v8247_v18  ;;  %v4083_v18 = vsel %vm7216_vm2, %v4078_v34, %v8326_v13  ;;  %v4117_v13 = vsel %vm7216_vm2, %v4112_v49, %v4116_v44  ;;  %v8437_v45 = vrot.slane %v4135_v12, 4  ;;  %v4159_v53 = vor.u32 %v4158_v38, %v8386_v14  ;;  %v5874_v26 = vld [vmem:[%s7184_s20 + $0x54] sm:$0xe] }
  0xff   : > { %6296 = vmatprep.mubr.bf16.mxu1 %v9044_v40  ;;  %6549 = vmatpush3.bf16.msra.mxu0 %v6987_v16  ;;  %v4162_v16 = vshll.u32 %v8409_v21, 16  ;;  %v9045_v46 = vsel %vm7216_vm2, %v8276_v42, %v8265_v52  ;;  %v9046_v29 = vsel %vm7216_vm2, %v8274_v35, %v8198_v58  ;;  %v4167_v56 = vshrl.u32 %v5820_v61, 16 }
 0x100   : > { %6550 = vmatprep.subr.bf16.mxu0 %v6989_v0  ;;  %v5851_v30 = vcombine.low %v9046_v29, %v9045_v46  ;;  %v4170_v8 = vshll.u32 %v5820_v61, 16  ;;  %v4176_v20 = vshll.u32 %v8421_v10, 16  ;;  %v5467_v7 = vcombine.low %v8253_v2, %v8263_v54  ;;  %v6995_v2 = vld [vmem:[%s8993_s1 + $0x228] sm:$0xff]   ;;  %v5823_v54 = vld [vmem:[%s7184_s20 + $0xc0] sm:$0xf]  ;;  %v9050_v29 = vld [vmem:[#allocation5_spill] sm:$0xff] }
 0x101   : > { %v5468_v48 = vcombine.low %v8282_v36, %v8338_v62  ;;  %v5852_v24 = vcombine.low %v4035_v55, %v4045_v22  ;;  %v8459_v52 = vrot.slane %v4149_v5, 4  ;;  %v5853_v42 = vcombine.low %v4059_v57, %v4069_v60 }
 0x102   : > { %v8461_v58 = vcombine.low %v4083_v18, %v4093_v28  ;;  %v8463_v35 = vcombine.low %v4107_v39, %v4117_v13  ;;  %v4131_v47 = vsel %vm7216_vm2, %v8431_v43, %v8376_v17  ;;  %v4141_v34 = vsel %vm7216_vm2, %v8437_v45, %v8433_v3  ;;  %v5876_v28 = vld [vmem:[%s7184_s20 + $0x6c] sm:$0xe] }
 0x103   : > { %6551 = vmatpush3.bf16.msra.mxu0 %v6989_v0  ;;  %v8479_v1 = vrot.slane %v4159_v53, 4  ;;  %v8481_v4 = vrot.slane %v4162_v16, 5  ;;  %v4180_v0 = vshrl.u32 %v8421_v10, 16  ;;  %v9047_v44 = vcombine.low %v8208_v6, %v8217_v51  ;;  %v6998_v6 = vld [vmem:[%s8993_s1 + $0x230] sm:$0xff]   ;;  %v8503_v51 = vld [vmem:[%s7184_s20 + $0xc4] sm:$0xf] }
 0x104   : > { %6552 = vmatprep.subr.bf16.mxu0 %v6992_v31  ;;  %v8488_v59 = vrot.slane %v4167_v56, 4  ;;  %v8492_v49 = vrot.slane %v4176_v20, 5  ;;  %v4186_v12 = vshll.u32 %v8442_v27, 16  ;;  %v4155_v38 = vsel %vm7216_vm2, %v8459_v52, %v8386_v14  ;;  %v5875_v14 = vld [vmem:[%s7184_s20 + $0x60] sm:$0xe]  ;;  %v9048_v39 = vld [vmem:[#allocation3_spill] sm:$0xff] }
 0x105   : > { %6521 = vmatmul.mubr.bf16.gmra.mrb[8].mxu0 %v8259_v19  ;;  %v8490_v19 = vrot.slane %v4170_v8, 5  ;;  %v4191_v23 = vshrl.u32 %v5823_v54, 16  ;;  %v5889_v15 = vrot.slane %v5873_v41, 9  ;;  %v4654_v55 = vrot.slane %v8079_v32, 5  ;;  %v6990_v13 = vld [vmem:[%s7184_s20 + $0xc] sm:$0xff]   ;;  %v7001_v56 = vld [vmem:[%s8993_s1 + $0x238] sm:$0xff]  }
 0x106   : > { %6297 = vmatmul.mubr.bf16.gmra.mrb[24].mxu1 %v9047_v44  ;;  %6524 = vmatprep.mubr.bf16.mxu0 %v5851_v30  ;;  %v4194_v22 = vshll.u32 %v5823_v54, 16  ;;  %v4657_v57 = vrot.slane %v8127_v63, 5  ;;  %v5890_v40 = vrot.slane %v5874_v26, 9  ;;  %v4661_v60 = vrot.slane %v8091_v33, 5  ;;  %v9049_v16 = vld [vmem:[#allocation4_spill] sm:$0xff]  ;;  %v9051_v52 = vld [vmem:[#allocation6_spill] sm:$0xff] }
 0x107   : > { %6300 = vmatprep.mubr.bf16.mxu1 %v5467_v7  ;;  %6553 = vmatpush3.bf16.msra.mxu0 %v6992_v31  ;;  %v4165_v18 = vsel %vm7216_vm2, %v8479_v1, %v8481_v4  ;;  %v8513_v5 = vrot.slane %v4180_v0, 4  ;;  %v8517_v61 = vsel %vm7462_vm5, %v5889_v15, %v4654_v55  ;;  %v4656_v32 = vrot.slane %v4654_v55, 4  ;;  %v9052_v4 = vld [vmem:[#allocation7_spill] sm:$0xff] }
 0x108   : > { %6554 = vmatprep.subr.bf16.mxu0 %v6995_v2  ;;  %v4200_v31 = vshll.u32 %v8503_v51, 16  ;;  %v8523_v63 = vsel %vm7462_vm5, %v5890_v40, %v4661_v60  ;;  %v4663_v33 = vrot.slane %v4661_v60, 4  ;;  %v4664_v3 = vrot.slane %v9048_v39, 5  ;;  %v8554_v26 = vld [vmem:[%s7184_s20 + $0xc8] sm:$0x1]  ;;  %v6991_v40 = vld [vmem:[%s7184_s20 + $0x18] sm:$0xff]  }
 0x109   : > { %v8529_v45 = vsel %vm7462_vm5, %v4656_v32, %v4657_v57  ;;  %v5891_v53 = vrot.slane %v5875_v14, 9  ;;  %v4668_v46 = vrot.slane %v9049_v16, 5  ;;  %v4671_v30 = vrot.slane %v9050_v29, 5  ;;  %v6993_v39 = vld [vmem:[%s7184_s20 + $0x24] sm:$0xff]  }
 0x10a   : > { %v5921_v8 = vcombine.low %v8517_v61, %v8529_v45  ;;  %v8540_v20 = vsel %vm7462_vm5, %v4663_v33, %v4664_v3  ;;  %v5892_v7 = vrot.slane %v5876_v28, 9  ;;  %v4678_v0 = vrot.slane %v9052_v4, 5  ;;  %v9054_v28 = vld [vmem:[#allocation11_spill] sm:$0xff]  ;;  %v5582_v61 = vld [vmem:[%s7184_s20 + $0x90] sm:$0xf] }
 0x10b   : > { %6555 = vmatpush3.bf16.msra.mxu0 %v6995_v2  ;;  %v4675_v2 = vrot.slane %v9051_v52, 5  ;;  %v5922_v54 = vcombine.low %v8523_v63, %v8540_v20  ;;  %v8547_v41 = vsel %vm7462_vm5, %v5891_v53, %v4668_v46  ;;  %v4670_v1 = vrot.slane %v4668_v46, 4  ;;  %v9055_v53 = vld [vmem:[#allocation2_spill] sm:$0xff]  ;;  %v7007_v45 = vld [vmem:[%s7184_s20 + $0xa8] sm:$0xff]  }
 0x10c   : > { %6556 = vmatprep.subr.bf16.mxu0 %v6998_v6  ;;  %v8556_v44 = vrot.slane %v4191_v23, 4  ;;  %v8569_v36 = vcombine.low %v4131_v47, %v4141_v34  ;;  %v4173_v62 = vor.u32 %v8490_v19, %v8488_v59  ;;  %v5877_v23 = vld [vmem:[%s7184_s20 + $0x78] sm:$0xe]  ;;  %v8581_v57 = vrot.slane %v4186_v12, 5  ;;  %v5826_v12 = vld [vmem:[%s7184_s20 + $0xcc] sm:$0xf] }
 0x10d   : > { %6525 = vmatmul.mubr.bf16.gmra.mrb[12].mxu0 %v5852_v24  ;;  %v8558_v24 = vrot.slane %v4194_v22, 5  ;;  %v8562_v15 = vsel %vm7462_vm5, %v5892_v7, %v4675_v2  ;;  %v4677_v55 = vrot.slane %v4675_v2, 4  ;;  %v8579_v22 = vcombine.low %v4155_v38, %v4165_v18  ;;  %v5576_v47 = vld [vmem:[%s7184_s20 + $0x78] sm:$0xf]  ;;  %v9053_v18 = vld [vmem:[#allocation8_spill] sm:$0xff] }
 0x10e   : > { %6301 = vmatmul.mubr.bf16.gmra.mrb[28].mxu1 %v5468_v48  ;;  %6528 = vmatprep.mubr.bf16.mxu0 %v5853_v42  ;;  %v4204_v48 = vshrl.u32 %v8503_v51, 16  ;;  %v8576_v42 = vsel %vm7462_vm5, %v4670_v1, %v4671_v30  ;;  %v4183_v34 = vor.u32 %v8513_v5, %v8492_v49  ;;  %v8592_v59 = vrot.slane %v4200_v31, 5  ;;  %v8606_v31 = vld [vmem:[%s7184_s20 + $0xd0] sm:$0xf]  ;;  %v9056_v1 = vld [vmem:[#allocation9_spill] sm:$0xff] }
 0x10f   : > { %6320 = vmatprep.mubr.bf16.mxu1 %v6990_v13  ;;  %6557 = vmatpush3.bf16.msra.mxu0 %v6998_v6  ;;  %v5923_v17 = vcombine.low %v8547_v41, %v8576_v42  ;;  %v8587_v43 = vsel %vm7462_vm5, %v4677_v55, %v4678_v0  ;;  %v4210_v19 = vshll.u32 %v8554_v26, 16  ;;  %v5878_v6 = vld [vmem:[%s7184_s20 + $0x84] sm:$0xe]  ;;  %v4197_v60 = vor.u32 %v8558_v24, %v8556_v44  ;;  %v9057_v24 = vld [vmem:[#allocation12_spill] sm:$0xff]  ;;  %v7071_v63 = vld [vmem:[%s7184_s20 + $0x8c] sm:$0x1] }
 0x110   : > { %6558 = vmatprep.subr.bf16.mxu0 %v7001_v56  ;;  %v5924_v38 = vcombine.low %v8562_v15, %v8587_v43  ;;  %v5893_v14 = vrot.slane %v5877_v23, 9  ;;  %v4682_v32 = vrot.slane %v9053_v18, 5  ;;  %v4685_v33 = vrot.slane %v9054_v28, 5 }
 0x111   : > { %v4206_v5 = vrot.slane %v4204_v48, 4  ;;  %v2429_v3 = vshrl.u32 %v5576_v47, 16  ;;  %v2432_v13 = vshll.u32 %v5576_v47, 16  ;;  %v2451_v16 = vsel %vm7216_vm2, %v8391_v50, %v9055_v53 }
 0x112   : > { %v4215_v46 = vshrl.u32 %v5826_v12, 16  ;;  %v8614_v29 = vsel %vm7462_vm5, %v5893_v14, %v4682_v32  ;;  %v4684_v30 = vrot.slane %v4682_v32, 4  ;;  %v5894_v7 = vrot.slane %v5878_v6, 9  ;;  %v7051_v6 = vld [vmem:[%s8993_s1 + $0x108] sm:$0xff]  }
 0x113   : > { %6559 = vmatpush3.bf16.msra.mxu0 %v7001_v56  ;;  %v4218_v52 = vshll.u32 %v5826_v12, 16  ;;  %v2431_v2 = vrot.slane %v2429_v3, 4  ;;  %v2434_v56 = vrot.slane %v2432_v13, 5  ;;  %v4689_v4 = vrot.slane %v9056_v1, 5  ;;  %v5879_v12 = vld [vmem:[%s7184_s20 + $0x90] sm:$0xe] }
 0x114   : > { %v4224_v50 = vshll.u32 %v8606_v31, 16  ;;  %v4228_v0 = vshrl.u32 %v8606_v31, 16  ;;  %v8623_v44 = vsel %vm7462_vm5, %v4684_v30, %v4685_v33  ;;  %v4692_v55 = vrot.slane %v9057_v24, 5  ;;  %v6994_v3 = vld [vmem:[%s7184_s20 + $0x30] sm:$0xff]  }
 0x115   : > { %6529 = vmatmul.mubr.bf16.gmra.mrb[16].mxu0 %v8461_v58  ;;  %v9058_v58 = vld [vmem:[#allocation15_spill] sm:$0xff]  ;;  %v4207_v48 = vor.u32 %v4206_v5, %v8592_v59  ;;  %v2435_v23 = vor.u32 %v2434_v56, %v2431_v2  ;;  %v4691_v47 = vrot.slane %v4689_v4, 4  ;;  %v4184_v14 = vrot.slane %v4183_v34, 4  ;;  %v8644_v13 = vld [vmem:[%s7184_s20 + $0xd4] sm:$0x1]  ;;  %v9059_v2 = vld [vmem:[#allocation10_spill] sm:$0xff] }
 0x116   : > { %6321 = vmatmul.mubr.bf16.vlgmr.msra.gmra.mrb[0].mxu1 %v6991_v40  ;;  %6532 = vmatprep.mubr.bf16.mxu0 %v8463_v35  ;;  %v5925_v35 = vcombine.low %v8614_v29, %v8623_v44  ;;  %v4174_v40 = vrot.slane %v4173_v62, 4  ;;  %v4212_v18 = vrot.slane %v4210_v19, 5  ;;  %v8636_v32 = vsel %vm7462_vm5, %v5894_v7, %v4689_v4  ;;  %v6996_v19 = vld [vmem:[%s7184_s20 + $0x3c] sm:$0xff]   ;;  %v7052_v1 = vld [vmem:[%s8993_s1 + $0x110] sm:$0xff]  }
 0x117   : > { %6600 = vmatpush3.bf16.msra.mxu1 %v9058_v58  ;;  %6324 = vmatprep.mubr.bf16.mxu1 %v6993_v39  ;;  %v4217_v28 = vrot.slane %v4215_v46, 4  ;;  %v4220_v33 = vrot.slane %v4218_v52, 5  ;;  %v2436_v39 = vrot.slane %v2435_v23, 4  ;;  %v8640_v5 = vsel %vm7462_vm5, %v4691_v47, %v4692_v55  ;;  %v7053_v47 = vld [vmem:[%s7184_s20 + $0x1c] sm:$0xf] }
 0x118   : > { %6593 = vmatprep.subr.bf16.mxu1 %v7051_v6  ;;  %v8646_v53 = vrot.slane %v4224_v50, 5  ;;  %v4230_v30 = vrot.slane %v4228_v0, 4  ;;  %v5926_v62 = vcombine.low %v8636_v32, %v8640_v5  ;;  %v5895_v34 = vrot.slane %v5879_v12, 9 }
 0x119   : > { %v4198_v7 = vrot.slane %v4197_v60, 4  ;;  %v4208_v46 = vrot.slane %v4207_v48, 4  ;;  %v2441_v52 = vsel %vm7216_vm2, %v2436_v39, %v7792_v11  ;;  %v4696_v56 = vrot.slane %v9059_v2, 5  ;;  %v9060_v11 = vld [vmem:[#allocation14_spill] sm:$0xff]  ;;  %v6997_v39 = vld [vmem:[%s7184_s20 + $0x48] sm:$0xff]  }
 0x11a   : > { %v4179_v4 = vsel %vm7216_vm2, %v4174_v40, %v8492_v49  ;;  %v4189_v60 = vsel %vm7216_vm2, %v4184_v14, %v8581_v57  ;;  %v8664_v50 = vcombine.low %v2441_v52, %v2451_v16  ;;  %v4699_v0 = vrot.slane %v9060_v11, 5  ;;  %v5869_v57 = vld [vmem:[%s7184_s20 + $0x18] sm:$0xe]  ;;  %v5880_v16 = vld [vmem:[%s7184_s20 + $0x9c] sm:$0xe] }
 0x11b   : > { %6601 = vmatpush3.bf16.msra.mxu1 %v7051_v6  ;;  %v4221_v24 = vor.u32 %v4220_v33, %v4217_v28  ;;  %v4234_v55 = vshll.u32 %v8644_v13, 16  ;;  %v8671_v58 = vsel %vm7462_vm5, %v5895_v34, %v4696_v56  ;;  %v4698_v48 = vrot.slane %v4696_v56, 4  ;;  %v7054_v40 = vld [vmem:[%s8993_s1 + $0x118] sm:$0xff]   ;;  %v7055_v2 = vld [vmem:[%s7184_s20 + $0x20] sm:$0x1] }
 0x11c   : > { %6594 = vmatprep.subr.bf16.mxu1 %v7052_v1  ;;  %v4231_v49 = vor.u32 %v4230_v30, %v8646_v53  ;;  %v4213_v23 = vsel %vm7216_vm2, %v4208_v46, %v4212_v18  ;;  %v4626_v12 = vrot.slane %v7053_v47, 5  ;;  %v5858_v6 = vcombine.low %v4179_v4, %v4189_v60  ;;  %v9061_v34 = vld [vmem:[#allocation13_spill] sm:$0xff]  ;;  %v5881_v11 = vld [vmem:[%s7184_s20 + $0xa8] sm:$0xe] }
 0x11d   : > { %6533 = vmatmul.mubr.bf16.gmra.mrb[20].mxu0 %v8569_v36  ;;  %v4203_v36 = vsel %vm7216_vm2, %v4198_v7, %v8592_v59  ;;  %v4222_v14 = vrot.slane %v4221_v24, 4  ;;  %v4236_v28 = vrot.slane %v4234_v55, 5  ;;  %v5885_v18 = vrot.slane %v5869_v57, 9  ;;  %v6999_v46 = vld [vmem:[%s7184_s20 + $0x54] sm:$0xff]   ;;  %v5870_v55 = vld [vmem:[%s7184_s20 + $0x24] sm:$0xe] }
 0x11e   : > { %6325 = vmatmul.mubr.bf16.gmra.mrb[4].mxu1 %v6994_v3  ;;  %6536 = vmatprep.mubr.bf16.mxu0 %v8579_v22  ;;  %v8685_v22 = vsel %vm7462_vm5, %v4698_v48, %v4699_v0  ;;  %v5896_v33 = vrot.slane %v5880_v16, 9  ;;  %v5859_v3 = vcombine.low %v4203_v36, %v4213_v23  ;;  %v4232_v30 = vrot.slane %v4231_v49, 4  ;;  %v7057_v48 = vld [vmem:[%s7184_s20 + $0x28] sm:$0xf]  ;;  %v7058_v36 = vld [vmem:[%s7184_s20 + $0x34] sm:$0xf] }
 0x11f   : > { %6328 = vmatprep.mubr.bf16.mxu1 %v6996_v19  ;;  %6602 = vmatpush3.bf16.msra.mxu1 %v7052_v1  ;;  %v5927_v59 = vcombine.low %v8671_v58, %v8685_v22  ;;  %v4703_v19 = vrot.slane %v9061_v34, 5  ;;  %v4706_v7 = vrot.slane %v8374_v25, 5  ;;  %v4628_v52 = vrot.slane %v4626_v12, 4  ;;  %v7056_v1 = vld [vmem:[%s8993_s1 + $0x120] sm:$0xff]  }
 0x120   : > { %6595 = vmatprep.subr.bf16.mxu1 %v7054_v40  ;;  %v4629_v56 = vrot.slane %v7055_v2, 5  ;;  %v4627_v25 = vsel %vm7462_vm5, %v5885_v18, %v4626_v12  ;;  %v4227_v0 = vsel %vm7216_vm2, %v4222_v14, %v8646_v53  ;;  %v4237_v24 = vsel %vm7216_vm2, %v4232_v30, %v4236_v28  ;;  %v5871_v12 = vld [vmem:[%s7184_s20 + $0x30] sm:$0xe]  ;;  %v7000_v30 = vld [vmem:[%s7184_s20 + $0x60] sm:$0xff]  }
 0x121   : > { %v8702_v4 = vsel %vm7462_vm5, %v5896_v33, %v4703_v19  ;;  %v4705_v60 = vrot.slane %v4703_v19, 4  ;;  %v4633_v49 = vrot.slane %v7057_v48, 5  ;;  %v4640_v23 = vrot.slane %v7058_v36, 5  ;;  %v7060_v33 = vld [vmem:[%s7184_s20 + $0x2c] sm:$0x1] }
 0x122   : > { %v4630_v16 = vsel %vm7462_vm5, %v4628_v52, %v4629_v56  ;;  %v5897_v47 = vrot.slane %v5881_v11, 9  ;;  %v5860_v28 = vcombine.low %v4227_v0, %v4237_v24  ;;  %v5886_v18 = vrot.slane %v5870_v55, 9  ;;  %v7002_v52 = vld [vmem:[%s7184_s20 + $0x6c] sm:$0xff]   ;;  %v5882_v11 = vld [vmem:[%s7184_s20 + $0xb4] sm:$0xe] }
 0x123   : > { %6603 = vmatpush3.bf16.msra.mxu1 %v7054_v40  ;;  %v8716_v57 = vsel %vm7462_vm5, %v4705_v60, %v4706_v7  ;;  %v9062_v40 = vld [vmem:[#allocation16_spill] sm:$0xff]  ;;  %v5917_v34 = vcombine.low %v4627_v25, %v4630_v16  ;;  %v4635_v19 = vrot.slane %v4633_v49, 4  ;;  %v5887_v2 = vrot.slane %v5871_v12, 9  ;;  %v5872_v0 = vld [vmem:[%s7184_s20 + $0x3c] sm:$0xe] }
 0x124   : > { %6596 = vmatprep.subr.bf16.mxu1 %v7056_v1  ;;  %v5928_v53 = vcombine.low %v8702_v4, %v8716_v57  ;;  %v4710_v14 = vrot.slane %v9062_v40, 5  ;;  %v4642_v56 = vrot.slane %v4640_v23, 4  ;;  %v7062_v24 = vld [vmem:[%s7184_s20 + $0x40] sm:$0xf]  ;;  %v4634_v48 = vsel %vm7462_vm5, %v5886_v18, %v4633_v49  ;;  %v7064_v18 = vld [vmem:[%s7184_s20 + $0x44] sm:$0x1] }
 0x125   : > { %6537 = vmatmul.mubr.bf16.gmra.mrb[24].mxu0 %v5858_v6  ;;  %v7059_v6 = vld [vmem:[%s8993_s1 + $0x128] sm:$0xff]   ;;  %v4647_v55 = vrot.slane %v7062_v24, 5  ;;  %v4717_v12 = vrot.slane %v8421_v10, 5  ;;  %v4641_v49 = vsel %vm7462_vm5, %v5887_v2, %v4640_v23  ;;  %v7065_v10 = vld [vmem:[%s8993_s1 + $0x138] sm:$0xff]   ;;  %v5883_v23 = vld [vmem:[%s7184_s20 + $0xc0] sm:$0xe] }
 0x126   : > { %6329 = vmatmul.mubr.bf16.gmra.mrb[8].mxu1 %v6997_v39  ;;  %6540 = vmatprep.mubr.bf16.mxu0 %v5859_v3  ;;  %v4636_v39 = vrot.slane %v7060_v33, 5  ;;  %v4713_v3 = vrot.slane %v8409_v21, 5  ;;  %v8733_v7 = vsel %vm7462_vm5, %v5897_v47, %v4710_v14  ;;  %v7063_v21 = vld [vmem:[%s8993_s1 + $0x130] sm:$0xff]   ;;  %v5898_v47 = vrot.slane %v5882_v11, 9 }
 0x127   : > { %6332 = vmatprep.mubr.bf16.mxu1 %v6999_v46  ;;  %6604 = vmatpush3.bf16.msra.mxu1 %v7056_v1  ;;  %v4712_v46 = vrot.slane %v4710_v14, 4  ;;  %v7061_v1 = vld [vmem:[%s7184_s20 + $0x38] sm:$0x1]  ;;  %v5888_v14 = vrot.slane %v5872_v0, 9  ;;  %v4650_v33 = vrot.slane %v7064_v18, 5  ;;  %v4724_v11 = vrot.slane %v8503_v51, 5 }
 0x128   : > { %6597 = vmatprep.subr.bf16.mxu1 %v7059_v6  ;;  %v4643_v60 = vrot.slane %v7061_v1, 5  ;;  %v4637_v36 = vsel %vm7462_vm5, %v4635_v19, %v4636_v39  ;;  %v4719_v39 = vrot.slane %v4717_v12, 4  ;;  %v5573_v19 = vld [vmem:[%s7184_s20 + $0x6c] sm:$0xf]  ;;  %v7005_v18 = vld [vmem:[%s7184_s20 + $0x90] sm:$0xff]   ;;  %v2472_v20 = vshll.u32 %v7071_v63, 16 }
 0x129   : > { %v8745_v25 = vsel %vm7462_vm5, %v4712_v46, %v4713_v3  ;;  %v5918_v3 = vcombine.low %v4634_v48, %v4637_v36  ;;  %v4648_v1 = vsel %vm7462_vm5, %v5888_v14, %v4647_v55  ;;  %v2405_v0 = vshrl.u32 %v5573_v19, 16  ;;  %v5884_v51 = vld [vmem:[%s7184_s20 + $0xcc] sm:$0xe] }
 0x12a   : > { %v5929_v16 = vcombine.low %v8733_v7, %v8745_v25  ;;  %v4644_v40 = vsel %vm7462_vm5, %v4642_v56, %v4643_v60  ;;  %v5899_v56 = vrot.slane %v5883_v23, 9  ;;  %v2408_v24 = vshll.u32 %v5573_v19, 16 }
 0x12b   : > { %6605 = vmatpush3.bf16.msra.mxu1 %v7059_v6  ;;  %v4720_v6 = vrot.slane %v8442_v27, 5  ;;  %v8765_v27 = vsel %vm7462_vm5, %v5898_v47, %v4717_v12  ;;  %v4727_v36 = vrot.slane %v8554_v26, 5  ;;  %v4726_v12 = vrot.slane %v4724_v11, 4 }
 0x12c   : > { %6598 = vmatprep.subr.bf16.mxu1 %v7063_v21  ;;  %v2410_v26 = vrot.slane %v2408_v24, 5  ;;  %v4734_v23 = vrot.slane %v8644_v13, 5 }
 0x12d   : > { %6541 = vmatmul.mubr.bf16.gmra.mrb[28].mxu0 %v5860_v28  ;;  %v4649_v28 = vrot.slane %v4647_v55, 4  ;;  %v8772_v46 = vsel %vm7462_vm5, %v4719_v39, %v4720_v6  ;;  %v8786_v55 = vsel %vm7462_vm5, %v5899_v56, %v4724_v11  ;;  %v4731_v39 = vrot.slane %v8606_v31, 5  ;;  %v7067_v56 = vld [vmem:[%s7184_s20 + $0x74] sm:$0x1] }
 0x12e   : > { %6333 = vmatmul.mubr.bf16.gmra.mrb[12].mxu1 %v7000_v30  ;;  %6560 = vmatprep.mubr.bf16.mxu0 %v5917_v34  ;;  %v7003_v30 = vld [vmem:[%s7184_s20 + $0x78] sm:$0xff]   ;;  %v5919_v34 = vcombine.low %v4641_v49, %v4644_v40  ;;  %v5930_v2 = vcombine.low %v8765_v27, %v8772_v46  ;;  %v8791_v49 = vsel %vm7462_vm5, %v4726_v12, %v4727_v36  ;;  %v2407_v40 = vrot.slane %v2405_v0, 4  ;;  %v7068_v0 = vld [vmem:[%s7184_s20 + $0x88] sm:$0xf] }
 0x12f   : > { %6336 = vmatprep.mubr.bf16.mxu1 %v7002_v52  ;;  %6606 = vmatpush3.bf16.msra.mxu1 %v7063_v21  ;;  %v7004_v52 = vld [vmem:[%s7184_s20 + $0x84] sm:$0xff]   ;;  %v4651_v60 = vsel %vm7462_vm5, %v4649_v28, %v4650_v33  ;;  %v7066_v21 = vld [vmem:[%s7184_s20 + $0x70] sm:$0xf]  ;;  %v5931_v28 = vcombine.low %v8786_v55, %v8791_v49  ;;  %v4733_v19 = vrot.slane %v4731_v39, 4  ;;  %v2462_v24 = vshll.u32 %v7068_v0, 16 }
 0x130   : > { %6599 = vmatprep.subr.bf16.mxu1 %v7065_v10  ;;  %v2414_v48 = vshll.u32 %v7066_v21, 16  ;;  %v2418_v47 = vshrl.u32 %v7066_v21, 16  ;;  %v5920_v6 = vcombine.low %v4648_v1, %v4651_v60  ;;  %v2424_v1 = vshll.u32 %v7067_v56, 16 }
 0x131   : > { %v8813_v11 = vsel %vm7462_vm5, %v4733_v19, %v4734_v23  ;;  %v2466_v21 = vshrl.u32 %v7068_v0, 16  ;;  %v7070_v19 = vld [vmem:[%s7184_s20 + $0xa0] sm:$0xf] }
 0x132   : > { %v8793_v14 = vrot.slane %v2414_v48, 5  ;;  %v2420_v33 = vrot.slane %v2418_v47, 4  ;;  %v2514_v56 = vshrl.u32 %v7070_v19, 16 }
 0x133   : > { %6607 = vmatpush3.bf16.msra.mxu1 %v7065_v10  ;;  %v5900_v10 = vrot.slane %v5884_v51, 9 }
 0x134   : > { %v2421_v31 = vor.u32 %v2420_v33, %v8793_v14  ;;  %v2480_v33 = vshll.u32 %v5582_v61, 16 }
 0x135   : > { %6561 = vmatmul.mubr.bf16.vlgmr.msra.gmra.mrb[0].mxu0 %v5918_v3  ;;  %v7006_v3 = vld [vmem:[%s7184_s20 + $0x9c] sm:$0xff]  }
 0x136   : > { %6337 = vmatmul.mubr.bf16.gmra.mrb[16].mxu1 %v7003_v30  ;;  %6564 = vmatprep.mubr.bf16.mxu0 %v5919_v34  ;;  %v5579_v30 = vld [vmem:[%s7184_s20 + $0x84] sm:$0xf]  ;;  %v8804_v34 = vsel %vm7462_vm5, %v5900_v10, %v4731_v39  ;;  %v2422_v47 = vrot.slane %v2421_v31, 4  ;;  %v7069_v10 = vld [vmem:[%s7184_s20 + $0x94] sm:$0xf]  ;;  %v2482_v0 = vrot.slane %v2480_v33, 5 }
 0x137   : > { %6340 = vmatprep.mubr.bf16.mxu1 %v7004_v52  ;;  %v2411_v52 = vor.u32 %v2410_v26, %v2407_v40  ;;  %v2453_v13 = vshrl.u32 %v5579_v30, 16  ;;  %v2456_v60 = vshll.u32 %v5579_v30, 16  ;;  %v5932_v48 = vcombine.low %v8804_v34, %v8813_v11 }
 0x138   : > { %v8822_v40 = vrot.slane %v2462_v24, 5  ;;  %v2468_v26 = vrot.slane %v2466_v21, 4  ;;  %v2486_v39 = vshll.u32 %v7069_v10, 16  ;;  %v2490_v23 = vshrl.u32 %v7069_v10, 16  ;;  %v7073_v10 = vld [vmem:[%s7184_s20 + $0xa4] sm:$0x1] }
 0x139   : > { %v2412_v36 = vrot.slane %v2411_v52, 4  ;;  %v2455_v12 = vrot.slane %v2453_v13, 4  ;;  %v2458_v51 = vrot.slane %v2456_v60, 5  ;;  %v2510_v52 = vshll.u32 %v7070_v19, 16  ;;  %v7074_v19 = vld [vmem:[%s7184_s20 + $0xac] sm:$0xf] }
 0x13a   : > { %v2469_v13 = vor.u32 %v2468_v26, %v8822_v40  ;;  %v8839_v41 = vrot.slane %v2486_v39, 5  ;;  %v2492_v42 = vrot.slane %v2490_v23, 4  ;;  %v2516_v21 = vrot.slane %v2514_v56, 4  ;;  %v5591_v23 = vld [vmem:[%s7184_s20 + $0xb4] sm:$0xf] }
 0x13b   : > { %v2520_v39 = vshll.u32 %v7073_v10, 16  ;;  %v2538_v15 = vshrl.u32 %v7074_v19, 16  ;;  %v2552_v63 = vshll.u32 %v5591_v23, 16 }
 0x13c   : > { %v2493_v26 = vor.u32 %v2492_v42, %v8839_v41 }
 0x13d   : > { %6565 = vmatmul.mubr.bf16.gmra.mrb[4].mxu0 %v5920_v6  ;;  %v5585_v6 = vld [vmem:[%s7184_s20 + $0x9c] sm:$0xf] }
 0x13e   : > { %6341 = vmatmul.mubr.bf16.gmra.mrb[20].mxu1 %v7005_v18  ;;  %6568 = vmatprep.mubr.bf16.mxu0 %v5921_v8  ;;  %v2426_v8 = vrot.slane %v2424_v1, 5  ;;  %v2477_v18 = vshrl.u32 %v5582_v61, 16  ;;  %v2504_v30 = vshll.u32 %v5585_v6, 16  ;;  %v2417_v1 = vsel %vm7216_vm2, %v2412_v36, %v8793_v14  ;;  %v7009_v61 = vld [vmem:[%s7184_s20 + $0xc0] sm:$0xff]  }
 0x13f   : > { %6344 = vmatprep.mubr.bf16.mxu1 %v7006_v3  ;;  %v2501_v3 = vshrl.u32 %v5585_v6, 16  ;;  %v8841_v14 = vrot.slane %v2510_v52, 5  ;;  %v2534_v52 = vshll.u32 %v7074_v19, 16 }
 0x140   : > { %v2427_v31 = vsel %vm7216_vm2, %v2422_v47, %v2426_v8  ;;  %v2479_v60 = vrot.slane %v2477_v18, 4  ;;  %v2506_v24 = vrot.slane %v2504_v30, 5  ;;  %v2474_v8 = vrot.slane %v2472_v20, 5  ;;  %v7075_v20 = vld [vmem:[%s7184_s20 + $0xb8] sm:$0xf] }
 0x141   : > { %v2470_v47 = vrot.slane %v2469_v13, 4  ;;  %v2517_v33 = vor.u32 %v2516_v21, %v8841_v14  ;;  %v2558_v29 = vshll.u32 %v7075_v20, 16  ;;  %v2562_v44 = vshrl.u32 %v7075_v20, 16 }
 0x143   : > { %v2518_v13 = vrot.slane %v2517_v33, 4 }
 0x145   : > { %6569 = vmatmul.mubr.bf16.gmra.mrb[8].mxu0 %v5922_v54  ;;  %v2459_v54 = vor.u32 %v2458_v51, %v2455_v12  ;;  %v2483_v12 = vor.u32 %v2482_v0, %v2479_v60  ;;  %v7072_v51 = vld [vmem:[%s7184_s20 + $0x98] sm:$0x1]  ;;  %v2522_v60 = vrot.slane %v2520_v39, 5 }
 0x146   : > { %6345 = vmatmul.mubr.bf16.gmra.mrb[24].mxu1 %v7007_v45  ;;  %6572 = vmatprep.mubr.bf16.mxu0 %v5923_v17  ;;  %v2503_v17 = vrot.slane %v2501_v3, 4  ;;  %v5621_v45 = vcombine.low %v2417_v1, %v2427_v31  ;;  %v2496_v6 = vshll.u32 %v7072_v51, 16  ;;  %v2549_v31 = vshrl.u32 %v5591_v23, 16 }
 0x147   : > { %6348 = vmatprep.mubr.bf16.mxu1 %v7008_v9  ;;  %v2460_v36 = vrot.slane %v2459_v54, 4  ;;  %v5588_v9 = vld [vmem:[%s7184_s20 + $0xa8] sm:$0xf]  ;;  %v2484_v56 = vrot.slane %v2483_v12, 4  ;;  %v2523_v32 = vsel %vm7216_vm2, %v2518_v13, %v2522_v60 }
 0x148   : > { %v2507_v18 = vor.u32 %v2506_v24, %v2503_v17  ;;  %v2525_v3 = vshrl.u32 %v5588_v9, 16  ;;  %v2528_v30 = vshll.u32 %v5588_v9, 16  ;;  %v2498_v1 = vrot.slane %v2496_v6, 5 }
 0x149   : > { %v2465_v43 = vsel %vm7216_vm2, %v2460_v36, %v8822_v40  ;;  %v2536_v17 = vrot.slane %v2534_v52, 5  ;;  %v2540_v24 = vrot.slane %v2538_v15, 4  ;;  %v2551_v21 = vrot.slane %v2549_v31, 4  ;;  %v5594_v36 = vld [vmem:[%s7184_s20 + $0xc0] sm:$0xf] }
 0x14a   : > { %v2508_v54 = vrot.slane %v2507_v18, 4  ;;  %v2527_v0 = vrot.slane %v2525_v3, 4  ;;  %v2530_v42 = vrot.slane %v2528_v30, 5  ;;  %v2573_v9 = vshrl.u32 %v5594_v36, 16  ;;  %v7077_v18 = vld [vmem:[%s7184_s20 + $0xc4] sm:$0xf] }
 0x14b   : > { %v2582_v33 = vshll.u32 %v7077_v18, 16 }
 0x14c   : > { %v2513_v51 = vsel %vm7216_vm2, %v2508_v54, %v8841_v14  ;;  %v2531_v5 = vor.u32 %v2530_v42, %v2527_v0  ;;  %v2586_v14 = vshrl.u32 %v7077_v18, 16  ;;  %v2575_v19 = vrot.slane %v2573_v9, 4 }
 0x14d   : > { %6573 = vmatmul.mubr.bf16.gmra.mrb[12].mxu0 %v5924_v38  ;;  %v2475_v38 = vsel %vm7216_vm2, %v2470_v47, %v2474_v8  ;;  %v2564_v8 = vrot.slane %v2562_v44, 4  ;;  %v2489_v47 = vsel %vm7216_vm2, %v2484_v56, %v8839_v41  ;;  %v7076_v41 = vld [vmem:[%s7184_s20 + $0xb0] sm:$0x1]  ;;  %v5625_v58 = vcombine.low %v2513_v51, %v2523_v32  ;;  %v7079_v44 = vld [vmem:[%s7184_s20 + $0xc8] sm:$0x1] }
 0x14e   : > { %6349 = vmatmul.mubr.bf16.gmra.mrb[28].mxu1 %v7009_v61  ;;  %6576 = vmatprep.mubr.bf16.mxu0 %v5925_v35  ;;  %v2494_v35 = vrot.slane %v2493_v26, 4  ;;  %v5623_v40 = vcombine.low %v2465_v43, %v2475_v38  ;;  %v2554_v61 = vrot.slane %v2552_v63, 5  ;;  %v2544_v6 = vshll.u32 %v7076_v41, 16 }
 0x14f   : > { %6384 = vmatprep.mubr.bf16.mxu1 %v5621_v45  ;;  %v2560_v45 = vrot.slane %v2558_v29, 5  ;;  %v2576_v26 = vshll.u32 %v5594_v36, 16  ;;  %v2532_v22 = vrot.slane %v2531_v5, 4  ;;  %v2584_v15 = vrot.slane %v2582_v33, 5 }
 0x150   : > { %v2499_v12 = vsel %vm7216_vm2, %v2494_v35, %v2498_v1  ;;  %v2555_v10 = vor.u32 %v2554_v61, %v2551_v21  ;;  %v2546_v30 = vrot.slane %v2544_v6, 5  ;;  %v2588_v43 = vrot.slane %v2586_v14, 4 }
 0x151   : > { %v2565_v39 = vor.u32 %v2564_v8, %v2560_v45  ;;  %v5624_v3 = vcombine.low %v2489_v47, %v2499_v12  ;;  %v2578_v52 = vrot.slane %v2576_v26, 5  ;;  %v2537_v31 = vsel %vm7216_vm2, %v2532_v22, %v2536_v17 }
 0x152   : > { %v2556_v38 = vrot.slane %v2555_v10, 4  ;;  %v2589_v29 = vor.u32 %v2588_v43, %v2584_v15  ;;  %v2592_v35 = vshll.u32 %v7079_v44, 16 }
 0x153   : > { %v2566_v56 = vrot.slane %v2565_v39, 4  ;;  %v2579_v20 = vor.u32 %v2578_v52, %v2575_v19 }
 0x154   : > { %v2561_v4 = vsel %vm7216_vm2, %v2556_v38, %v2560_v45  ;;  %v2594_v54 = vrot.slane %v2592_v35, 5 }
 0x155   : > { %6577 = vmatmul.mubr.bf16.gmra.mrb[16].mxu0 %v5926_v62  ;;  %v2541_v62 = vor.u32 %v2540_v24, %v2536_v17  ;;  %v2580_v25 = vrot.slane %v2579_v20, 4 }
 0x156   : > { %6385 = vmatmul.mubr.bf16.vlgmr.msra.gmra.mrb[16].mxu1 %v8664_v50  ;;  %6580 = vmatprep.mubr.bf16.mxu0 %v5927_v59  ;;  %v7078_v50 = vld [vmem:[%s7184_s20 + $0xbc] sm:$0x1] }
 0x157   : > { %6388 = vmatprep.mubr.bf16.mxu1 %v5623_v40  ;;  %v2568_v23 = vshll.u32 %v7078_v50, 16  ;;  %v2542_v59 = vrot.slane %v2541_v62, 4  ;;  %v2585_v13 = vsel %vm7216_vm2, %v2580_v25, %v2584_v15 }
 0x159   : > { %v2570_v1 = vrot.slane %v2568_v23, 5  ;;  %v2547_v63 = vsel %vm7216_vm2, %v2542_v59, %v2546_v30 }
 0x15b   : > { %v2571_v57 = vsel %vm7216_vm2, %v2566_v56, %v2570_v1 }
 0x15c   : > { %v5627_v7 = vcombine.low %v2561_v4, %v2571_v57 }
 0x15d   : > { %6581 = vmatmul.mubr.bf16.gmra.mrb[20].mxu0 %v5928_v53  ;;  %v5626_v53 = vcombine.low %v2537_v31, %v2547_v63 }
 0x15e   : > { %6389 = vmatmul.mubr.bf16.gmra.mrb[20].mxu1 %v5624_v3  ;;  %6584 = vmatprep.mubr.bf16.mxu0 %v5929_v16  ;;  %v2590_v16 = vrot.slane %v2589_v29, 4 }
 0x15f   : > { %6392 = vmatprep.mubr.bf16.mxu1 %v5625_v58 }
 0x160   : > { %v2595_v60 = vsel %vm7216_vm2, %v2590_v16, %v2594_v54 }
 0x161   : > { %v5628_v0 = vcombine.low %v2585_v13, %v2595_v60 }
 0x165   : > { %6585 = vmatmul.mubr.bf16.gmra.mrb[24].mxu0 %v5930_v2 }
 0x166   : > { %6393 = vmatmul.mubr.bf16.gmra.mrb[24].mxu1 %v5626_v53  ;;  %6588 = vmatprep.mubr.bf16.mxu0 %v5931_v28 }
 0x167   : > { %6396 = vmatprep.mubr.bf16.mxu1 %v5627_v7 }
 0x16d   : > { %6589 = vmatmul.mubr.bf16.gmra.mrb[28].mxu0 %v5932_v48 }
 0x16e   : > { %6397 = vmatmul.mubr.bf16.gmra.mrb[28].mxu1 %v5628_v0 }
 0x1e9   : > { %v6322_v27 = vpop.f32.mrb[0].mxu1 }
 0x1ea   : > { %v2005_v46 = vpop.f32.mrb[1].mxu1 }
 0x1eb   : > { %v6323_v2 = vpop.f32.mrb[2].mxu1 }
 0x1ec   : > { %v2008_v55 = vpop.f32.mrb[3].mxu1 }
 0x1f1   : > { %v6326_v49 = vpop.f32.mrb[4].mxu1 }
 0x1f2   : > { %v2021_v28 = vpop.f32.mrb[5].mxu1 }
 0x1f3   : > { %v6327_v34 = vpop.f32.mrb[6].mxu1 }
 0x1f4   : > { %v2024_v11 = vpop.f32.mrb[7].mxu1 }
 0x1f9   : > { %v6330_v48 = vpop.f32.mrb[8].mxu1 }
 0x1fa   : > { %v2037_v42 = vpop.f32.mrb[9].mxu1 }
 0x1fb   : > { %v6331_v17 = vpop.f32.mrb[10].mxu1 }
 0x1fc   : > { %v8926_v24 = vpop.f32.mrb[11].mxu1 }
 0x201   : > { %v8928_v40 = vpop.f32.mrb[12].mxu1 }
 0x202   : > { %v8930_v21 = vpop.f32.mrb[13].mxu1 }
 0x203   : > { %v8932_v61 = vpop.f32.mrb[14].mxu1 }
 0x204   : > { %v8934_v45 = vpop.f32.mrb[15].mxu1 }
 0x208   : > { %v6562_v8 = vpop.f32.mrb[0].mxu0 }
 0x209   : > { %v6608_v36 = vadd.f32 %v6562_v8, %v6322_v27  ;;  %v4899_v47 = vpop.f32.mrb[1].mxu0 }
 0x20a   : > { %v6609_v12 = vadd.f32 %v4899_v47, %v2005_v46  ;;  %v6563_v51 = vpop.f32.mrb[2].mxu0 }
 0x20b   : > { %5060 = vst [vmem:[%s8940_s22 + $0x10] sm:$0xff] %v6608_v36  ;;  %v6610_v32 = vadd.f32 %v6563_v51, %v6323_v2  ;;  %v4902_v5 = vpop.f32.mrb[3].mxu0  ;;  %v5139_v26 = vmul.f32 %v6608_v36, %v6608_v36 }
 0x20c   : > { %5058 = vst [vmem:[%s8940_s22] sm:$0xff] %v6609_v12  ;;  %v6611_v62 = vadd.f32 %v4902_v5, %v2008_v55  ;;  %v5137_v41 = vmul.f32 %v6609_v12, %v6609_v12 }
 0x20d   : > { %5061 = vst [vmem:[%s8940_s22 + $0x18] sm:$0xff] %v6610_v32  ;;  %v5140_v50 = vmul.f32 %v6610_v32, %v6610_v32 }
 0x20e   : > { %5059 = vst [vmem:[%s8940_s22 + $0x8] sm:$0xff] %v6611_v62  ;;  %v5097_v6 = vadd.f32 %v6611_v62, %v6609_v12  ;;  %v5138_v9 = vmul.f32 %v6611_v62, %v6611_v62 }
 0x210   : > { %v5098_v18 = vadd.f32 %v6608_v36, %v5097_v6  ;;  %v5169_v33 = vadd.f32 %v5138_v9, %v5137_v41  ;;  %v6566_v14 = vpop.f32.mrb[4].mxu0 }
 0x211   : > { %v6612_v10 = vadd.f32 %v6566_v14, %v6326_v49  ;;  %v4915_v39 = vpop.f32.mrb[5].mxu0 }
 0x212   : > { %v5170_v23 = vadd.f32 %v5169_v33, %v5139_v26  ;;  %v6613_v3 = vadd.f32 %v4915_v39, %v2021_v28  ;;  %v5099_v58 = vadd.f32 %v6610_v32, %v5098_v18  ;;  %v6567_v22 = vpop.f32.mrb[6].mxu0 }
 0x213   : > { %5064 = vst [vmem:[%s8940_s22 + $0x30] sm:$0xff] %v6612_v10  ;;  %v6614_v59 = vadd.f32 %v6567_v22, %v6327_v34  ;;  %v4918_v30 = vpop.f32.mrb[7].mxu0  ;;  %v5143_v31 = vmul.f32 %v6612_v10, %v6612_v10 }
 0x214   : > { %5062 = vst [vmem:[%s8940_s22 + $0x20] sm:$0xff] %v6613_v3  ;;  %v5100_v19 = vadd.f32 %v6613_v3, %v5099_v58  ;;  %v5141_v52 = vmul.f32 %v6613_v3, %v6613_v3  ;;  %v5171_v15 = vadd.f32 %v5170_v23, %v5140_v50  ;;  %v6615_v43 = vadd.f32 %v4918_v30, %v2024_v11 }
 0x215   : > { %5065 = vst [vmem:[%s8940_s22 + $0x38] sm:$0xff] %v6614_v59  ;;  %v5144_v4 = vmul.f32 %v6614_v59, %v6614_v59 }
 0x216   : > { %v5172_v38 = vadd.f32 %v5171_v15, %v5141_v52  ;;  %5063 = vst [vmem:[%s8940_s22 + $0x28] sm:$0xff] %v6615_v43  ;;  %v5101_v56 = vadd.f32 %v6615_v43, %v5100_v19  ;;  %v5142_v1 = vmul.f32 %v6615_v43, %v6615_v43 }
 0x218   : > { %v5102_v63 = vadd.f32 %v6612_v10, %v5101_v56  ;;  %v5173_v20 = vadd.f32 %v5172_v38, %v5142_v1  ;;  %v6570_v29 = vpop.f32.mrb[8].mxu0 }
 0x219   : > { %v6616_v44 = vadd.f32 %v6570_v29, %v6330_v48  ;;  %v4931_v35 = vpop.f32.mrb[9].mxu0 }
 0x21a   : > { %v5174_v57 = vadd.f32 %v5173_v20, %v5143_v31  ;;  %v6617_v53 = vadd.f32 %v4931_v35, %v2037_v42  ;;  %v5103_v7 = vadd.f32 %v6614_v59, %v5102_v63  ;;  %v6571_v25 = vpop.f32.mrb[10].mxu0 }
 0x21b   : > { %5068 = vst [vmem:[%s8940_s22 + $0x50] sm:$0xff] %v6616_v44  ;;  %v6618_v16 = vadd.f32 %v6571_v25, %v6331_v17  ;;  %v4934_v54 = vpop.f32.mrb[11].mxu0  ;;  %v5147_v55 = vmul.f32 %v6616_v44, %v6616_v44 }
 0x21c   : > { %5066 = vst [vmem:[%s8940_s22 + $0x40] sm:$0xff] %v6617_v53  ;;  %v5104_v13 = vadd.f32 %v6617_v53, %v5103_v7  ;;  %v5145_v60 = vmul.f32 %v6617_v53, %v6617_v53  ;;  %v5175_v0 = vadd.f32 %v5174_v57, %v5144_v4  ;;  %v6619_v37 = vadd.f32 %v4934_v54, %v8926_v24 }
 0x21d   : > { %5069 = vst [vmem:[%s8940_s22 + $0x58] sm:$0xff] %v6618_v16  ;;  %v5148_v42 = vmul.f32 %v6618_v16, %v6618_v16 }
 0x21e   : > { %v5176_v27 = vadd.f32 %v5175_v0, %v5145_v60  ;;  %5067 = vst [vmem:[%s8940_s22 + $0x48] sm:$0xff] %v6619_v37  ;;  %v5105_v46 = vadd.f32 %v6619_v37, %v5104_v13  ;;  %v5146_v2 = vmul.f32 %v6619_v37, %v6619_v37 }
 0x220   : > { %v5106_v49 = vadd.f32 %v6616_v44, %v5105_v46  ;;  %v5177_v28 = vadd.f32 %v5176_v27, %v5146_v2  ;;  %v6574_v34 = vpop.f32.mrb[12].mxu0 }
 0x221   : > { %v6620_v11 = vadd.f32 %v6574_v34, %v8928_v40  ;;  %v4947_v48 = vpop.f32.mrb[13].mxu0 }
 0x222   : > { %v5178_v17 = vadd.f32 %v5177_v28, %v5147_v55  ;;  %v6621_v24 = vadd.f32 %v4947_v48, %v8930_v21  ;;  %v5107_v8 = vadd.f32 %v6618_v16, %v5106_v49  ;;  %v6575_v36 = vpop.f32.mrb[14].mxu0 }
 0x223   : > { %5072 = vst [vmem:[%s8940_s22 + $0x70] sm:$0xff] %v6620_v11  ;;  %v6622_v47 = vadd.f32 %v6575_v36, %v8932_v61  ;;  %v4950_v12 = vpop.f32.mrb[15].mxu0  ;;  %v5151_v9 = vmul.f32 %v6620_v11, %v6620_v11 }
 0x224   : > { %5070 = vst [vmem:[%s8940_s22 + $0x60] sm:$0xff] %v6621_v24  ;;  %v5108_v51 = vadd.f32 %v6621_v24, %v5107_v8  ;;  %v5149_v32 = vmul.f32 %v6621_v24, %v6621_v24  ;;  %v5179_v5 = vadd.f32 %v5178_v17, %v5148_v42  ;;  %v6623_v62 = vadd.f32 %v4950_v12, %v8934_v45 }
 0x225   : > { %5073 = vst [vmem:[%s8940_s22 + $0x78] sm:$0xff] %v6622_v47  ;;  %v5152_v14 = vmul.f32 %v6622_v47, %v6622_v47 }
 0x226   : > { %v5180_v40 = vadd.f32 %v5179_v5, %v5149_v32  ;;  %5071 = vst [vmem:[%s8940_s22 + $0x68] sm:$0xff] %v6623_v62  ;;  %v5109_v41 = vadd.f32 %v6623_v62, %v5108_v51  ;;  %v5150_v6 = vmul.f32 %v6623_v62, %v6623_v62 }
 0x228   : > { %v5110_v21 = vadd.f32 %v6620_v11, %v5109_v41  ;;  %v5181_v26 = vadd.f32 %v5180_v40, %v5150_v6  ;;  %v6578_v18 = vpop.f32.mrb[16].mxu0 }
 0x229   : > { %v6386_v33 = vpop.f32.mrb[16].mxu1  ;;  %v4963_v61 = vpop.f32.mrb[17].mxu0 }
 0x22a   : > { %v5182_v10 = vadd.f32 %v5181_v26, %v5151_v9  ;;  %v6624_v39 = vadd.f32 %v6578_v18, %v6386_v33  ;;  %v2823_v50 = vpop.f32.mrb[17].mxu1  ;;  %v5111_v45 = vadd.f32 %v6622_v47, %v5110_v21  ;;  %v6579_v23 = vpop.f32.mrb[18].mxu0 }
 0x22b   : > { %v6625_v3 = vadd.f32 %v4963_v61, %v2823_v50  ;;  %v6387_v58 = vpop.f32.mrb[18].mxu1  ;;  %v4966_v22 = vpop.f32.mrb[19].mxu0 }
 0x22c   : > { %5076 = vst [vmem:[%s8940_s22 + $0x90] sm:$0xff] %v6624_v39  ;;  %v5183_v59 = vadd.f32 %v5182_v10, %v5152_v14  ;;  %v6626_v30 = vadd.f32 %v6579_v23, %v6387_v58  ;;  %v2826_v19 = vpop.f32.mrb[19].mxu1  ;;  %v5155_v63 = vmul.f32 %v6624_v39, %v6624_v39 }
 0x22d   : > { %5074 = vst [vmem:[%s8940_s22 + $0x80] sm:$0xff] %v6625_v3  ;;  %v5112_v52 = vadd.f32 %v6625_v3, %v5111_v45  ;;  %v5153_v15 = vmul.f32 %v6625_v3, %v6625_v3  ;;  %v6627_v43 = vadd.f32 %v4966_v22, %v2826_v19 }
 0x22e   : > { %5077 = vst [vmem:[%s8940_s22 + $0x98] sm:$0xff] %v6626_v30  ;;  %v5156_v7 = vmul.f32 %v6626_v30, %v6626_v30 }
 0x22f   : > { %v5184_v38 = vadd.f32 %v5183_v59, %v5153_v15  ;;  %5075 = vst [vmem:[%s8940_s22 + $0x88] sm:$0xff] %v6627_v43  ;;  %v5113_v56 = vadd.f32 %v6627_v43, %v5112_v52  ;;  %v5154_v1 = vmul.f32 %v6627_v43, %v6627_v43 }
 0x230   : > { %v6582_v31 = vpop.f32.mrb[20].mxu0 }
 0x231   : > { %v5114_v20 = vadd.f32 %v6624_v39, %v5113_v56  ;;  %v5185_v29 = vadd.f32 %v5184_v38, %v5154_v1  ;;  %v6390_v44 = vpop.f32.mrb[20].mxu1  ;;  %v4979_v35 = vpop.f32.mrb[21].mxu0 }
 0x232   : > { %v6628_v4 = vadd.f32 %v6582_v31, %v6390_v44  ;;  %v2839_v57 = vpop.f32.mrb[21].mxu1  ;;  %v6583_v53 = vpop.f32.mrb[22].mxu0 }
 0x233   : > { %v5186_v25 = vadd.f32 %v5185_v29, %v5155_v63  ;;  %v6629_v16 = vadd.f32 %v4979_v35, %v2839_v57  ;;  %v5115_v54 = vadd.f32 %v6626_v30, %v5114_v20  ;;  %v6391_v13 = vpop.f32.mrb[22].mxu1  ;;  %v4982_v60 = vpop.f32.mrb[23].mxu0 }
 0x234   : > { %5080 = vst [vmem:[%s8940_s22 + $0xb0] sm:$0xff] %v6628_v4  ;;  %v6630_v0 = vadd.f32 %v6583_v53, %v6391_v13  ;;  %v2842_v37 = vpop.f32.mrb[23].mxu1  ;;  %v5159_v48 = vmul.f32 %v6628_v4, %v6628_v4 }
 0x235   : > { %5078 = vst [vmem:[%s8940_s22 + $0xa0] sm:$0xff] %v6629_v16  ;;  %v5116_v27 = vadd.f32 %v6629_v16, %v5115_v54  ;;  %v5157_v46 = vmul.f32 %v6629_v16, %v6629_v16  ;;  %v5187_v2 = vadd.f32 %v5186_v25, %v5156_v7  ;;  %v6631_v55 = vadd.f32 %v4982_v60, %v2842_v37 }
 0x236   : > { %5081 = vst [vmem:[%s8940_s22 + $0xb8] sm:$0xff] %v6630_v0  ;;  %v5160_v51 = vmul.f32 %v6630_v0, %v6630_v0 }
 0x237   : > { %v5188_v49 = vadd.f32 %v5187_v2, %v5157_v46  ;;  %5079 = vst [vmem:[%s8940_s22 + $0xa8] sm:$0xff] %v6631_v55  ;;  %v5117_v28 = vadd.f32 %v6631_v55, %v5116_v27  ;;  %v5158_v34 = vmul.f32 %v6631_v55, %v6631_v55 }
 0x238   : > { %v6586_v11 = vpop.f32.mrb[24].mxu0 }
 0x239   : > { %v5118_v42 = vadd.f32 %v6628_v4, %v5117_v28  ;;  %v5189_v17 = vadd.f32 %v5188_v49, %v5158_v34  ;;  %v6394_v24 = vpop.f32.mrb[24].mxu1  ;;  %v4995_v8 = vpop.f32.mrb[25].mxu0 }
 0x23a   : > { %v6632_v36 = vadd.f32 %v6586_v11, %v6394_v24  ;;  %v2855_v47 = vpop.f32.mrb[25].mxu1  ;;  %v6587_v12 = vpop.f32.mrb[26].mxu0  ;;  %v5096_v11 = vld [vmem:[%s8916_s10] sm:$0x1] }
 0x23b   : > { %v5190_v32 = vadd.f32 %v5189_v17, %v5159_v48  ;;  %v6633_v5 = vadd.f32 %v4995_v8, %v2855_v47  ;;  %v5119_v62 = vadd.f32 %v6630_v0, %v5118_v42  ;;  %v6395_v40 = vpop.f32.mrb[26].mxu1  ;;  %v4998_v41 = vpop.f32.mrb[27].mxu0  ;;  %v5136_v17 = vld [vmem:[%s8922_s13] sm:$0x1] }
 0x23c   : > { %5084 = vst [vmem:[%s8940_s22 + $0xd0] sm:$0xff] %v6632_v36  ;;  %v6634_v6 = vadd.f32 %v6587_v12, %v6395_v40  ;;  %v2858_v9 = vpop.f32.mrb[27].mxu1  ;;  %v5163_v50 = vmul.f32 %v6632_v36, %v6632_v36 }
 0x23d   : > { %5082 = vst [vmem:[%s8940_s22 + $0xc0] sm:$0xff] %v6633_v5  ;;  %v5120_v21 = vadd.f32 %v6633_v5, %v5119_v62  ;;  %v5161_v26 = vmul.f32 %v6633_v5, %v6633_v5  ;;  %v5191_v18 = vadd.f32 %v5190_v32, %v5160_v51  ;;  %v6635_v33 = vadd.f32 %v4998_v41, %v2858_v9 }
 0x23e   : > { %5085 = vst [vmem:[%s8940_s22 + $0xd8] sm:$0xff] %v6634_v6  ;;  %v5164_v19 = vmul.f32 %v6634_v6, %v6634_v6 }
 0x23f   : > { %v5192_v61 = vadd.f32 %v5191_v18, %v5161_v26  ;;  %5083 = vst [vmem:[%s8940_s22 + $0xc8] sm:$0xff] %v6635_v33  ;;  %v5121_v14 = vadd.f32 %v6635_v33, %v5120_v21  ;;  %v5162_v10 = vmul.f32 %v6635_v33, %v6635_v33 }
 0x240   : > { %v6590_v39 = vpop.f32.mrb[28].mxu0 }
 0x241   : > { %v5122_v45 = vadd.f32 %v6632_v36, %v5121_v14  ;;  %v5193_v23 = vadd.f32 %v5192_v61, %v5162_v10  ;;  %v6398_v3 = vpop.f32.mrb[28].mxu1  ;;  %v5011_v58 = vpop.f32.mrb[29].mxu0 }
 0x242   : > { %v6636_v22 = vadd.f32 %v6590_v39, %v6398_v3  ;;  %v2871_v59 = vpop.f32.mrb[29].mxu1  ;;  %v6591_v30 = vpop.f32.mrb[30].mxu0 }
 0x243   : > { %v5194_v52 = vadd.f32 %v5193_v23, %v5163_v50  ;;  %v6637_v15 = vadd.f32 %v5011_v58, %v2871_v59  ;;  %v5123_v43 = vadd.f32 %v6634_v6, %v5122_v45  ;;  %v6399_v38 = vpop.f32.mrb[30].mxu1  ;;  %v5014_v56 = vpop.f32.mrb[31].mxu0 }
 0x244   : > { %5088 = vst [vmem:[%s8940_s22 + $0xf0] sm:$0xff] %v6636_v22  ;;  %v6638_v1 = vadd.f32 %v6591_v30, %v6399_v38  ;;  %v2874_v31 = vpop.f32.mrb[31].mxu1  ;;  %v5167_v53 = vmul.f32 %v6636_v22, %v6636_v22 }
 0x245   : > { %5086 = vst [vmem:[%s8940_s22 + $0xe0] sm:$0xff] %v6637_v15  ;;  %v5124_v63 = vadd.f32 %v6637_v15, %v5123_v43  ;;  %v5165_v20 = vmul.f32 %v6637_v15, %v6637_v15  ;;  %v5195_v29 = vadd.f32 %v5194_v52, %v5164_v19  ;;  %v6639_v44 = vadd.f32 %v5014_v56, %v2874_v31 }
 0x246   : > { %5089 = vst [vmem:[%s8940_s22 + $0xf8] sm:$0xff] %v6638_v1  ;;  %v5168_v16 = vmul.f32 %v6638_v1, %v6638_v1 }
 0x247   : > { %v5196_v35 = vadd.f32 %v5195_v29, %v5165_v20  ;;  %5087 = vst [vmem:[%s8940_s22 + $0xe8] sm:$0xff] %v6639_v44  ;;  %v5125_v4 = vadd.f32 %v6639_v44, %v5124_v63  ;;  %v5166_v57 = vmul.f32 %v6639_v44, %v6639_v44 }
 0x249   : > { %v5126_v7 = vadd.f32 %v6636_v22, %v5125_v4  ;;  %v5197_v25 = vadd.f32 %v5196_v35, %v5166_v57 }
 0x24b   : > { %v5127_v54 = vadd.f32 %v6638_v1, %v5126_v7  ;;  %v5198_v13 = vadd.f32 %v5197_v25, %v5167_v53 }
 0x24d   : > { %v5128_v60 = vrot.slane %v5127_v54, 4  ;;  %v5199_v0 = vadd.f32 %v5198_v13, %v5168_v16 }
 0x24f   : > { %v5129_v37 = vadd.f32 %v5128_v60, %v5127_v54  ;;  %v5200_v27 = vrot.slane %v5199_v0, 4 }
 0x251   : > { %v5130_v46 = vrot.slane %v5129_v37, 2  ;;  %v5201_v2 = vadd.f32 %v5200_v27, %v5199_v0 }
 0x253   : > { %v5131_v55 = vadd.f32 %v5130_v46, %v5129_v37  ;;  %v5202_v49 = vrot.slane %v5201_v2, 2 }
 0x255   : > { %v5132_v28 = vrot.slane %v5131_v55, 1  ;;  %v5203_v34 = vadd.f32 %v5202_v49, %v5201_v2 }
 0x257   : > { %v5133_v48 = vadd.f32 %v5132_v28, %v5131_v55  ;;  %v5204_v42 = vrot.slane %v5203_v34, 1 }
 0x259   : > { %v5134_v24 = vadd.f32 %v5133_v48, %v5096_v11  ;;  %v5205_v8 = vadd.f32 %v5204_v42, %v5203_v34 }
 0x25b   : > { %5135 = vst [vmem:[%s8916_s10] sm:$0x1] %v5134_v24  ;;  %v5206_v36 = vadd.f32 %v5205_v8, %v5136_v17 }
 0x25d   : > { %5207 = vst [vmem:[%s8922_s13] sm:$0x1] %v5206_v36 }
 0x25e PF: > { %s15_s17 = sadd.s32 1, %s7102_s17   ;;  %s9063_s15 = smov %s7098_s16 }
 0x25f   : > { %p12_p5 = scmp.ge.s32.totalorder %s15_s17, 4   ;;  %s9064_s16 = smov %s9066_s18 }
 0x261   :  { %14 = sbr.rel (!%p12_p5) target bundleno = 2 (0x2), region = 97 }

</bundles_post_ra>
